<compile_context>
chip_gen: v7x
topology: tpu7x:2x2x1
jax: 0.10.0
libtpu: 0.0.40
codegen_flags: <defaults>
</compile_context>

<pallas_src>
import jax
import jax.numpy as jnp
from jax.experimental import pallas as pl
from jax.experimental.pallas import tpu as pltpu

# ---------------------------------------------------------------------------
# Static network geometry (input NHWC (N, 48, 64, 3), as fc1 = 16*9*13 implies)
# ---------------------------------------------------------------------------
K = 5
C0, C1, C2 = 3, 6, 16
C1P = 8                       # conv1 rows in-kernel: 6 channels + const-1 + zero
H0, W0 = 48, 64
HP1, WP1 = 22, 30             # pooled conv1 grid
HP2, WP2 = 9, 13              # pooled conv2 grid
D1, D1P = K * K * C0, 80      # conv1 contraction: 75 -> 80 (bias row at col 75)
M1, M1P = HP1 * WP1, 768      # conv1 spatial: 660 -> 768 (lane padded)
M2 = HP2 * WP2                # 117
F1, F2, F3, FP = 120, 84, 7, 128
TAPROWS = K * K * C1P         # 200 = conv2 in-kernel patch rows


# ---------------------------------------------------------------------------
# The single fused Pallas kernel
# ---------------------------------------------------------------------------
def net_kernel(p1_ref, w1_ref, w2_ref, g_ref, f1w_ref, f1b_ref,
               f2w_ref, f2b_ref, f3w_ref, f3b_ref, o_ref):
    nl = p1_ref.shape[1] // 4          # batched lanes per pool phase = nb * 768
    nb = nl // M1P                     # batch size (static)

    # ---- conv1 (+bias via ones-row of p1) -> 2x2 max-pool -> ReLU ----------
    acc1 = jnp.dot(w1_ref[...], p1_ref[...],
                   preferred_element_type=jnp.float32)           # (8, 4*nl)
    h1 = jnp.maximum(jnp.maximum(acc1[:, 0:nl], acc1[:, nl:2 * nl]),
                     jnp.maximum(acc1[:, 2 * nl:3 * nl], acc1[:, 3 * nl:4 * nl]))
    h1 = jnp.maximum(h1, 0.0)          # (8, nl) f32; row 6 == 1.0, row 7 == 0.0
    # lane layout: [image n][oh1*30 + ow1] (660 valid of 768 per image)

    # ---- conv2 patches built in-kernel: 25 static lane-shifted copies ------
    # Tap (kh, kw) at conv2-output lane L reads h1 lane L + kh*30 + kw, which
    # for every *valid* output stays inside the same image segment.
    h1p = jnp.concatenate([h1, jnp.zeros((C1P, 128), jnp.float32)], axis=1)
    taps = [h1p[:, kh * WP1 + kw: kh * WP1 + kw + nl]
            for kh in range(K) for kw in range(K)]               # 25 x (8, nl)
    pat2 = jnp.concatenate(taps, axis=0).astype(jnp.bfloat16)    # (200, nl)

    # ---- conv2 (+bias via the constant-1 row of h1) -> pool -> ReLU --------
    acc2 = jnp.dot(w2_ref[...], pat2,
                   preferred_element_type=jnp.float32)           # (16, nl)
    a2p = jnp.concatenate([acc2, jnp.zeros((C2, 128), jnp.float32)], axis=1)
    pool = jnp.maximum(jnp.maximum(a2p[:, 0:nl], a2p[:, 1:nl + 1]),
                       jnp.maximum(a2p[:, WP1:WP1 + nl],
                                   a2p[:, WP1 + 1:WP1 + 1 + nl]))
    h2 = jnp.maximum(pool, 0.0).astype(jnp.bfloat16)             # (16, nl)
    # valid pooled values at lane n*768 + 60*ph + 2*pw; garbage elsewhere is
    # zeroed by the gather matrix below.

    # ---- per-image lane compaction (MXU gather) + NCHW flatten -------------
    rows = []
    for i in range(nb):
        ci = jnp.dot(h2[:, i * M1P:(i + 1) * M1P], g_ref[...],
                     preferred_element_type=jnp.float32)         # (16, 128)
        rows.append(ci.astype(jnp.bfloat16).reshape(1, C2 * FP)) # (1, 2048)
    xf = jnp.concatenate(rows, axis=0) if nb > 1 else rows[0]    # (nb, 2048)

    # ---- fc1 -> ReLU -> fc2 -> ReLU -> fc3 ---------------------------------
    a = jnp.dot(xf, f1w_ref[...], preferred_element_type=jnp.float32)
    a = jnp.maximum(a + f1b_ref[...], 0.0).astype(jnp.bfloat16)
    a = jnp.dot(a, f2w_ref[...], preferred_element_type=jnp.float32)
    a = jnp.maximum(a + f2b_ref[...], 0.0).astype(jnp.bfloat16)
    a = jnp.dot(a, f3w_ref[...], preferred_element_type=jnp.float32)
    o_ref[...] = a + f3b_ref[...]                                # (nb, 128) f32


# ---------------------------------------------------------------------------
# XLA glue: pooled im2col for conv1 only (phase-major, bias row included)
# ---------------------------------------------------------------------------
def build_p1(x):
    """x: (N, 48, 64, C0) -> (80, 4*N*768) bf16.

    Column = phase*(N*768) + n*768 + (oh*30 + ow), phase = dy*2 + dx.
    Row    = (kh*5 + kw)*3 + c for rows < 75; row 75 = 1.0 (bias); 76..79 = 0.
    Value  = x[n, 2*oh + dy + kh, 2*ow + dx + kw, c].
    """
    n = x.shape[0]
    ho, wo = H0 - K + 1, W0 - K + 1                   # 44, 60 (both even)
    taps = [x[:, kh:kh + ho, kw:kw + wo, :] for kh in range(K) for kw in range(K)]
    pat = jnp.stack(taps, axis=3).reshape(n, ho, wo, D1)          # (N,44,60,75)
    pat = pat.reshape(n, HP1, 2, WP1, 2, D1)                      # split pool phases
    pat = pat.transpose(2, 4, 0, 1, 3, 5).reshape(4, n, M1, D1)   # (4,N,660,75)
    pat = jnp.pad(pat, ((0, 0), (0, 0), (0, M1P - M1), (0, 0)))   # m 660 -> 768
    ones = jnp.ones(pat.shape[:3] + (1,), pat.dtype)
    zero = jnp.zeros(pat.shape[:3] + (D1P - D1 - 1,), pat.dtype)
    pat = jnp.concatenate([pat, ones, zero], axis=-1)             # (4,N,768,80)
    pat = pat.transpose(3, 0, 1, 2).reshape(D1P, 4 * n * M1P)
    return pat.astype(jnp.bfloat16)


# ---------------------------------------------------------------------------
# Forward pass (mirrors Net.forward); `prep` holds the one-time re-laid weights
# ---------------------------------------------------------------------------
def net_forward(x, prep):
    nb = x.shape[0]
    nl = nb * M1P
    p1 = build_p1(x.astype(jnp.bfloat16))                         # (80, 4*nl)

    flops = 2 * (C1P * D1P * 4 * nl          # conv1
                 + C2 * TAPROWS * nl         # conv2
                 + nb * C2 * M1P * FP        # lane compaction
                 + nb * (C2 * FP) * FP       # fc1
                 + 2 * nb * FP * FP)         # fc2 + fc3
    weight_bytes = sum(int(v.size) * v.dtype.itemsize for v in prep.values())
    bytes_accessed = int(p1.size) * 2 + weight_bytes + nb * FP * 4

    out = pl.pallas_call(
        net_kernel,
        out_shape=jax.ShapeDtypeStruct((nb, FP), jnp.float32),
        cost_estimate=pl.CostEstimate(flops=int(flops), transcendentals=0,
                                      bytes_accessed=int(bytes_accessed)),
        compiler_params=pltpu.CompilerParams(vmem_limit_bytes=32 * 1024 * 1024),
    )(p1, prep["conv1_wt"], prep["conv2_wt"], prep["gather"],
      prep["fc1_w"], prep["fc1_b"], prep["fc2_w"], prep["fc2_b"],
      prep["fc3_w"], prep["fc3_b"])
    return out[:, :F3]                                            # (N, 7) f32


# ---------------------------------------------------------------------------
# One-time parameter preparation (outside the jitted forward)
# ---------------------------------------------------------------------------
def prepare_params(params):
    # conv1 -> (8, 80): rows 0..5 = [W1 in (kh,kw,cin) order | b1 | 0000];
    # row 6 = e_75 (emits the constant-1 channel that carries conv2's bias);
    # row 7 = 0.
    w1 = jnp.transpose(params["conv1_w"], (0, 2, 3, 1)).reshape(C1, D1)
    w1 = jnp.concatenate([w1, params["conv1_b"].reshape(C1, 1),
                          jnp.zeros((C1, D1P - D1 - 1))], axis=1)
    ones_row = jnp.zeros((1, D1P)).at[0, D1].set(1.0)
    conv1_wt = jnp.concatenate([w1, ones_row, jnp.zeros((1, D1P))], axis=0)

    # conv2 -> (16, 200): col (kh*5+kw)*8 + cin = W2[cout,cin,kh,kw];
    # col 6 (tap 0, the constant-1 row of h1) = b2; remaining cols 0.
    w2 = jnp.transpose(params["conv2_w"], (0, 2, 3, 1))           # (16,5,5,6)
    w2 = jnp.pad(w2, ((0, 0), (0, 0), (0, 0), (0, C1P - C1)))     # (16,5,5,8)
    w2 = w2.reshape(C2, TAPROWS)
    conv2_wt = w2.at[:, C1].set(params["conv2_b"])

    # Lane-compaction gather matrix: G[l, m] = 1 iff m < 117 and
    # l == 60*(m//13) + 2*(m%13)   (pooled conv2 positions in h2's lane layout).
    m = jnp.arange(FP)
    src = 2 * WP1 * (m // WP2) + 2 * (m % WP2)
    gather = (jnp.arange(M1P)[:, None] == src[None, :]) & (m[None, :] < M2)

    # fc1 consumes the compacted NCHW flatten: input index = c*128 + (ph*13+pw).
    # Padded positions (m >= 117) of the compacted activation are exactly 0, so
    # the zero-padded fc1 rows there are never "activated" — do not change the
    # flatten order or this padding without updating the gather matrix too.
    w1fc = params["fc1_w"].reshape(F1, C2, M2)
    w1fc = jnp.pad(w1fc, ((0, FP - F1), (0, 0), (0, FP - M2)))
    fc1_w = w1fc.reshape(FP, C2 * FP).T
    fc2_w = jnp.pad(params["fc2_w"], ((0, FP - F2), (0, FP - F1))).T
    fc3_w = jnp.pad(params["fc3_w"], ((0, FP - F3), (0, FP - F2))).T

    bf = lambda a: a.astype(jnp.bfloat16)
    return {
        "conv1_wt": bf(conv1_wt), "conv2_wt": bf(conv2_wt), "gather": bf(gather),
        "fc1_w": bf(fc1_w), "fc2_w": bf(fc2_w), "fc3_w": bf(fc3_w),
        "fc1_b": jnp.pad(params["fc1_b"], (0, FP - F1)).reshape(1, FP).astype(jnp.float32),
        "fc2_b": jnp.pad(params["fc2_b"], (0, FP - F2)).reshape(1, FP).astype(jnp.float32),
        "fc3_b": jnp.pad(params["fc3_b"], (0, FP - F3)).reshape(1, FP).astype(jnp.float32),
    }


# ---------------------------------------------------------------------------
# Deterministic parameter init (PyTorch default-style uniform(+-1/sqrt(fan_in)))
# ---------------------------------------------------------------------------
def init_params(key):
    def uni(k, shape, fan_in):
        bound = 1.0 / (float(fan_in) ** 0.5)
        return jax.random.uniform(k, shape, jnp.float32, -bound, bound)

    ks = jax.random.split(key, 10)
    return {
        "conv1_w": uni(ks[0], (C1, C0, K, K), C0 * K * K),
        "conv1_b": uni(ks[1], (C1,), C0 * K * K),
        "conv2_w": uni(ks[2], (C2, C1, K, K), C1 * K * K),
        "conv2_b": uni(ks[3], (C2,), C1 * K * K),
        "fc1_w":   uni(ks[4], (F1, C2 * M2), C2 * M2),
        "fc1_b":   uni(ks[5], (F1,), C2 * M2),
        "fc2_w":   uni(ks[6], (F2, F1), F1),
        "fc2_b":   uni(ks[7], (F2,), F1),
        "fc3_w":   uni(ks[8], (F3, F2), F2),
        "fc3_b":   uni(ks[9], (F3,), F2),
    }


if __name__ == "__main__":
    key = jax.random.PRNGKey(0)
    kx, kp = jax.random.split(key)
    # NHWC input (N, 48, 64, 3): smallest spatial size consistent with
    # fc1 = Linear(16*9*13, 120).
    x = jax.random.normal(kx, (2, H0, W0, C0), jnp.float32)
    params = init_params(kp)
    prep = prepare_params(params)      # one-time weight re-layout, outside the jit

    fwd = jax.jit(net_forward)
    out = jax.block_until_ready(fwd(x, prep))
    assert out.shape == (2, F3) and out.dtype == jnp.float32
    print("KERNEL_OK")
</pallas_src>

<mosaic_0001>
module attributes {stable_mosaic.version = 11 : i64} {
  func.func @net_kernel(%arg0: memref<80x6144xbf16, #tpu.memory_space<vmem>>, %arg1: memref<8x80xbf16, #tpu.memory_space<vmem>>, %arg2: memref<16x200xbf16, #tpu.memory_space<vmem>>, %arg3: memref<768x128xbf16, #tpu.memory_space<vmem>>, %arg4: memref<2048x128xbf16, #tpu.memory_space<vmem>>, %arg5: memref<1x128xf32, #tpu.memory_space<vmem>>, %arg6: memref<128x128xbf16, #tpu.memory_space<vmem>>, %arg7: memref<1x128xf32, #tpu.memory_space<vmem>>, %arg8: memref<128x128xbf16, #tpu.memory_space<vmem>>, %arg9: memref<1x128xf32, #tpu.memory_space<vmem>>, %arg10: memref<2x128xf32, #tpu.memory_space<vmem>>) attributes {dimension_semantics = [], scalar_prefetch = 0 : i64, scratch_operands = 0 : i64, tpu.core_type = #tpu.core_type<tc>} {
    %c0 = arith.constant 0 : index
    %c0_0 = arith.constant 0 : index
    %0 = vector.load %arg1[%c0, %c0_0] : memref<8x80xbf16, #tpu.memory_space<vmem>>, vector<8x80xbf16>
    %c0_1 = arith.constant 0 : index
    %c0_2 = arith.constant 0 : index
    %1 = vector.load %arg0[%c0_1, %c0_2] : memref<80x6144xbf16, #tpu.memory_space<vmem>>, vector<80x6144xbf16>
    %cst = arith.constant dense<0.000000e+00> : vector<8x6144xf32>
    %2 = tpu.matmul %0, %1, %cst {dimension_numbers = #tpu.dot_dimension_numbers<[1], [0], [0], [1], [0, 0, 1, 1], [], []>} : vector<8x80xbf16>, vector<80x6144xbf16>, vector<8x6144xf32> -> vector<8x6144xf32>
    %3 = vector.extract_strided_slice %2 {offsets = [0, 0], sizes = [8, 1536], strides = [1, 1]} : vector<8x6144xf32> to vector<8x1536xf32>
    %4 = vector.extract_strided_slice %2 {offsets = [0, 1536], sizes = [8, 1536], strides = [1, 1]} : vector<8x6144xf32> to vector<8x1536xf32>
    %5 = arith.maximumf %3, %4 : vector<8x1536xf32>
    %6 = vector.extract_strided_slice %2 {offsets = [0, 3072], sizes = [8, 1536], strides = [1, 1]} : vector<8x6144xf32> to vector<8x1536xf32>
    %7 = vector.extract_strided_slice %2 {offsets = [0, 4608], sizes = [8, 1536], strides = [1, 1]} : vector<8x6144xf32> to vector<8x1536xf32>
    %8 = arith.maximumf %6, %7 : vector<8x1536xf32>
    %9 = arith.maximumf %5, %8 : vector<8x1536xf32>
    %cst_3 = arith.constant 0.000000e+00 : f32
    %10 = vector.broadcast %cst_3 : f32 to vector<8x1536xf32>
    %11 = arith.maximumf %9, %10 : vector<8x1536xf32>
    %cst_4 = arith.constant 0.000000e+00 : f32
    %12 = vector.broadcast %cst_4 : f32 to vector<8x128xf32>
    %13 = tpu.concatenate %11, %12 in 1 : vector<8x1536xf32>, vector<8x128xf32> -> vector<8x1664xf32>
    %14 = vector.extract_strided_slice %13 {offsets = [0, 0], sizes = [8, 1536], strides = [1, 1]} : vector<8x1664xf32> to vector<8x1536xf32>
    %15 = vector.extract_strided_slice %13 {offsets = [0, 1], sizes = [8, 1536], strides = [1, 1]} : vector<8x1664xf32> to vector<8x1536xf32>
    %16 = vector.extract_strided_slice %13 {offsets = [0, 2], sizes = [8, 1536], strides = [1, 1]} : vector<8x1664xf32> to vector<8x1536xf32>
    %17 = vector.extract_strided_slice %13 {offsets = [0, 3], sizes = [8, 1536], strides = [1, 1]} : vector<8x1664xf32> to vector<8x1536xf32>
    %18 = vector.extract_strided_slice %13 {offsets = [0, 4], sizes = [8, 1536], strides = [1, 1]} : vector<8x1664xf32> to vector<8x1536xf32>
    %19 = vector.extract_strided_slice %13 {offsets = [0, 30], sizes = [8, 1536], strides = [1, 1]} : vector<8x1664xf32> to vector<8x1536xf32>
    %20 = vector.extract_strided_slice %13 {offsets = [0, 31], sizes = [8, 1536], strides = [1, 1]} : vector<8x1664xf32> to vector<8x1536xf32>
    %21 = vector.extract_strided_slice %13 {offsets = [0, 32], sizes = [8, 1536], strides = [1, 1]} : vector<8x1664xf32> to vector<8x1536xf32>
    %22 = vector.extract_strided_slice %13 {offsets = [0, 33], sizes = [8, 1536], strides = [1, 1]} : vector<8x1664xf32> to vector<8x1536xf32>
    %23 = vector.extract_strided_slice %13 {offsets = [0, 34], sizes = [8, 1536], strides = [1, 1]} : vector<8x1664xf32> to vector<8x1536xf32>
    %24 = vector.extract_strided_slice %13 {offsets = [0, 60], sizes = [8, 1536], strides = [1, 1]} : vector<8x1664xf32> to vector<8x1536xf32>
    %25 = vector.extract_strided_slice %13 {offsets = [0, 61], sizes = [8, 1536], strides = [1, 1]} : vector<8x1664xf32> to vector<8x1536xf32>
    %26 = vector.extract_strided_slice %13 {offsets = [0, 62], sizes = [8, 1536], strides = [1, 1]} : vector<8x1664xf32> to vector<8x1536xf32>
    %27 = vector.extract_strided_slice %13 {offsets = [0, 63], sizes = [8, 1536], strides = [1, 1]} : vector<8x1664xf32> to vector<8x1536xf32>
    %28 = vector.extract_strided_slice %13 {offsets = [0, 64], sizes = [8, 1536], strides = [1, 1]} : vector<8x1664xf32> to vector<8x1536xf32>
    %29 = vector.extract_strided_slice %13 {offsets = [0, 90], sizes = [8, 1536], strides = [1, 1]} : vector<8x1664xf32> to vector<8x1536xf32>
    %30 = vector.extract_strided_slice %13 {offsets = [0, 91], sizes = [8, 1536], strides = [1, 1]} : vector<8x1664xf32> to vector<8x1536xf32>
    %31 = vector.extract_strided_slice %13 {offsets = [0, 92], sizes = [8, 1536], strides = [1, 1]} : vector<8x1664xf32> to vector<8x1536xf32>
    %32 = vector.extract_strided_slice %13 {offsets = [0, 93], sizes = [8, 1536], strides = [1, 1]} : vector<8x1664xf32> to vector<8x1536xf32>
    %33 = vector.extract_strided_slice %13 {offsets = [0, 94], sizes = [8, 1536], strides = [1, 1]} : vector<8x1664xf32> to vector<8x1536xf32>
    %34 = vector.extract_strided_slice %13 {offsets = [0, 120], sizes = [8, 1536], strides = [1, 1]} : vector<8x1664xf32> to vector<8x1536xf32>
    %35 = vector.extract_strided_slice %13 {offsets = [0, 121], sizes = [8, 1536], strides = [1, 1]} : vector<8x1664xf32> to vector<8x1536xf32>
    %36 = vector.extract_strided_slice %13 {offsets = [0, 122], sizes = [8, 1536], strides = [1, 1]} : vector<8x1664xf32> to vector<8x1536xf32>
    %37 = vector.extract_strided_slice %13 {offsets = [0, 123], sizes = [8, 1536], strides = [1, 1]} : vector<8x1664xf32> to vector<8x1536xf32>
    %38 = vector.extract_strided_slice %13 {offsets = [0, 124], sizes = [8, 1536], strides = [1, 1]} : vector<8x1664xf32> to vector<8x1536xf32>
    %39 = tpu.concatenate %14, %15, %16, %17, %18, %19, %20, %21, %22, %23, %24, %25, %26, %27, %28, %29 in 0 : vector<8x1536xf32>, vector<8x1536xf32>, vector<8x1536xf32>, vector<8x1536xf32>, vector<8x1536xf32>, vector<8x1536xf32>, vector<8x1536xf32>, vector<8x1536xf32>, vector<8x1536xf32>, vector<8x1536xf32>, vector<8x1536xf32>, vector<8x1536xf32>, vector<8x1536xf32>, vector<8x1536xf32>, vector<8x1536xf32>, vector<8x1536xf32> -> vector<128x1536xf32>
    %40 = tpu.concatenate %30, %31, %32, %33, %34, %35, %36, %37, %38 in 0 : vector<8x1536xf32>, vector<8x1536xf32>, vector<8x1536xf32>, vector<8x1536xf32>, vector<8x1536xf32>, vector<8x1536xf32>, vector<8x1536xf32>, vector<8x1536xf32>, vector<8x1536xf32> -> vector<72x1536xf32>
    %41 = tpu.concatenate %39, %40 in 0 : vector<128x1536xf32>, vector<72x1536xf32> -> vector<200x1536xf32>
    %42 = arith.truncf %41 : vector<200x1536xf32> to vector<200x1536xbf16>
    %c0_5 = arith.constant 0 : index
    %c0_6 = arith.constant 0 : index
    %43 = vector.load %arg2[%c0_5, %c0_6] : memref<16x200xbf16, #tpu.memory_space<vmem>>, vector<16x200xbf16>
    %cst_7 = arith.constant dense<0.000000e+00> : vector<16x1536xf32>
    %44 = tpu.matmul %43, %42, %cst_7 {dimension_numbers = #tpu.dot_dimension_numbers<[1], [0], [0], [1], [0, 0, 1, 1], [], []>} : vector<16x200xbf16>, vector<200x1536xbf16>, vector<16x1536xf32> -> vector<16x1536xf32>
    %cst_8 = arith.constant 0.000000e+00 : f32
    %45 = vector.broadcast %cst_8 : f32 to vector<16x128xf32>
    %46 = tpu.concatenate %44, %45 in 1 : vector<16x1536xf32>, vector<16x128xf32> -> vector<16x1664xf32>
    %47 = vector.extract_strided_slice %46 {offsets = [0, 0], sizes = [16, 1536], strides = [1, 1]} : vector<16x1664xf32> to vector<16x1536xf32>
    %48 = vector.extract_strided_slice %46 {offsets = [0, 1], sizes = [16, 1536], strides = [1, 1]} : vector<16x1664xf32> to vector<16x1536xf32>
    %49 = arith.maximumf %47, %48 : vector<16x1536xf32>
    %50 = vector.extract_strided_slice %46 {offsets = [0, 30], sizes = [16, 1536], strides = [1, 1]} : vector<16x1664xf32> to vector<16x1536xf32>
    %51 = vector.extract_strided_slice %46 {offsets = [0, 31], sizes = [16, 1536], strides = [1, 1]} : vector<16x1664xf32> to vector<16x1536xf32>
    %52 = arith.maximumf %50, %51 : vector<16x1536xf32>
    %53 = arith.maximumf %49, %52 : vector<16x1536xf32>
    %cst_9 = arith.constant 0.000000e+00 : f32
    %54 = vector.broadcast %cst_9 : f32 to vector<16x1536xf32>
    %55 = arith.maximumf %53, %54 : vector<16x1536xf32>
    %56 = arith.truncf %55 : vector<16x1536xf32> to vector<16x1536xbf16>
    %57 = vector.extract_strided_slice %56 {offsets = [0, 0], sizes = [16, 768], strides = [1, 1]} : vector<16x1536xbf16> to vector<16x768xbf16>
    %c0_10 = arith.constant 0 : index
    %c0_11 = arith.constant 0 : index
    %58 = vector.load %arg3[%c0_10, %c0_11] : memref<768x128xbf16, #tpu.memory_space<vmem>>, vector<768x128xbf16>
    %cst_12 = arith.constant dense<0.000000e+00> : vector<16x128xf32>
    %59 = tpu.matmul %57, %58, %cst_12 {dimension_numbers = #tpu.dot_dimension_numbers<[1], [0], [0], [1], [0, 0, 1, 1], [], []>} : vector<16x768xbf16>, vector<768x128xbf16>, vector<16x128xf32> -> vector<16x128xf32>
    %60 = arith.truncf %59 : vector<16x128xf32> to vector<16x128xbf16>
    %61 = vector.shape_cast %60 : vector<16x128xbf16> to vector<1x2048xbf16>
    %62 = vector.extract_strided_slice %56 {offsets = [0, 768], sizes = [16, 768], strides = [1, 1]} : vector<16x1536xbf16> to vector<16x768xbf16>
    %c0_13 = arith.constant 0 : index
    %c0_14 = arith.constant 0 : index
    %63 = vector.load %arg3[%c0_13, %c0_14] : memref<768x128xbf16, #tpu.memory_space<vmem>>, vector<768x128xbf16>
    %cst_15 = arith.constant dense<0.000000e+00> : vector<16x128xf32>
    %64 = tpu.matmul %62, %63, %cst_15 {dimension_numbers = #tpu.dot_dimension_numbers<[1], [0], [0], [1], [0, 0, 1, 1], [], []>} : vector<16x768xbf16>, vector<768x128xbf16>, vector<16x128xf32> -> vector<16x128xf32>
    %65 = arith.truncf %64 : vector<16x128xf32> to vector<16x128xbf16>
    %66 = vector.shape_cast %65 : vector<16x128xbf16> to vector<1x2048xbf16>
    %67 = tpu.concatenate %61, %66 in 0 : vector<1x2048xbf16>, vector<1x2048xbf16> -> vector<2x2048xbf16>
    %c0_16 = arith.constant 0 : index
    %c0_17 = arith.constant 0 : index
    %68 = vector.load %arg4[%c0_16, %c0_17] : memref<2048x128xbf16, #tpu.memory_space<vmem>>, vector<2048x128xbf16>
    %cst_18 = arith.constant dense<0.000000e+00> : vector<2x128xf32>
    %69 = tpu.matmul %67, %68, %cst_18 {dimension_numbers = #tpu.dot_dimension_numbers<[1], [0], [0], [1], [0, 0, 1, 1], [], []>} : vector<2x2048xbf16>, vector<2048x128xbf16>, vector<2x128xf32> -> vector<2x128xf32>
    %c0_19 = arith.constant 0 : index
    %c0_20 = arith.constant 0 : index
    %70 = vector.load %arg5[%c0_19, %c0_20] : memref<1x128xf32, #tpu.memory_space<vmem>>, vector<1x128xf32>
    %71 = vector.broadcast %70 : vector<1x128xf32> to vector<2x128xf32>
    %72 = arith.addf %69, %71 : vector<2x128xf32>
    %cst_21 = arith.constant 0.000000e+00 : f32
    %73 = vector.broadcast %cst_21 : f32 to vector<2x128xf32>
    %74 = arith.maximumf %72, %73 : vector<2x128xf32>
    %75 = arith.truncf %74 : vector<2x128xf32> to vector<2x128xbf16>
    %c0_22 = arith.constant 0 : index
    %c0_23 = arith.constant 0 : index
    %76 = vector.load %arg6[%c0_22, %c0_23] : memref<128x128xbf16, #tpu.memory_space<vmem>>, vector<128x128xbf16>
    %cst_24 = arith.constant dense<0.000000e+00> : vector<2x128xf32>
    %77 = tpu.matmul %75, %76, %cst_24 {dimension_numbers = #tpu.dot_dimension_numbers<[1], [0], [0], [1], [0, 0, 1, 1], [], []>} : vector<2x128xbf16>, vector<128x128xbf16>, vector<2x128xf32> -> vector<2x128xf32>
    %c0_25 = arith.constant 0 : index
    %c0_26 = arith.constant 0 : index
    %78 = vector.load %arg7[%c0_25, %c0_26] : memref<1x128xf32, #tpu.memory_space<vmem>>, vector<1x128xf32>
    %79 = vector.broadcast %78 : vector<1x128xf32> to vector<2x128xf32>
    %80 = arith.addf %77, %79 : vector<2x128xf32>
    %cst_27 = arith.constant 0.000000e+00 : f32
    %81 = vector.broadcast %cst_27 : f32 to vector<2x128xf32>
    %82 = arith.maximumf %80, %81 : vector<2x128xf32>
    %83 = arith.truncf %82 : vector<2x128xf32> to vector<2x128xbf16>
    %c0_28 = arith.constant 0 : index
    %c0_29 = arith.constant 0 : index
    %84 = vector.load %arg8[%c0_28, %c0_29] : memref<128x128xbf16, #tpu.memory_space<vmem>>, vector<128x128xbf16>
    %cst_30 = arith.constant dense<0.000000e+00> : vector<2x128xf32>
    %85 = tpu.matmul %83, %84, %cst_30 {dimension_numbers = #tpu.dot_dimension_numbers<[1], [0], [0], [1], [0, 0, 1, 1], [], []>} : vector<2x128xbf16>, vector<128x128xbf16>, vector<2x128xf32> -> vector<2x128xf32>
    %c0_31 = arith.constant 0 : index
    %c0_32 = arith.constant 0 : index
    %86 = vector.load %arg9[%c0_31, %c0_32] : memref<1x128xf32, #tpu.memory_space<vmem>>, vector<1x128xf32>
    %87 = vector.broadcast %86 : vector<1x128xf32> to vector<2x128xf32>
    %88 = arith.addf %85, %87 : vector<2x128xf32>
    %c0_33 = arith.constant 0 : index
    %c0_34 = arith.constant 0 : index
    %89 = vector.load %arg10[%c0_33, %c0_34] : memref<2x128xf32, #tpu.memory_space<vmem>>, vector<2x128xf32>
    tpu.vector_store %arg10[%c0_33, %c0_34], %88 {strides = array<i32>} : memref<2x128xf32, #tpu.memory_space<vmem>>, vector<2x128xf32>,
    return
  }
}

</mosaic_0001>

<bundles_post_ra>
// kernel: net_forward.1
= control target key start
LH: loop header
LB: loop body
LE: loop exit
PB: predicated region body
PF: predicated region fallthrough
CT: control target
= control target key end

     0   :  { %v8966_v8 = vmov 0   ;;  %vm1478_vm0 = vcmask 654336   ;;  %s13400_s0 = inlined_call_operand.vmem [shape: bf16[80,6144], index: 0, kind: input, shape index: {}]   ;;  %s13401_s1 = inlined_call_operand.vmem [shape: bf16[8,80], index: 1, kind: input, shape index: {}]   ;;  %s13402_s2 = inlined_call_operand.vmem [shape: bf16[16,200], index: 2, kind: input, shape index: {}]   ;;  %s13403_s3 = inlined_call_operand.vmem [shape: bf16[768,128], index: 3, kind: input, shape index: {}]   ;;  %s13404_s4 = inlined_call_operand.vmem [shape: bf16[2048,128], index: 4, kind: input, shape index: {}]   ;;  %s13405_s5 = inlined_call_operand.vmem [shape: f32[1,128], index: 5, kind: input, shape index: {}]   ;;  %s13406_s6 = inlined_call_operand.vmem [shape: bf16[128,128], index: 6, kind: input, shape index: {}]   ;;  %s13407_s7 = inlined_call_operand.vmem [shape: f32[1,128], index: 7, kind: input, shape index: {}]   ;;  %s13408_s8 = inlined_call_operand.vmem [shape: bf16[128,128], index: 8, kind: input, shape index: {}]   ;;  %s13409_s9 = inlined_call_operand.vmem [shape: f32[1,128], index: 9, kind: input, shape index: {}]   ;;  %s13410_s10 = inlined_call_operand.hbm [shape: f32[2,128], index: 10, kind: output, shape index: {}]  }
   0x1   :  { %v38_v0 = vld [vmem:[%s13400_s0] sm:$0xff]  ;;  %v39_v2 = vld [vmem:[%s13400_s0 + $0x8] sm:$0xff]  ;;  %1514 = vmatprep.mubr.bf16.mxu0 %v8966_v8  ;;  %1555 = vmatprep.mubr.bf16.mxu1 %v8966_v8  ;;  %v40_v39 = vld [vmem:[%s13400_s0 + $0x10] sm:$0xff] }
   0x2   :  { %v62_v1 = vld [vmem:[%s13400_s0 + $0xc0] sm:$0xff]  ;;  %v63_v4 = vld [vmem:[%s13400_s0 + $0xc8] sm:$0xff]  ;;  %v64_v40 = vld [vmem:[%s13400_s0 + $0xd0] sm:$0xff] }
   0x3   :  { %v6991_v3 = vcombine.high %v38_v0, %v62_v1  ;;  %v6990_v5 = vcombine.low %v38_v0, %v62_v1  ;;  %v86_v6 = vld [vmem:[%s13400_s0 + $0x180] sm:$0xff]  ;;  %v6993_v9 = vcombine.high %v39_v2, %v63_v4  ;;  %v6992_v10 = vcombine.low %v39_v2, %v63_v4  ;;  %v87_v12 = vld [vmem:[%s13400_s0 + $0x188] sm:$0xff]  ;;  %v41_v41 = vld [vmem:[%s13400_s0 + $0x18] sm:$0xff] }
   0x4   :  { %v110_v7 = vld [vmem:[%s13400_s0 + $0x240] sm:$0xff]  ;;  %v111_v13 = vld [vmem:[%s13400_s0 + $0x248] sm:$0xff]  ;;  %v65_v42 = vld [vmem:[%s13400_s0 + $0xd8] sm:$0xff]  ;;  %v6995_v45 = vcombine.high %v40_v39, %v64_v40  ;;  %v6994_v52 = vcombine.low %v40_v39, %v64_v40 }
   0x5   :  { %v7039_v11 = vcombine.high %v86_v6, %v110_v7  ;;  %v134_v14 = vld [vmem:[%s13400_s0 + $0x300] sm:$0xff]  ;;  %1482 = vmatprep.subr.bf16.mxu0 %v6991_v3  ;;  %v7041_v15 = vcombine.high %v87_v12, %v111_v13  ;;  %v135_v17 = vld [vmem:[%s13400_s0 + $0x308] sm:$0xff]  ;;  %1523 = vmatprep.subr.bf16.mxu1 %v6993_v9  ;;  %v7038_v19 = vcombine.low %v86_v6, %v110_v7  ;;  %v88_v47 = vld [vmem:[%s13400_s0 + $0x190] sm:$0xff] }
   0x6   :  { %v158_v16 = vld [vmem:[%s13400_s0 + $0x3c0] sm:$0xff]  ;;  %v159_v18 = vld [vmem:[%s13400_s0 + $0x3c8] sm:$0xff]  ;;  %1483 = vmatpush1.bf16.msra.mxu0 %v6990_v5  ;;  %1524 = vmatpush1.bf16.msra.mxu1 %v6992_v10  ;;  %v7040_v20 = vcombine.low %v87_v12, %v111_v13  ;;  %v6997_v46 = vcombine.high %v41_v41, %v65_v42  ;;  %v112_v48 = vld [vmem:[%s13400_s0 + $0x250] sm:$0xff]  ;;  %v6996_v53 = vcombine.low %v41_v41, %v65_v42 }
   0x7   :  { %1484 = vmatprep.subr.bf16.mxu0 %v7039_v11  ;;  %v7087_v21 = vcombine.high %v134_v14, %v158_v16  ;;  %1525 = vmatprep.subr.bf16.mxu1 %v7041_v15  ;;  %v7089_v22 = vcombine.high %v135_v17, %v159_v18  ;;  %v182_v23 = vld [vmem:[%s13400_s0 + $0x480] sm:$0xff]  ;;  %v183_v25 = vld [vmem:[%s13400_s0 + $0x488] sm:$0xff]  ;;  %v7086_v27 = vcombine.low %v134_v14, %v158_v16  ;;  %v89_v49 = vld [vmem:[%s13400_s0 + $0x198] sm:$0xff] }
   0x8   :  { %v206_v24 = vld [vmem:[%s13400_s0 + $0x540] sm:$0xff]  ;;  %v207_v26 = vld [vmem:[%s13400_s0 + $0x548] sm:$0xff]  ;;  %v7088_v28 = vcombine.low %v135_v17, %v159_v18  ;;  %v113_v50 = vld [vmem:[%s13400_s0 + $0x258] sm:$0xff]  ;;  %v7043_v54 = vcombine.high %v88_v47, %v112_v48  ;;  %v7042_v60 = vcombine.low %v88_v47, %v112_v48 }
   0x9   :  { %v7135_v29 = vcombine.high %v182_v23, %v206_v24  ;;  %v7137_v30 = vcombine.high %v183_v25, %v207_v26  ;;  %v230_v31 = vld [vmem:[%s13400_s0 + $0x600] sm:$0xff]  ;;  %v231_v33 = vld [vmem:[%s13400_s0 + $0x608] sm:$0xff]  ;;  %v7134_v35 = vcombine.low %v182_v23, %v206_v24  ;;  %v7136_v36 = vcombine.low %v183_v25, %v207_v26  ;;  %v136_v56 = vld [vmem:[%s13400_s0 + $0x310] sm:$0xff] }
   0xa   :  { %1485 = vmatpush1.bf16.msra.mxu0 %v7038_v19  ;;  %1526 = vmatpush1.bf16.msra.mxu1 %v7040_v20  ;;  %v254_v32 = vld [vmem:[%s13400_s0 + $0x6c0] sm:$0xff]  ;;  %v255_v34 = vld [vmem:[%s13400_s0 + $0x6c8] sm:$0xff]  ;;  %v7045_v55 = vcombine.high %v89_v49, %v113_v50  ;;  %v160_v57 = vld [vmem:[%s13400_s0 + $0x3d0] sm:$0xff]  ;;  %v7044_v61 = vcombine.low %v89_v49, %v113_v50 }
   0xb   :  { %1486 = vmatprep.subr.bf16.mxu0 %v7087_v21  ;;  %1527 = vmatprep.subr.bf16.mxu1 %v7089_v22  ;;  %v7183_v37 = vcombine.high %v230_v31, %v254_v32  ;;  %v7185_v38 = vcombine.high %v231_v33, %v255_v34  ;;  %v7182_v43 = vcombine.low %v230_v31, %v254_v32  ;;  %v9131_v51 = vld [vmem:[%s13401_s1] sm:$0xf]  ;;  %v137_v58 = vld [vmem:[%s13400_s0 + $0x318] sm:$0xff]  ;;  %v184_v0 = vld [vmem:[%s13400_s0 + $0x490] sm:$0xff] }
   0xc   :  { %v7184_v44 = vcombine.low %v231_v33, %v255_v34  ;;  %v161_v59 = vld [vmem:[%s13400_s0 + $0x3d8] sm:$0xff]  ;;  %v7091_v62 = vcombine.high %v136_v56, %v160_v57  ;;  %v208_v1 = vld [vmem:[%s13400_s0 + $0x550] sm:$0xff]  ;;  %v7090_v4 = vcombine.low %v136_v56, %v160_v57  ;;  %v42_v17 = vld [vmem:[%s13400_s0 + $0x20] sm:$0xff] }
   0xd   :  { %v7093_v63 = vcombine.high %v137_v58, %v161_v59  ;;  %v185_v2 = vld [vmem:[%s13400_s0 + $0x498] sm:$0xff]  ;;  %v7092_v5 = vcombine.low %v137_v58, %v161_v59  ;;  %v7139_v6 = vcombine.high %v184_v0, %v208_v1  ;;  %v232_v9 = vld [vmem:[%s13400_s0 + $0x610] sm:$0xff]  ;;  %v7138_v13 = vcombine.low %v184_v0, %v208_v1  ;;  %v66_v18 = vld [vmem:[%s13400_s0 + $0xe0] sm:$0xff] }
   0xe   :  { %1487 = vmatpush1.bf16.msra.mxu0 %v7086_v27  ;;  %1528 = vmatpush1.bf16.msra.mxu1 %v7088_v28  ;;  %v209_v3 = vld [vmem:[%s13400_s0 + $0x558] sm:$0xff]  ;;  %v256_v10 = vld [vmem:[%s13400_s0 + $0x6d0] sm:$0xff]  ;;  %v43_v19 = vld [vmem:[%s13400_s0 + $0x28] sm:$0xff]  ;;  %v6999_v23 = vcombine.high %v42_v17, %v66_v18 }
   0xf   :  { %1488 = vmatprep.subr.bf16.mxu0 %v7135_v29  ;;  %1529 = vmatprep.subr.bf16.mxu1 %v7137_v30  ;;  %v7141_v7 = vcombine.high %v185_v2, %v209_v3  ;;  %v233_v11 = vld [vmem:[%s13400_s0 + $0x618] sm:$0xff]  ;;  %v7140_v14 = vcombine.low %v185_v2, %v209_v3  ;;  %v7187_v15 = vcombine.high %v232_v9, %v256_v10  ;;  %v67_v20 = vld [vmem:[%s13400_s0 + $0xe8] sm:$0xff]  ;;  %v90_v25 = vld [vmem:[%s13400_s0 + $0x1a0] sm:$0xff] }
  0x10   :  { %v257_v12 = vld [vmem:[%s13400_s0 + $0x6d8] sm:$0xff]  ;;  %v7186_v21 = vcombine.low %v232_v9, %v256_v10  ;;  %v7001_v24 = vcombine.high %v43_v19, %v67_v20  ;;  %v114_v26 = vld [vmem:[%s13400_s0 + $0x260] sm:$0xff]  ;;  %v91_v27 = vld [vmem:[%s13400_s0 + $0x1a8] sm:$0xff]  ;;  %v6998_v29 = vcombine.low %v42_v17, %v66_v18  ;;  %v7000_v30 = vcombine.low %v43_v19, %v67_v20 }
  0x11   :  { %v7189_v16 = vcombine.high %v233_v11, %v257_v12  ;;  %v7188_v22 = vcombine.low %v233_v11, %v257_v12  ;;  %v115_v28 = vld [vmem:[%s13400_s0 + $0x268] sm:$0xff]  ;;  %v7047_v31 = vcombine.high %v90_v25, %v114_v26  ;;  %v138_v33 = vld [vmem:[%s13400_s0 + $0x320] sm:$0xff]  ;;  %v44_v58 = vld [vmem:[%s13400_s0 + $0x30] sm:$0xff] }
  0x12   :  { %1489 = vmatpush1.bf16.msra.mxu0 %v7134_v35  ;;  %1530 = vmatpush1.bf16.msra.mxu1 %v7136_v36  ;;  %v7049_v32 = vcombine.high %v91_v27, %v115_v28  ;;  %v162_v34 = vld [vmem:[%s13400_s0 + $0x3e0] sm:$0xff]  ;;  %v139_v35 = vld [vmem:[%s13400_s0 + $0x328] sm:$0xff]  ;;  %v68_v59 = vld [vmem:[%s13400_s0 + $0xf0] sm:$0xff] }
  0x13   :  { %1490 = vmatprep.subr.bf16.mxu0 %v7183_v37  ;;  %1531 = vmatprep.subr.bf16.mxu1 %v7185_v38  ;;  %v163_v36 = vld [vmem:[%s13400_s0 + $0x3e8] sm:$0xff]  ;;  %v7046_v37 = vcombine.low %v90_v25, %v114_v26  ;;  %v7048_v38 = vcombine.low %v91_v27, %v115_v28  ;;  %v7095_v39 = vcombine.high %v138_v33, %v162_v34  ;;  %v186_v41 = vld [vmem:[%s13400_s0 + $0x4a0] sm:$0xff]  ;;  %v92_v2 = vld [vmem:[%s13400_s0 + $0x1b0] sm:$0xff] }
  0x14   :  { %v7097_v40 = vcombine.high %v139_v35, %v163_v36  ;;  %v210_v42 = vld [vmem:[%s13400_s0 + $0x560] sm:$0xff]  ;;  %v7003_v0 = vcombine.high %v44_v58, %v68_v59  ;;  %v116_v3 = vld [vmem:[%s13400_s0 + $0x270] sm:$0xff]  ;;  %v189_v20 = vld [vmem:[%s13400_s0 + $0x4b8] sm:$0xff] }
  0x15   :  { %v7143_v47 = vcombine.high %v186_v41, %v210_v42  ;;  %v234_v49 = vld [vmem:[%s13400_s0 + $0x620] sm:$0xff]  ;;  %v7051_v9 = vcombine.high %v92_v2, %v116_v3  ;;  %v140_v11 = vld [vmem:[%s13400_s0 + $0x330] sm:$0xff]  ;;  %v237_v28 = vld [vmem:[%s13400_s0 + $0x638] sm:$0xff] }
  0x16   :  { %1491 = vmatpush1.bf16.msra.mxu0 %v7182_v43  ;;  %1532 = vmatpush1.bf16.msra.mxu1 %v7184_v44  ;;  %v187_v43 = vld [vmem:[%s13400_s0 + $0x4a8] sm:$0xff]  ;;  %v258_v50 = vld [vmem:[%s13400_s0 + $0x6e0] sm:$0xff]  ;;  %v164_v12 = vld [vmem:[%s13400_s0 + $0x3f0] sm:$0xff] }
  0x17   :  { %1564 = vmatprep.subr.bf16.mxu0 %v6995_v45  ;;  %1605 = vmatprep.subr.bf16.mxu1 %v6997_v46  ;;  %v211_v44 = vld [vmem:[%s13400_s0 + $0x568] sm:$0xff]  ;;  %v7094_v45 = vcombine.low %v138_v33, %v162_v34  ;;  %v7096_v46 = vcombine.low %v139_v35, %v163_v36  ;;  %v7191_v56 = vcombine.high %v234_v49, %v258_v50  ;;  %v188_v18 = vld [vmem:[%s13400_s0 + $0x4b0] sm:$0xff]  ;;  %v46_v34 = vld [vmem:[%s13400_s0 + $0x40] sm:$0xff] }
  0x18   :  { %v7145_v48 = vcombine.high %v187_v43, %v211_v44  ;;  %v7099_v17 = vcombine.high %v140_v11, %v164_v12  ;;  %v212_v19 = vld [vmem:[%s13400_s0 + $0x570] sm:$0xff]  ;;  %v70_v35 = vld [vmem:[%s13400_s0 + $0x100] sm:$0xff]  ;;  %v47_v36 = vld [vmem:[%s13400_s0 + $0x48] sm:$0xff] }
  0x19   :  { %7230 = vmatmul.mubr.msk.bf16.vlgmr.msra.gmra.mrb[0].mxu0 %vm1478_vm0, %v9131_v51  ;;  %7231 = vmatmul.mubr.msk.bf16.vlgmr.msra.gmra.mrb[0].mxu1 %vm1478_vm0, %v9131_v51  ;;  %v7147_v25 = vcombine.high %v188_v18, %v212_v19  ;;  %v236_v26 = vld [vmem:[%s13400_s0 + $0x630] sm:$0xff] }
  0x1a   :  { %1565 = vmatpush1.bf16.msra.mxu0 %v6994_v52  ;;  %1606 = vmatpush1.bf16.msra.mxu1 %v6996_v53  ;;  %v235_v52 = vld [vmem:[%s13400_s0 + $0x628] sm:$0xff]  ;;  %v260_v27 = vld [vmem:[%s13400_s0 + $0x6f0] sm:$0xff] }
  0x1b   :  { %1566 = vmatprep.subr.bf16.mxu0 %v7043_v54  ;;  %1607 = vmatprep.subr.bf16.mxu1 %v7045_v55  ;;  %v259_v53 = vld [vmem:[%s13400_s0 + $0x6e8] sm:$0xff]  ;;  %v7142_v54 = vcombine.low %v186_v41, %v210_v42  ;;  %v7144_v55 = vcombine.low %v187_v43, %v211_v44  ;;  %v7195_v33 = vcombine.high %v236_v26, %v260_v27  ;;  %v94_v42 = vld [vmem:[%s13400_s0 + $0x1c0] sm:$0xff] }
  0x1c   :  { %1596 = vmatprep.mubr.bf16.mxu0 %v8966_v8  ;;  %1637 = vmatprep.mubr.bf16.mxu1 %v8966_v8  ;;  %v7193_v57 = vcombine.high %v235_v52, %v259_v53  ;;  %v7007_v41 = vcombine.high %v46_v34, %v70_v35  ;;  %v118_v43 = vld [vmem:[%s13400_s0 + $0x280] sm:$0xff]  ;;  %v95_v44 = vld [vmem:[%s13400_s0 + $0x1c8] sm:$0xff] }
  0x1e   :  { %1567 = vmatpush1.bf16.msra.mxu0 %v7042_v60  ;;  %1608 = vmatpush1.bf16.msra.mxu1 %v7044_v61  ;;  %v45_v60 = vld [vmem:[%s13400_s0 + $0x38] sm:$0xff] }
  0x1f   :  { %1568 = vmatprep.subr.bf16.mxu0 %v7091_v62  ;;  %1609 = vmatprep.subr.bf16.mxu1 %v7093_v63  ;;  %v69_v61 = vld [vmem:[%s13400_s0 + $0xf8] sm:$0xff]  ;;  %v7190_v62 = vcombine.low %v234_v49, %v258_v50  ;;  %v7192_v63 = vcombine.low %v235_v52, %v259_v53  ;;  %v7055_v49 = vcombine.high %v94_v42, %v118_v43  ;;  %v142_v50 = vld [vmem:[%s13400_s0 + $0x340] sm:$0xff]  ;;  %v143_v53 = vld [vmem:[%s13400_s0 + $0x348] sm:$0xff] }
  0x20   :  { %v7005_v1 = vcombine.high %v45_v60, %v69_v61  ;;  %v166_v52 = vld [vmem:[%s13400_s0 + $0x400] sm:$0xff] }
  0x22   :  { %1569 = vmatpush1.bf16.msra.mxu0 %v7090_v4  ;;  %1610 = vmatpush1.bf16.msra.mxu1 %v7092_v5  ;;  %v93_v4 = vld [vmem:[%s13400_s0 + $0x1b8] sm:$0xff] }
  0x23   :  { %1570 = vmatprep.subr.bf16.mxu0 %v7139_v6  ;;  %1611 = vmatprep.subr.bf16.mxu1 %v7141_v7  ;;  %v117_v5 = vld [vmem:[%s13400_s0 + $0x278] sm:$0xff]  ;;  %v7002_v6 = vcombine.low %v44_v58, %v68_v59  ;;  %v7004_v7 = vcombine.low %v45_v60, %v69_v61  ;;  %v7103_v58 = vcombine.high %v142_v50, %v166_v52  ;;  %v190_v59 = vld [vmem:[%s13400_s0 + $0x4c0] sm:$0xff]  ;;  %v191_v61 = vld [vmem:[%s13400_s0 + $0x4c8] sm:$0xff] }
  0x24   :  { %v7053_v10 = vcombine.high %v93_v4, %v117_v5  ;;  %v214_v60 = vld [vmem:[%s13400_s0 + $0x580] sm:$0xff] }
  0x26   :  { %1571 = vmatpush1.bf16.msra.mxu0 %v7138_v13  ;;  %1612 = vmatpush1.bf16.msra.mxu1 %v7140_v14  ;;  %v141_v13 = vld [vmem:[%s13400_s0 + $0x338] sm:$0xff] }
  0x27   :  { %1572 = vmatprep.subr.bf16.mxu0 %v7187_v15  ;;  %1613 = vmatprep.subr.bf16.mxu1 %v7189_v16  ;;  %v165_v14 = vld [vmem:[%s13400_s0 + $0x3f8] sm:$0xff]  ;;  %v7050_v15 = vcombine.low %v92_v2, %v116_v3  ;;  %v7052_v16 = vcombine.low %v93_v4, %v117_v5  ;;  %v7151_v2 = vcombine.high %v190_v59, %v214_v60  ;;  %v238_v3 = vld [vmem:[%s13400_s0 + $0x640] sm:$0xff]  ;;  %v239_v5 = vld [vmem:[%s13400_s0 + $0x648] sm:$0xff] }
  0x28   :  { %v262_v4 = vld [vmem:[%s13400_s0 + $0x700] sm:$0xff] }
  0x2a   :  { %1573 = vmatpush1.bf16.msra.mxu0 %v7186_v21  ;;  %1614 = vmatpush1.bf16.msra.mxu1 %v7188_v22  ;;  %v7101_v21 = vcombine.high %v141_v13, %v165_v14  ;;  %v213_v22 = vld [vmem:[%s13400_s0 + $0x578] sm:$0xff] }
  0x2b   :  { %1646 = vmatprep.subr.bf16.mxu0 %v6999_v23  ;;  %1687 = vmatprep.subr.bf16.mxu1 %v7001_v24  ;;  %v7098_v23 = vcombine.low %v140_v11, %v164_v12  ;;  %v7100_v24 = vcombine.low %v141_v13, %v165_v14  ;;  %v7199_v11 = vcombine.high %v238_v3, %v262_v4  ;;  %v48_v12 = vld [vmem:[%s13400_s0 + $0x50] sm:$0xff]  ;;  %v49_v14 = vld [vmem:[%s13400_s0 + $0x58] sm:$0xff] }
  0x2c   :  { %v72_v13 = vld [vmem:[%s13400_s0 + $0x110] sm:$0xff] }
  0x2d   :  { %7232 = vmatmul.mubr.msk.bf16.vlgmr.msra.gmra.mrb[4].mxu0 %vm1478_vm0, %v9131_v51  ;;  %7233 = vmatmul.mubr.msk.bf16.vlgmr.msra.gmra.mrb[4].mxu1 %vm1478_vm0, %v9131_v51 }
  0x2e   :  { %1647 = vmatpush1.bf16.msra.mxu0 %v6998_v29  ;;  %1688 = vmatpush1.bf16.msra.mxu1 %v7000_v30  ;;  %v7149_v29 = vcombine.high %v189_v20, %v213_v22  ;;  %v261_v30 = vld [vmem:[%s13400_s0 + $0x6f8] sm:$0xff] }
  0x2f   :  { %1648 = vmatprep.subr.bf16.mxu0 %v7047_v31  ;;  %1689 = vmatprep.subr.bf16.mxu1 %v7049_v32  ;;  %v7146_v31 = vcombine.low %v188_v18, %v212_v19  ;;  %v7148_v32 = vcombine.low %v189_v20, %v213_v22  ;;  %v7011_v19 = vcombine.high %v48_v12, %v72_v13  ;;  %v96_v20 = vld [vmem:[%s13400_s0 + $0x1d0] sm:$0xff]  ;;  %v97_v22 = vld [vmem:[%s13400_s0 + $0x1d8] sm:$0xff] }
  0x30   :  { %1678 = vmatprep.mubr.bf16.mxu0 %v8966_v8  ;;  %1719 = vmatprep.mubr.bf16.mxu1 %v8966_v8 }
  0x32   :  { %1649 = vmatpush1.bf16.msra.mxu0 %v7046_v37  ;;  %1690 = vmatpush1.bf16.msra.mxu1 %v7048_v38  ;;  %v7197_v37 = vcombine.high %v237_v28, %v261_v30  ;;  %v71_v38 = vld [vmem:[%s13400_s0 + $0x108] sm:$0xff] }
  0x33   :  { %1650 = vmatprep.subr.bf16.mxu0 %v7095_v39  ;;  %1691 = vmatprep.subr.bf16.mxu1 %v7097_v40  ;;  %v7194_v39 = vcombine.low %v236_v26, %v260_v27  ;;  %v7196_v40 = vcombine.low %v237_v28, %v261_v30  ;;  %v144_v28 = vld [vmem:[%s13400_s0 + $0x350] sm:$0xff]  ;;  %v145_v30 = vld [vmem:[%s13400_s0 + $0x358] sm:$0xff] }
  0x36   :  { %1651 = vmatpush1.bf16.msra.mxu0 %v7094_v45  ;;  %1692 = vmatpush1.bf16.msra.mxu1 %v7096_v46  ;;  %v7009_v45 = vcombine.high %v47_v36, %v71_v38  ;;  %v119_v46 = vld [vmem:[%s13400_s0 + $0x288] sm:$0xff] }
  0x37   :  { %1652 = vmatprep.subr.bf16.mxu0 %v7143_v47  ;;  %1693 = vmatprep.subr.bf16.mxu1 %v7145_v48  ;;  %v7006_v47 = vcombine.low %v46_v34, %v70_v35  ;;  %v7008_v48 = vcombine.low %v47_v36, %v71_v38  ;;  %v192_v36 = vld [vmem:[%s13400_s0 + $0x4d0] sm:$0xff]  ;;  %v193_v38 = vld [vmem:[%s13400_s0 + $0x4d8] sm:$0xff] }
  0x3a   :  { %1653 = vmatpush1.bf16.msra.mxu0 %v7142_v54  ;;  %1694 = vmatpush1.bf16.msra.mxu1 %v7144_v55  ;;  %v7057_v54 = vcombine.high %v95_v44, %v119_v46  ;;  %v167_v55 = vld [vmem:[%s13400_s0 + $0x408] sm:$0xff] }
  0x3b   :  { %1654 = vmatprep.subr.bf16.mxu0 %v7191_v56  ;;  %1695 = vmatprep.subr.bf16.mxu1 %v7193_v57  ;;  %v7054_v56 = vcombine.low %v94_v42, %v118_v43  ;;  %v7056_v57 = vcombine.low %v95_v44, %v119_v46  ;;  %v240_v44 = vld [vmem:[%s13400_s0 + $0x650] sm:$0xff]  ;;  %v241_v46 = vld [vmem:[%s13400_s0 + $0x658] sm:$0xff] }
  0x3e   :  { %1655 = vmatpush1.bf16.msra.mxu0 %v7190_v62  ;;  %1696 = vmatpush1.bf16.msra.mxu1 %v7192_v63  ;;  %v7105_v62 = vcombine.high %v143_v53, %v167_v55  ;;  %v215_v63 = vld [vmem:[%s13400_s0 + $0x588] sm:$0xff] }
  0x3f   :  { %1728 = vmatprep.subr.bf16.mxu0 %v7003_v0  ;;  %1769 = vmatprep.subr.bf16.mxu1 %v7005_v1  ;;  %v7102_v0 = vcombine.low %v142_v50, %v166_v52  ;;  %v7104_v1 = vcombine.low %v143_v53, %v167_v55  ;;  %v50_v50 = vld [vmem:[%s13400_s0 + $0x60] sm:$0xff]  ;;  %v51_v55 = vld [vmem:[%s13400_s0 + $0x68] sm:$0xff] }
  0x40   :  { %v74_v52 = vld [vmem:[%s13400_s0 + $0x120] sm:$0xff] }
  0x41   :  { %7234 = vmatmul.mubr.msk.bf16.vlgmr.msra.gmra.mrb[8].mxu0 %vm1478_vm0, %v9131_v51  ;;  %7235 = vmatmul.mubr.msk.bf16.vlgmr.msra.gmra.mrb[8].mxu1 %vm1478_vm0, %v9131_v51 }
  0x42   :  { %1729 = vmatpush1.bf16.msra.mxu0 %v7002_v6  ;;  %1770 = vmatpush1.bf16.msra.mxu1 %v7004_v7  ;;  %v7153_v6 = vcombine.high %v191_v61, %v215_v63  ;;  %v263_v7 = vld [vmem:[%s13400_s0 + $0x708] sm:$0xff] }
  0x43   :  { %1730 = vmatprep.subr.bf16.mxu0 %v7051_v9  ;;  %1771 = vmatprep.subr.bf16.mxu1 %v7053_v10  ;;  %v7150_v9 = vcombine.low %v190_v59, %v214_v60  ;;  %v7152_v10 = vcombine.low %v191_v61, %v215_v63  ;;  %v7200_v18 = vcombine.low %v239_v5, %v263_v7  ;;  %v98_v59 = vld [vmem:[%s13400_s0 + $0x1e0] sm:$0xff]  ;;  %v99_v63 = vld [vmem:[%s13400_s0 + $0x1e8] sm:$0xff] }
  0x44   :  { %1760 = vmatprep.mubr.bf16.mxu0 %v8966_v8  ;;  %1801 = vmatprep.mubr.bf16.mxu1 %v8966_v8  ;;  %v122_v60 = vld [vmem:[%s13400_s0 + $0x2a0] sm:$0xff] }
  0x46   :  { %1731 = vmatpush1.bf16.msra.mxu0 %v7050_v15  ;;  %1772 = vmatpush1.bf16.msra.mxu1 %v7052_v16  ;;  %v7201_v15 = vcombine.high %v239_v5, %v263_v7  ;;  %v73_v16 = vld [vmem:[%s13400_s0 + $0x118] sm:$0xff]  ;;  %v147_v7 = vld [vmem:[%s13400_s0 + $0x368] sm:$0xff] }
  0x47   :  { %1732 = vmatprep.subr.bf16.mxu0 %v7099_v17  ;;  %1773 = vmatprep.subr.bf16.mxu1 %v7101_v21  ;;  %v7198_v17 = vcombine.low %v238_v3, %v262_v4  ;;  %v120_v21 = vld [vmem:[%s13400_s0 + $0x290] sm:$0xff]  ;;  %v7012_v26 = vcombine.low %v49_v14, %v73_v16  ;;  %v146_v3 = vld [vmem:[%s13400_s0 + $0x360] sm:$0xff] }
  0x48   :  { %v7059_v27 = vcombine.high %v96_v20, %v120_v21  ;;  %v170_v4 = vld [vmem:[%s13400_s0 + $0x420] sm:$0xff] }
  0x4a   :  { %1733 = vmatpush1.bf16.msra.mxu0 %v7098_v23  ;;  %1774 = vmatpush1.bf16.msra.mxu1 %v7100_v24  ;;  %v7013_v23 = vcombine.high %v49_v14, %v73_v16  ;;  %v121_v24 = vld [vmem:[%s13400_s0 + $0x298] sm:$0xff]  ;;  %v195_v16 = vld [vmem:[%s13400_s0 + $0x4e8] sm:$0xff] }
  0x4b   :  { %1734 = vmatprep.subr.bf16.mxu0 %v7147_v25  ;;  %1775 = vmatprep.subr.bf16.mxu1 %v7149_v29  ;;  %v7010_v25 = vcombine.low %v48_v12, %v72_v13  ;;  %v168_v29 = vld [vmem:[%s13400_s0 + $0x410] sm:$0xff]  ;;  %v7060_v34 = vcombine.low %v97_v22, %v121_v24  ;;  %v194_v12 = vld [vmem:[%s13400_s0 + $0x4e0] sm:$0xff] }
  0x4c   :  { %v7107_v35 = vcombine.high %v144_v28, %v168_v29  ;;  %v218_v13 = vld [vmem:[%s13400_s0 + $0x5a0] sm:$0xff] }
  0x4e   :  { %1735 = vmatpush1.bf16.msra.mxu0 %v7146_v31  ;;  %1776 = vmatpush1.bf16.msra.mxu1 %v7148_v32  ;;  %v7061_v31 = vcombine.high %v97_v22, %v121_v24  ;;  %v169_v32 = vld [vmem:[%s13400_s0 + $0x418] sm:$0xff]  ;;  %v7159_v22 = vcombine.high %v194_v12, %v218_v13  ;;  %v267_v24 = vld [vmem:[%s13400_s0 + $0x728] sm:$0xff] }
  0x4f   :  { %1736 = vmatprep.subr.bf16.mxu0 %v7195_v33  ;;  %1777 = vmatprep.subr.bf16.mxu1 %v7197_v37  ;;  %v7058_v33 = vcombine.low %v96_v20, %v120_v21  ;;  %v216_v37 = vld [vmem:[%s13400_s0 + $0x590] sm:$0xff]  ;;  %v7108_v42 = vcombine.low %v145_v30, %v169_v32  ;;  %v266_v20 = vld [vmem:[%s13400_s0 + $0x720] sm:$0xff] }
  0x50   :  { %v7155_v43 = vcombine.high %v192_v36, %v216_v37 }
  0x52   :  { %1737 = vmatpush1.bf16.msra.mxu0 %v7194_v39  ;;  %1778 = vmatpush1.bf16.msra.mxu1 %v7196_v40  ;;  %v7109_v39 = vcombine.high %v145_v30, %v169_v32  ;;  %v217_v40 = vld [vmem:[%s13400_s0 + $0x598] sm:$0xff] }
  0x53   :  { %1810 = vmatprep.subr.bf16.mxu0 %v7007_v41  ;;  %1851 = vmatprep.subr.bf16.mxu1 %v7009_v45  ;;  %v7106_v41 = vcombine.low %v144_v28, %v168_v29  ;;  %v264_v45 = vld [vmem:[%s13400_s0 + $0x710] sm:$0xff]  ;;  %v7156_v53 = vcombine.low %v193_v38, %v217_v40  ;;  %v77_v32 = vld [vmem:[%s13400_s0 + $0x138] sm:$0xff] }
  0x54   :  { %v76_v28 = vld [vmem:[%s13400_s0 + $0x130] sm:$0xff] }
  0x55   :  { %7236 = vmatmul.mubr.msk.bf16.vlgmr.msra.gmra.mrb[12].mxu0 %vm1478_vm0, %v9131_v51  ;;  %7237 = vmatmul.mubr.msk.bf16.vlgmr.msra.gmra.mrb[12].mxu1 %vm1478_vm0, %v9131_v51 }
  0x56   :  { %1811 = vmatpush1.bf16.msra.mxu0 %v7006_v47  ;;  %1852 = vmatpush1.bf16.msra.mxu1 %v7008_v48  ;;  %v7157_v47 = vcombine.high %v193_v38, %v217_v40  ;;  %v265_v48 = vld [vmem:[%s13400_s0 + $0x718] sm:$0xff] }
  0x57   :  { %1812 = vmatprep.subr.bf16.mxu0 %v7055_v49  ;;  %1853 = vmatprep.subr.bf16.mxu1 %v7057_v54  ;;  %v7154_v49 = vcombine.low %v192_v36, %v216_v37  ;;  %v7203_v54 = vcombine.high %v240_v44, %v264_v45  ;;  %v7204_v61 = vcombine.low %v241_v46, %v265_v48  ;;  %v124_v36 = vld [vmem:[%s13400_s0 + $0x2b0] sm:$0xff]  ;;  %v125_v40 = vld [vmem:[%s13400_s0 + $0x2b8] sm:$0xff] }
  0x58   :  { %1842 = vmatprep.mubr.bf16.mxu0 %v8966_v8  ;;  %1883 = vmatprep.mubr.bf16.mxu1 %v8966_v8 }
  0x5a   :  { %1813 = vmatpush1.bf16.msra.mxu0 %v7054_v56  ;;  %1854 = vmatpush1.bf16.msra.mxu1 %v7056_v57  ;;  %v75_v56 = vld [vmem:[%s13400_s0 + $0x128] sm:$0xff]  ;;  %v7205_v57 = vcombine.high %v241_v46, %v265_v48  ;;  %v173_v48 = vld [vmem:[%s13400_s0 + $0x438] sm:$0xff] }
  0x5b   :  { %1814 = vmatprep.subr.bf16.mxu0 %v7103_v58  ;;  %1855 = vmatprep.subr.bf16.mxu1 %v7105_v62  ;;  %v7202_v58 = vcombine.low %v240_v44, %v264_v45  ;;  %v7015_v62 = vcombine.high %v50_v50, %v74_v52  ;;  %v7016_v5 = vcombine.low %v51_v55, %v75_v56  ;;  %v172_v44 = vld [vmem:[%s13400_s0 + $0x430] sm:$0xff] }
  0x5e   :  { %1815 = vmatpush1.bf16.msra.mxu0 %v7102_v0  ;;  %1856 = vmatpush1.bf16.msra.mxu1 %v7104_v1  ;;  %v123_v0 = vld [vmem:[%s13400_s0 + $0x2a8] sm:$0xff]  ;;  %v7017_v1 = vcombine.high %v51_v55, %v75_v56 }
  0x5f   :  { %1816 = vmatprep.subr.bf16.mxu0 %v7151_v2  ;;  %1857 = vmatprep.subr.bf16.mxu1 %v7153_v6  ;;  %v7014_v2 = vcombine.low %v50_v50, %v74_v52  ;;  %v7063_v6 = vcombine.high %v98_v59, %v122_v60  ;;  %v7064_v14 = vcombine.low %v99_v63, %v123_v0  ;;  %v9544_v50 = vld [vmem:[%s13401_s1] sm:$0xf] }
  0x62   :  { %1817 = vmatpush1.bf16.msra.mxu0 %v7150_v9  ;;  %1858 = vmatpush1.bf16.msra.mxu1 %v7152_v10  ;;  %v171_v9 = vld [vmem:[%s13400_s0 + $0x428] sm:$0xff]  ;;  %v7065_v10 = vcombine.high %v99_v63, %v123_v0 }
  0x63   :  { %1818 = vmatprep.subr.bf16.mxu0 %v7199_v11  ;;  %1859 = vmatprep.subr.bf16.mxu1 %v7201_v15  ;;  %v7062_v11 = vcombine.low %v98_v59, %v122_v60  ;;  %v7111_v15 = vcombine.high %v146_v3, %v170_v4  ;;  %v7112_v21 = vcombine.low %v147_v7, %v171_v9 }
  0x66   :  { %1819 = vmatpush1.bf16.msra.mxu0 %v7198_v17  ;;  %1860 = vmatpush1.bf16.msra.mxu1 %v7200_v18  ;;  %v7113_v17 = vcombine.high %v147_v7, %v171_v9  ;;  %v7110_v18 = vcombine.low %v146_v3, %v170_v4 }
  0x67   :  { %1892 = vmatprep.subr.bf16.mxu0 %v7011_v19  ;;  %1933 = vmatprep.subr.bf16.mxu1 %v7013_v23  ;;  %v242_v19 = vld [vmem:[%s13400_s0 + $0x660] sm:$0xff]  ;;  %v243_v23 = vld [vmem:[%s13400_s0 + $0x668] sm:$0xff] }
  0x68   :  { %v7207_v30 = vcombine.high %v242_v19, %v266_v20  ;;  %v7208_v37 = vcombine.low %v243_v23, %v267_v24 }
  0x69   :  { %7238 = vmatmul.mubr.msk.bf16.vlgmr.msra.gmra.mrb[16].mxu0 %vm1478_vm0, %v9131_v51  ;;  %7239 = vmatmul.mubr.msk.bf16.vlgmr.msra.gmra.mrb[16].mxu1 %vm1478_vm0, %v9131_v51 }
  0x6a   :  { %1893 = vmatpush1.bf16.msra.mxu0 %v7010_v25  ;;  %1934 = vmatpush1.bf16.msra.mxu1 %v7012_v26  ;;  %v7158_v26 = vcombine.low %v194_v12, %v218_v13 }
  0x6b   :  { %1894 = vmatprep.subr.bf16.mxu0 %v7059_v27  ;;  %1935 = vmatprep.subr.bf16.mxu1 %v7061_v31  ;;  %v52_v27 = vld [vmem:[%s13400_s0 + $0x70] sm:$0xff]  ;;  %v53_v31 = vld [vmem:[%s13400_s0 + $0x78] sm:$0xff] }
  0x6c   :  { %1924 = vmatprep.mubr.bf16.mxu0 %v8966_v8  ;;  %1965 = vmatprep.mubr.bf16.mxu1 %v8966_v8  ;;  %v7019_v38 = vcombine.high %v52_v27, %v76_v28  ;;  %v7020_v45 = vcombine.low %v53_v31, %v77_v32 }
  0x6e   :  { %1895 = vmatpush1.bf16.msra.mxu0 %v7058_v33  ;;  %1936 = vmatpush1.bf16.msra.mxu1 %v7060_v34  ;;  %v7209_v33 = vcombine.high %v243_v23, %v267_v24  ;;  %v7206_v34 = vcombine.low %v242_v19, %v266_v20 }
  0x6f   :  { %1896 = vmatprep.subr.bf16.mxu0 %v7107_v35  ;;  %1937 = vmatprep.subr.bf16.mxu1 %v7109_v39  ;;  %v100_v35 = vld [vmem:[%s13400_s0 + $0x1f0] sm:$0xff]  ;;  %v101_v39 = vld [vmem:[%s13400_s0 + $0x1f8] sm:$0xff] }
  0x70   :  { %v7067_v46 = vcombine.high %v100_v35, %v124_v36  ;;  %v7066_v52 = vcombine.low %v100_v35, %v124_v36  ;;  %v7068_v55 = vcombine.low %v101_v39, %v125_v40 }
  0x72   :  { %1897 = vmatpush1.bf16.msra.mxu0 %v7106_v41  ;;  %1938 = vmatpush1.bf16.msra.mxu1 %v7108_v42  ;;  %v7021_v41 = vcombine.high %v53_v31, %v77_v32  ;;  %v7018_v42 = vcombine.low %v52_v27, %v76_v28 }
  0x73   :  { %1898 = vmatprep.subr.bf16.mxu0 %v7155_v43  ;;  %1939 = vmatprep.subr.bf16.mxu1 %v7157_v47  ;;  %v148_v43 = vld [vmem:[%s13400_s0 + $0x370] sm:$0xff]  ;;  %v149_v47 = vld [vmem:[%s13400_s0 + $0x378] sm:$0xff] }
  0x74   :  { %v7115_v56 = vcombine.high %v148_v43, %v172_v44  ;;  %v7117_v59 = vcombine.high %v149_v47, %v173_v48  ;;  %v7114_v60 = vcombine.low %v148_v43, %v172_v44  ;;  %v7116_v63 = vcombine.low %v149_v47, %v173_v48 }
  0x76   :  { %1899 = vmatpush1.bf16.msra.mxu0 %v7154_v49  ;;  %1940 = vmatpush1.bf16.msra.mxu1 %v7156_v53  ;;  %v7069_v49 = vcombine.high %v101_v39, %v125_v40  ;;  %v196_v53 = vld [vmem:[%s13400_s0 + $0x4f0] sm:$0xff] }
  0x77   :  { %1900 = vmatprep.subr.bf16.mxu0 %v7203_v54  ;;  %1941 = vmatprep.subr.bf16.mxu1 %v7205_v57  ;;  %v220_v54 = vld [vmem:[%s13400_s0 + $0x5b0] sm:$0xff]  ;;  %v197_v57 = vld [vmem:[%s13400_s0 + $0x4f8] sm:$0xff] }
  0x78   :  { %v7163_v0 = vcombine.high %v196_v53, %v220_v54  ;;  %v7162_v4 = vcombine.low %v196_v53, %v220_v54 }
  0x7a   :  { %1901 = vmatpush1.bf16.msra.mxu0 %v7202_v58  ;;  %1942 = vmatpush1.bf16.msra.mxu1 %v7204_v61  ;;  %v221_v58 = vld [vmem:[%s13400_s0 + $0x5b8] sm:$0xff]  ;;  %v244_v61 = vld [vmem:[%s13400_s0 + $0x670] sm:$0xff] }
  0x7b   :  { %1974 = vmatprep.subr.bf16.mxu0 %v7015_v62  ;;  %2015 = vmatprep.subr.bf16.mxu1 %v7017_v1  ;;  %v268_v62 = vld [vmem:[%s13400_s0 + $0x730] sm:$0xff]  ;;  %v245_v1 = vld [vmem:[%s13400_s0 + $0x678] sm:$0xff]  ;;  %v7165_v3 = vcombine.high %v197_v57, %v221_v58  ;;  %v7164_v7 = vcombine.low %v197_v57, %v221_v58 }
  0x7c   :  { %v7211_v9 = vcombine.high %v244_v61, %v268_v62  ;;  %v7210_v13 = vcombine.low %v244_v61, %v268_v62 }
  0x7d   :  { %7240 = vmatmul.mubr.msk.bf16.vlgmr.msra.gmra.mrb[20].mxu0 %vm1478_vm0, %v9131_v51  ;;  %7241 = vmatmul.mubr.msk.bf16.vlgmr.msra.gmra.mrb[20].mxu1 %vm1478_vm0, %v9131_v51  ;;  %v219_v51 = vld [vmem:[%s13400_s0 + $0x5a8] sm:$0xff] }
  0x7e   :  { %1975 = vmatpush1.bf16.msra.mxu0 %v7014_v2  ;;  %2016 = vmatpush1.bf16.msra.mxu1 %v7016_v5  ;;  %v7161_v25 = vcombine.high %v195_v16, %v219_v51  ;;  %v7160_v29 = vcombine.low %v195_v16, %v219_v51  ;;  %v269_v2 = vld [vmem:[%s13400_s0 + $0x738] sm:$0xff]  ;;  %v54_v5 = vld [vmem:[%s13400_s0 + $0x80] sm:$0xff] }
  0x7f   :  { %1976 = vmatprep.subr.bf16.mxu0 %v7063_v6  ;;  %2017 = vmatprep.subr.bf16.mxu1 %v7065_v10  ;;  %v78_v6 = vld [vmem:[%s13400_s0 + $0x140] sm:$0xff]  ;;  %v55_v10 = vld [vmem:[%s13400_s0 + $0x88] sm:$0xff]  ;;  %v7213_v12 = vcombine.high %v245_v1, %v269_v2  ;;  %v7212_v16 = vcombine.low %v245_v1, %v269_v2 }
  0x80   :  { %2006 = vmatprep.mubr.bf16.mxu0 %v8966_v8  ;;  %2047 = vmatprep.mubr.bf16.mxu1 %v8966_v8  ;;  %v7023_v51 = vcombine.high %v54_v5, %v78_v6  ;;  %v7022_v20 = vcombine.low %v54_v5, %v78_v6 }
  0x82   :  { %1977 = vmatpush1.bf16.msra.mxu0 %v7062_v11  ;;  %2018 = vmatpush1.bf16.msra.mxu1 %v7064_v14  ;;  %v79_v11 = vld [vmem:[%s13400_s0 + $0x148] sm:$0xff]  ;;  %v102_v14 = vld [vmem:[%s13400_s0 + $0x200] sm:$0xff] }
  0x83   :  { %1978 = vmatprep.subr.bf16.mxu0 %v7111_v15  ;;  %2019 = vmatprep.subr.bf16.mxu1 %v7113_v17  ;;  %v126_v15 = vld [vmem:[%s13400_s0 + $0x2c0] sm:$0xff]  ;;  %v103_v17 = vld [vmem:[%s13400_s0 + $0x208] sm:$0xff]  ;;  %v7025_v19 = vcombine.high %v55_v10, %v79_v11  ;;  %v7024_v23 = vcombine.low %v55_v10, %v79_v11 }
  0x84   :  { %v7071_v24 = vcombine.high %v102_v14, %v126_v15  ;;  %v7070_v28 = vcombine.low %v102_v14, %v126_v15 }
  0x86   :  { %1979 = vmatpush1.bf16.msra.mxu0 %v7110_v18  ;;  %2020 = vmatpush1.bf16.msra.mxu1 %v7112_v21  ;;  %v127_v18 = vld [vmem:[%s13400_s0 + $0x2c8] sm:$0xff]  ;;  %v150_v21 = vld [vmem:[%s13400_s0 + $0x380] sm:$0xff] }
  0x87   :  { %1980 = vmatprep.subr.bf16.mxu0 %v7159_v22  ;;  %2021 = vmatprep.subr.bf16.mxu1 %v7161_v25  ;;  %v174_v22 = vld [vmem:[%s13400_s0 + $0x440] sm:$0xff]  ;;  %v151_v25 = vld [vmem:[%s13400_s0 + $0x388] sm:$0xff]  ;;  %v7073_v27 = vcombine.high %v103_v17, %v127_v18  ;;  %v7072_v31 = vcombine.low %v103_v17, %v127_v18 }
  0x88   :  { %v7119_v32 = vcombine.high %v150_v21, %v174_v22  ;;  %v7118_v36 = vcombine.low %v150_v21, %v174_v22 }
  0x8a   :  { %1981 = vmatpush1.bf16.msra.mxu0 %v7158_v26  ;;  %2022 = vmatpush1.bf16.msra.mxu1 %v7160_v29  ;;  %v175_v26 = vld [vmem:[%s13400_s0 + $0x448] sm:$0xff]  ;;  %v198_v29 = vld [vmem:[%s13400_s0 + $0x500] sm:$0xff] }
  0x8b   :  { %1982 = vmatprep.subr.bf16.mxu0 %v7207_v30  ;;  %2023 = vmatprep.subr.bf16.mxu1 %v7209_v33  ;;  %v222_v30 = vld [vmem:[%s13400_s0 + $0x5c0] sm:$0xff]  ;;  %v199_v33 = vld [vmem:[%s13400_s0 + $0x508] sm:$0xff]  ;;  %v7121_v35 = vcombine.high %v151_v25, %v175_v26  ;;  %v7120_v39 = vcombine.low %v151_v25, %v175_v26 }
  0x8c   :  { %v7167_v40 = vcombine.high %v198_v29, %v222_v30  ;;  %v7166_v44 = vcombine.low %v198_v29, %v222_v30 }
  0x8e   :  { %1983 = vmatpush1.bf16.msra.mxu0 %v7206_v34  ;;  %2024 = vmatpush1.bf16.msra.mxu1 %v7208_v37  ;;  %v223_v34 = vld [vmem:[%s13400_s0 + $0x5c8] sm:$0xff]  ;;  %v246_v37 = vld [vmem:[%s13400_s0 + $0x680] sm:$0xff] }
  0x8f   :  { %2056 = vmatprep.subr.bf16.mxu0 %v7019_v38  ;;  %2097 = vmatprep.subr.bf16.mxu1 %v7021_v41  ;;  %v270_v38 = vld [vmem:[%s13400_s0 + $0x740] sm:$0xff]  ;;  %v247_v41 = vld [vmem:[%s13400_s0 + $0x688] sm:$0xff]  ;;  %v7169_v43 = vcombine.high %v199_v33, %v223_v34  ;;  %v7168_v47 = vcombine.low %v199_v33, %v223_v34 }
  0x90   :  { %v7215_v48 = vcombine.high %v246_v37, %v270_v38  ;;  %v7214_v54 = vcombine.low %v246_v37, %v270_v38 }
  0x91   :  { %7242 = vmatmul.mubr.msk.bf16.vlgmr.msra.gmra.mrb[24].mxu0 %vm1478_vm0, %v9544_v50  ;;  %7243 = vmatmul.mubr.msk.bf16.vlgmr.msra.gmra.mrb[24].mxu1 %vm1478_vm0, %v9544_v50 }
  0x92   :  { %2057 = vmatpush1.bf16.msra.mxu0 %v7018_v42  ;;  %2098 = vmatpush1.bf16.msra.mxu1 %v7020_v45  ;;  %v271_v42 = vld [vmem:[%s13400_s0 + $0x748] sm:$0xff]  ;;  %v56_v45 = vld [vmem:[%s13400_s0 + $0x90] sm:$0xff] }
  0x93   :  { %2058 = vmatprep.subr.bf16.mxu0 %v7067_v46  ;;  %2099 = vmatprep.subr.bf16.mxu1 %v7069_v49  ;;  %v80_v46 = vld [vmem:[%s13400_s0 + $0x150] sm:$0xff]  ;;  %v57_v49 = vld [vmem:[%s13400_s0 + $0x98] sm:$0xff]  ;;  %v7217_v53 = vcombine.high %v247_v41, %v271_v42  ;;  %v7216_v57 = vcombine.low %v247_v41, %v271_v42 }
  0x94   :  { %2088 = vmatprep.mubr.bf16.mxu0 %v8966_v8  ;;  %2129 = vmatprep.mubr.bf16.mxu1 %v8966_v8  ;;  %v7027_v58 = vcombine.high %v56_v45, %v80_v46  ;;  %v7026_v62 = vcombine.low %v56_v45, %v80_v46 }
  0x96   :  { %2059 = vmatpush1.bf16.msra.mxu0 %v7066_v52  ;;  %2100 = vmatpush1.bf16.msra.mxu1 %v7068_v55  ;;  %v81_v52 = vld [vmem:[%s13400_s0 + $0x158] sm:$0xff]  ;;  %v104_v55 = vld [vmem:[%s13400_s0 + $0x210] sm:$0xff] }
  0x97   :  { %2060 = vmatprep.subr.bf16.mxu0 %v7115_v56  ;;  %2101 = vmatprep.subr.bf16.mxu1 %v7117_v59  ;;  %v128_v56 = vld [vmem:[%s13400_s0 + $0x2d0] sm:$0xff]  ;;  %v105_v59 = vld [vmem:[%s13400_s0 + $0x218] sm:$0xff]  ;;  %v7029_v61 = vcombine.high %v57_v49, %v81_v52  ;;  %v7028_v1 = vcombine.low %v57_v49, %v81_v52 }
  0x98   :  { %v7075_v2 = vcombine.high %v104_v55, %v128_v56  ;;  %v7074_v6 = vcombine.low %v104_v55, %v128_v56 }
  0x9a   :  { %2061 = vmatpush1.bf16.msra.mxu0 %v7114_v60  ;;  %2102 = vmatpush1.bf16.msra.mxu1 %v7116_v63  ;;  %v129_v60 = vld [vmem:[%s13400_s0 + $0x2d8] sm:$0xff]  ;;  %v152_v63 = vld [vmem:[%s13400_s0 + $0x390] sm:$0xff] }
  0x9b   :  { %2062 = vmatprep.subr.bf16.mxu0 %v7163_v0  ;;  %2103 = vmatprep.subr.bf16.mxu1 %v7165_v3  ;;  %v176_v0 = vld [vmem:[%s13400_s0 + $0x450] sm:$0xff]  ;;  %v153_v3 = vld [vmem:[%s13400_s0 + $0x398] sm:$0xff]  ;;  %v7077_v5 = vcombine.high %v105_v59, %v129_v60  ;;  %v7076_v10 = vcombine.low %v105_v59, %v129_v60 }
  0x9c   :  { %v7123_v11 = vcombine.high %v152_v63, %v176_v0  ;;  %v7122_v15 = vcombine.low %v152_v63, %v176_v0 }
  0x9e   :  { %2063 = vmatpush1.bf16.msra.mxu0 %v7162_v4  ;;  %2104 = vmatpush1.bf16.msra.mxu1 %v7164_v7  ;;  %v177_v4 = vld [vmem:[%s13400_s0 + $0x458] sm:$0xff]  ;;  %v200_v7 = vld [vmem:[%s13400_s0 + $0x510] sm:$0xff] }
  0x9f   :  { %2064 = vmatprep.subr.bf16.mxu0 %v7211_v9  ;;  %2105 = vmatprep.subr.bf16.mxu1 %v7213_v12  ;;  %v224_v9 = vld [vmem:[%s13400_s0 + $0x5d0] sm:$0xff]  ;;  %v201_v12 = vld [vmem:[%s13400_s0 + $0x518] sm:$0xff]  ;;  %v7125_v14 = vcombine.high %v153_v3, %v177_v4  ;;  %v7124_v17 = vcombine.low %v153_v3, %v177_v4 }
  0xa0   :  { %v7171_v18 = vcombine.high %v200_v7, %v224_v9  ;;  %v7170_v22 = vcombine.low %v200_v7, %v224_v9 }
  0xa2   :  { %2065 = vmatpush1.bf16.msra.mxu0 %v7210_v13  ;;  %2106 = vmatpush1.bf16.msra.mxu1 %v7212_v16  ;;  %v225_v13 = vld [vmem:[%s13400_s0 + $0x5d8] sm:$0xff]  ;;  %v248_v16 = vld [vmem:[%s13400_s0 + $0x690] sm:$0xff] }
  0xa3   :  { %2138 = vmatprep.subr.bf16.mxu0 %v7023_v51  ;;  %2179 = vmatprep.subr.bf16.mxu1 %v7025_v19  ;;  %v272_v51 = vld [vmem:[%s13400_s0 + $0x750] sm:$0xff]  ;;  %v249_v19 = vld [vmem:[%s13400_s0 + $0x698] sm:$0xff]  ;;  %v7173_v21 = vcombine.high %v201_v12, %v225_v13  ;;  %v7172_v25 = vcombine.low %v201_v12, %v225_v13 }
  0xa4   :  { %v7219_v26 = vcombine.high %v248_v16, %v272_v51  ;;  %v7218_v30 = vcombine.low %v248_v16, %v272_v51 }
  0xa5   :  { %7244 = vmatmul.mubr.msk.bf16.vlgmr.msra.gmra.mrb[28].mxu0 %vm1478_vm0, %v9544_v50  ;;  %7245 = vmatmul.mubr.msk.bf16.vlgmr.msra.gmra.mrb[28].mxu1 %vm1478_vm0, %v9544_v50 }
  0xa6   :  { %2139 = vmatpush1.bf16.msra.mxu0 %v7022_v20  ;;  %2180 = vmatpush1.bf16.msra.mxu1 %v7024_v23  ;;  %v273_v20 = vld [vmem:[%s13400_s0 + $0x758] sm:$0xff]  ;;  %v58_v23 = vld [vmem:[%s13400_s0 + $0xa0] sm:$0xff] }
  0xa7   :  { %2140 = vmatprep.subr.bf16.mxu0 %v7071_v24  ;;  %2181 = vmatprep.subr.bf16.mxu1 %v7073_v27  ;;  %v82_v24 = vld [vmem:[%s13400_s0 + $0x160] sm:$0xff]  ;;  %v59_v27 = vld [vmem:[%s13400_s0 + $0xa8] sm:$0xff]  ;;  %v7221_v29 = vcombine.high %v249_v19, %v273_v20  ;;  %v7220_v33 = vcombine.low %v249_v19, %v273_v20 }
  0xa8   :  { %2170 = vmatprep.mubr.bf16.mxu0 %v8966_v8  ;;  %2211 = vmatprep.mubr.bf16.mxu1 %v8966_v8  ;;  %v7031_v34 = vcombine.high %v58_v23, %v82_v24  ;;  %v7030_v38 = vcombine.low %v58_v23, %v82_v24 }
  0xaa   :  { %2141 = vmatpush1.bf16.msra.mxu0 %v7070_v28  ;;  %2182 = vmatpush1.bf16.msra.mxu1 %v7072_v31  ;;  %v83_v28 = vld [vmem:[%s13400_s0 + $0x168] sm:$0xff]  ;;  %v106_v31 = vld [vmem:[%s13400_s0 + $0x220] sm:$0xff] }
  0xab   :  { %2142 = vmatprep.subr.bf16.mxu0 %v7119_v32  ;;  %2183 = vmatprep.subr.bf16.mxu1 %v7121_v35  ;;  %v130_v32 = vld [vmem:[%s13400_s0 + $0x2e0] sm:$0xff]  ;;  %v107_v35 = vld [vmem:[%s13400_s0 + $0x228] sm:$0xff]  ;;  %v7033_v37 = vcombine.high %v59_v27, %v83_v28  ;;  %v7032_v41 = vcombine.low %v59_v27, %v83_v28 }
  0xac   :  { %v7079_v42 = vcombine.high %v106_v31, %v130_v32  ;;  %v7078_v46 = vcombine.low %v106_v31, %v130_v32 }
  0xae   :  { %2143 = vmatpush1.bf16.msra.mxu0 %v7118_v36  ;;  %2184 = vmatpush1.bf16.msra.mxu1 %v7120_v39  ;;  %v131_v36 = vld [vmem:[%s13400_s0 + $0x2e8] sm:$0xff]  ;;  %v154_v39 = vld [vmem:[%s13400_s0 + $0x3a0] sm:$0xff] }
  0xaf   :  { %2144 = vmatprep.subr.bf16.mxu0 %v7167_v40  ;;  %2185 = vmatprep.subr.bf16.mxu1 %v7169_v43  ;;  %v178_v40 = vld [vmem:[%s13400_s0 + $0x460] sm:$0xff]  ;;  %v155_v43 = vld [vmem:[%s13400_s0 + $0x3a8] sm:$0xff]  ;;  %v7081_v45 = vcombine.high %v107_v35, %v131_v36  ;;  %v7080_v49 = vcombine.low %v107_v35, %v131_v36 }
  0xb0   :  { %v7127_v52 = vcombine.high %v154_v39, %v178_v40  ;;  %v7126_v56 = vcombine.low %v154_v39, %v178_v40 }
  0xb2   :  { %2145 = vmatpush1.bf16.msra.mxu0 %v7166_v44  ;;  %2186 = vmatpush1.bf16.msra.mxu1 %v7168_v47  ;;  %v179_v44 = vld [vmem:[%s13400_s0 + $0x468] sm:$0xff]  ;;  %v202_v47 = vld [vmem:[%s13400_s0 + $0x520] sm:$0xff] }
  0xb3   :  { %2146 = vmatprep.subr.bf16.mxu0 %v7215_v48  ;;  %2187 = vmatprep.subr.bf16.mxu1 %v7217_v53  ;;  %v226_v48 = vld [vmem:[%s13400_s0 + $0x5e0] sm:$0xff]  ;;  %v203_v53 = vld [vmem:[%s13400_s0 + $0x528] sm:$0xff]  ;;  %v7129_v55 = vcombine.high %v155_v43, %v179_v44 }
  0xb6   :  { %2147 = vmatpush1.bf16.msra.mxu0 %v7214_v54  ;;  %2188 = vmatpush1.bf16.msra.mxu1 %v7216_v57  ;;  %v227_v54 = vld [vmem:[%s13400_s0 + $0x5e8] sm:$0xff]  ;;  %v7128_v57 = vcombine.low %v155_v43, %v179_v44 }
  0xb7   :  { %2220 = vmatprep.subr.bf16.mxu0 %v7027_v58  ;;  %2261 = vmatprep.subr.bf16.mxu1 %v7029_v61  ;;  %v7175_v58 = vcombine.high %v202_v47, %v226_v48 }
  0xb9   :  { %7246 = vmatmul.mubr.msk.bf16.vlgmr.msra.gmra.mrb[32].mxu0 %vm1478_vm0, %v9544_v50  ;;  %7247 = vmatmul.mubr.msk.bf16.vlgmr.msra.gmra.mrb[32].mxu1 %vm1478_vm0, %v9544_v50 }
  0xba   :  { %2221 = vmatpush1.bf16.msra.mxu0 %v7026_v62  ;;  %2262 = vmatpush1.bf16.msra.mxu1 %v7028_v1 }
  0xbb   :  { %2222 = vmatprep.subr.bf16.mxu0 %v7075_v2  ;;  %2263 = vmatprep.subr.bf16.mxu1 %v7077_v5 }
  0xbc   :  { %2252 = vmatprep.mubr.bf16.mxu0 %v8966_v8  ;;  %2293 = vmatprep.mubr.bf16.mxu1 %v8966_v8 }
  0xbe   :  { %2223 = vmatpush1.bf16.msra.mxu0 %v7074_v6  ;;  %2264 = vmatpush1.bf16.msra.mxu1 %v7076_v10 }
  0xbf   :  { %2224 = vmatprep.subr.bf16.mxu0 %v7123_v11  ;;  %2265 = vmatprep.subr.bf16.mxu1 %v7125_v14 }
  0xc2   :  { %2225 = vmatpush1.bf16.msra.mxu0 %v7122_v15  ;;  %2266 = vmatpush1.bf16.msra.mxu1 %v7124_v17 }
  0xc3   :  { %2226 = vmatprep.subr.bf16.mxu0 %v7171_v18  ;;  %2267 = vmatprep.subr.bf16.mxu1 %v7173_v21 }
  0xc6   :  { %2227 = vmatpush1.bf16.msra.mxu0 %v7170_v22  ;;  %2268 = vmatpush1.bf16.msra.mxu1 %v7172_v25 }
  0xc7   :  { %2228 = vmatprep.subr.bf16.mxu0 %v7219_v26  ;;  %2269 = vmatprep.subr.bf16.mxu1 %v7221_v29 }
  0xca   :  { %2229 = vmatpush1.bf16.msra.mxu0 %v7218_v30  ;;  %2270 = vmatpush1.bf16.msra.mxu1 %v7220_v33 }
  0xcb   :  { %2302 = vmatprep.subr.bf16.mxu0 %v7031_v34  ;;  %2343 = vmatprep.subr.bf16.mxu1 %v7033_v37 }
  0xcd   :  { %7248 = vmatmul.mubr.msk.bf16.vlgmr.msra.gmra.mrb[36].mxu0 %vm1478_vm0, %v9544_v50  ;;  %7249 = vmatmul.mubr.msk.bf16.vlgmr.msra.gmra.mrb[36].mxu1 %vm1478_vm0, %v9544_v50 }
  0xce   :  { %2303 = vmatpush1.bf16.msra.mxu0 %v7030_v38  ;;  %2344 = vmatpush1.bf16.msra.mxu1 %v7032_v41 }
  0xcf   :  { %2304 = vmatprep.subr.bf16.mxu0 %v7079_v42  ;;  %2345 = vmatprep.subr.bf16.mxu1 %v7081_v45 }
  0xd0   :  { %2334 = vmatprep.mubr.bf16.mxu0 %v8966_v8  ;;  %2375 = vmatprep.mubr.bf16.mxu1 %v8966_v8 }
  0xd2   :  { %2305 = vmatpush1.bf16.msra.mxu0 %v7078_v46  ;;  %2346 = vmatpush1.bf16.msra.mxu1 %v7080_v49 }
  0xd3   :  { %2306 = vmatprep.subr.bf16.mxu0 %v7127_v52 }
  0xd4   :  { %15 = vsyncpa [#allocation3], 0  ;;  %2347 = vmatprep.subr.bf16.mxu1 %v7129_v55  ;;  %v7177_v59 = vcombine.high %v203_v53, %v227_v54  ;;  %v250_v60 = vld [vmem:[%s13400_s0 + $0x6a0] sm:$0xff]  ;;  %v251_v62 = vld [vmem:[%s13400_s0 + $0x6a8] sm:$0xff]  ;;  %v7174_v0 = vcombine.low %v202_v47, %v226_v48  ;;  %v7176_v1 = vcombine.low %v203_v53, %v227_v54  ;;  %s8969_s28 = smov 126   ;;  %s8970_s29 = smov 125  }
  0xd5   :  { %v274_v61 = vld [vmem:[%s13400_s0 + $0x760] sm:$0xff]  ;;  %v275_v63 = vld [vmem:[%s13400_s0 + $0x768] sm:$0xff]  ;;  %v60_v4 = vld [vmem:[%s13400_s0 + $0xb0] sm:$0xff]  ;;  %s8971_s30 = smov 98   ;;  %s8972_s11 = smov 99   ;;  %vm13538_vm1 = vcmask 1039360  }
  0xd6   :  { %2307 = vmatpush1.bf16.msra.mxu0 %v7126_v56  ;;  %2348 = vmatpush1.bf16.msra.mxu1 %v7128_v57  ;;  %v7223_v2 = vcombine.high %v250_v60, %v274_v61  ;;  %v7225_v3 = vcombine.high %v251_v62, %v275_v63  ;;  %v84_v5 = vld [vmem:[%s13400_s0 + $0x170] sm:$0xff]  ;;  %v61_v6 = vld [vmem:[%s13400_s0 + $0xb8] sm:$0xff]  ;;  %v7222_v9 = vcombine.low %v250_v60, %v274_v61  ;;  %s8973_s12 = smov 97   ;;  %s8974_s13 = smov 96   ;;  %vm13447_vm2 = vcmask 1031168  }
  0xd7   :  { %2308 = vmatprep.subr.bf16.mxu0 %v7175_v58  ;;  %2349 = vmatprep.subr.bf16.mxu1 %v7177_v59  ;;  %v85_v7 = vld [vmem:[%s13400_s0 + $0x178] sm:$0xff]  ;;  %v7224_v10 = vcombine.low %v251_v62, %v275_v63  ;;  %v7035_v11 = vcombine.high %v60_v4, %v84_v5  ;;  %v108_v13 = vld [vmem:[%s13400_s0 + $0x230] sm:$0xff]  ;;  %v7034_v51 = vcombine.low %v60_v4, %v84_v5  ;;  %s8975_s14 = smov 95   ;;  %s8976_s15 = smov 124   ;;  %vm2655_vm3 = vcmask 1022976  }
  0xd8   :  { %v7037_v12 = vcombine.high %v61_v6, %v85_v7  ;;  %v132_v14 = vld [vmem:[%s13400_s0 + $0x2f0] sm:$0xff]  ;;  %v109_v15 = vld [vmem:[%s13400_s0 + $0x238] sm:$0xff]  ;;  %v7036_v17 = vcombine.low %v61_v6, %v85_v7  ;;  %v13411_v6 = vmov 0.0   ;;  %s8977_s16 = smov 94   ;;  %s8978_s17 = smov 67   ;;  %vm2757_vm4 = vcmask 801792  }
  0xd9   :  { %v133_v16 = vld [vmem:[%s13400_s0 + $0x2f8] sm:$0xff]  ;;  %v7083_v18 = vcombine.high %v108_v13, %v132_v14  ;;  %v156_v20 = vld [vmem:[%s13400_s0 + $0x3b0] sm:$0xff]  ;;  %v7082_v24 = vcombine.low %v108_v13, %v132_v14  ;;  %s8979_s18 = smov 68   ;;  %s8980_s19 = smov 65   ;;  %vm2808_vm5 = vcmask 793600   ;;  %vm2859_vm6 = vcmask 785408  }
  0xda   :  { %2309 = vmatpush1.bf16.msra.mxu0 %v7174_v0  ;;  %2350 = vmatpush1.bf16.msra.mxu1 %v7176_v1  ;;  %v7085_v19 = vcombine.high %v109_v15, %v133_v16  ;;  %v180_v21 = vld [vmem:[%s13400_s0 + $0x470] sm:$0xff]  ;;  %v157_v22 = vld [vmem:[%s13400_s0 + $0x3b8] sm:$0xff]  ;;  %v7084_v25 = vcombine.low %v109_v15, %v133_v16  ;;  %s8981_s20 = smov 66   ;;  %s8982_s21 = smov 64   ;;  %vm2910_vm7 = vcmask 777216   ;;  %vm2706_vm8 = vcmask 1014784  }
  0xdb   :  { %2310 = vmatprep.subr.bf16.mxu0 %v7223_v2  ;;  %2351 = vmatprep.subr.bf16.mxu1 %v7225_v3  ;;  %v181_v23 = vld [vmem:[%s13400_s0 + $0x478] sm:$0xff]  ;;  %v7131_v26 = vcombine.high %v156_v20, %v180_v21  ;;  %v204_v28 = vld [vmem:[%s13400_s0 + $0x530] sm:$0xff]  ;;  %v7130_v32 = vcombine.low %v156_v20, %v180_v21  ;;  %s8983_s22 = smov 38   ;;  %s8984_s23 = smov 37   ;;  %vm2961_vm9 = vcmask 769024   ;;  %vm3063_vm10 = vcmask 547840  }
  0xdc   :  { %v7133_v27 = vcombine.high %v157_v22, %v181_v23  ;;  %v228_v29 = vld [vmem:[%s13400_s0 + $0x5f0] sm:$0xff]  ;;  %v205_v30 = vld [vmem:[%s13400_s0 + $0x538] sm:$0xff]  ;;  %v7132_v33 = vcombine.low %v157_v22, %v181_v23  ;;  %vm3012_vm11 = vcmask 556032   ;;  %vm3114_vm12 = vcmask 539648  }
  0xdd   :  { %v229_v31 = vld [vmem:[%s13400_s0 + $0x5f8] sm:$0xff]  ;;  %v7179_v34 = vcombine.high %v204_v28, %v228_v29  ;;  %v252_v36 = vld [vmem:[%s13400_s0 + $0x6b0] sm:$0xff]  ;;  %v7178_v39 = vcombine.low %v204_v28, %v228_v29  ;;  %vm3165_vm13 = vcmask 531456   ;;  %vm13483_vm14 = vcmask 523264  }
  0xde   :  { %2311 = vmatpush1.bf16.msra.mxu0 %v7222_v9  ;;  %2352 = vmatpush1.bf16.msra.mxu1 %v7224_v10  ;;  %v7181_v35 = vcombine.high %v205_v30, %v229_v31  ;;  %v276_v37 = vld [vmem:[%s13400_s0 + $0x770] sm:$0xff]  ;;  %v277_v38 = vld [vmem:[%s13400_s0 + $0x778] sm:$0xff]  ;;  %v7180_v40 = vcombine.low %v205_v30, %v229_v31  ;;  %vm13482_vm15 = vcmask 310272  }
  0xdf   :  { %2384 = vmatprep.subr.bf16.mxu0 %v7035_v11  ;;  %2425 = vmatprep.subr.bf16.mxu1 %v7037_v12  ;;  %v7227_v41 = vcombine.high %v252_v36, %v276_v37  ;;  %v7226_v48 = vcombine.low %v252_v36, %v276_v37 }
  0xe1   :  { %7250 = vmatmul.mubr.msk.bf16.vlgmr.msra.gmra.mrb[40].mxu0 %vm1478_vm0, %v9544_v50  ;;  %7251 = vmatmul.mubr.msk.bf16.vlgmr.msra.gmra.mrb[40].mxu1 %vm1478_vm0, %v9544_v50 }
  0xe2   :  { %2385 = vmatpush1.bf16.msra.mxu0 %v7034_v51  ;;  %2426 = vmatpush1.bf16.msra.mxu1 %v7036_v17 }
  0xe3   :  { %2386 = vmatprep.subr.bf16.mxu0 %v7083_v18  ;;  %2427 = vmatprep.subr.bf16.mxu1 %v7085_v19 }
  0xe4   :  { %2416 = vmatprep.mubr.bf16.mxu0 %v8966_v8  ;;  %2457 = vmatprep.mubr.bf16.mxu1 %v8966_v8  ;;  %v253_v8 = vld [vmem:[%s13400_s0 + $0x6b8] sm:$0xff]  ;;  %s8968_s0 = smov 127  }
  0xe5   :  { %v7229_v43 = vcombine.high %v253_v8, %v277_v38  ;;  %v7228_v53 = vcombine.low %v253_v8, %v277_v38  ;;  %2551 = vrot.lane.b32.xlu0 %v13411_v6, %s8968_s0 }
  0xe6   :  { %2387 = vmatpush1.bf16.msra.mxu0 %v7082_v24  ;;  %2428 = vmatpush1.bf16.msra.mxu1 %v7084_v25 }
  0xe7   :  { %2388 = vmatprep.subr.bf16.mxu0 %v7131_v26  ;;  %2429 = vmatprep.subr.bf16.mxu1 %v7133_v27 }
  0xea   :  { %2389 = vmatpush1.bf16.msra.mxu0 %v7130_v32  ;;  %2430 = vmatpush1.bf16.msra.mxu1 %v7132_v33 }
  0xeb   :  { %2390 = vmatprep.subr.bf16.mxu0 %v7179_v34  ;;  %2431 = vmatprep.subr.bf16.mxu1 %v7181_v35 }
  0xec   :  { %v9840_v42 = vpop.f32.mrb[0].mxu0  ;;  %v9842_v44 = vpop.f32.mrb[0].mxu1 }
  0xed   :  { %v9844_v45 = vpop.f32.mrb[1].mxu0  ;;  %v9846_v46 = vpop.f32.mrb[1].mxu1 }
  0xee   :  { %v1520_v47 = vpop.f32.mrb[2].mxu0  ;;  %2391 = vmatpush1.bf16.msra.mxu0 %v7178_v39  ;;  %v1561_v49 = vpop.f32.mrb[2].mxu1  ;;  %2432 = vmatpush1.bf16.msra.mxu1 %v7180_v40 }
  0xef   :  { %v1521_v52 = vpop.f32.mrb[3].mxu0  ;;  %2392 = vmatprep.subr.bf16.mxu0 %v7227_v41  ;;  %v1562_v54 = vpop.f32.mrb[3].mxu1  ;;  %2433 = vmatprep.subr.bf16.mxu1 %v7229_v43 }
  0xf2   :  { %2393 = vmatpush1.bf16.msra.mxu0 %v7226_v48  ;;  %2434 = vmatpush1.bf16.msra.mxu1 %v7228_v53 }
  0xf5   :  { %7252 = vmatmul.mubr.msk.bf16.vlgmr.msra.gmra.mrb[44].mxu0 %vm1478_vm0, %v9544_v50  ;;  %7253 = vmatmul.mubr.msk.bf16.vlgmr.msra.gmra.mrb[44].mxu1 %vm1478_vm0, %v9544_v50  ;;  %vm3318_vm0 = vcmask 809984  }
 0x100   :  { %v9852_v55 = vpop.f32.mrb[4].mxu0  ;;  %v9854_v56 = vpop.f32.mrb[4].mxu1 }
 0x101   :  { %v9856_v57 = vpop.f32.mrb[5].mxu0  ;;  %v9858_v58 = vpop.f32.mrb[5].mxu1 }
 0x102   :  { %v1602_v59 = vpop.f32.mrb[6].mxu0  ;;  %v1643_v60 = vpop.f32.mrb[6].mxu1 }
 0x103   :  { %v1603_v61 = vpop.f32.mrb[7].mxu0  ;;  %v1644_v62 = vpop.f32.mrb[7].mxu1 }
 0x114   :  { %v9860_v63 = vpop.f32.mrb[8].mxu0  ;;  %v9862_v0 = vpop.f32.mrb[8].mxu1 }
 0x115   :  { %v9864_v1 = vpop.f32.mrb[9].mxu0  ;;  %v9866_v2 = vpop.f32.mrb[9].mxu1 }
 0x116   :  { %v1684_v50 = vpop.f32.mrb[10].mxu0  ;;  %v1725_v3 = vpop.f32.mrb[10].mxu1 }
 0x117   :  { %v1685_v4 = vpop.f32.mrb[11].mxu0  ;;  %v1726_v5 = vpop.f32.mrb[11].mxu1 }
 0x128   :  { %v9870_v7 = vpop.f32.mrb[12].mxu0  ;;  %v9874_v10 = vpop.f32.mrb[12].mxu1 }
 0x129   :  { %v2466_v9 = vmax.f32 %v9840_v42, %v9870_v7  ;;  %v9876_v11 = vpop.f32.mrb[13].mxu0  ;;  %v2468_v12 = vmax.f32 %v9842_v44, %v9874_v10  ;;  %v9882_v14 = vpop.f32.mrb[13].mxu1 }
 0x12a   :  { %v2467_v13 = vmax.f32 %v9844_v45, %v9876_v11  ;;  %v1766_v15 = vpop.f32.mrb[14].mxu0  ;;  %v2469_v16 = vmax.f32 %v9846_v46, %v9882_v14  ;;  %v1807_v51 = vpop.f32.mrb[14].mxu1 }
 0x12b   :  { %v1767_v17 = vpop.f32.mrb[15].mxu0  ;;  %v1808_v18 = vpop.f32.mrb[15].mxu1 }
 0x13c   :  { %v9886_v19 = vpop.f32.mrb[16].mxu0  ;;  %v9890_v21 = vpop.f32.mrb[16].mxu1 }
 0x13d   :  { %v2470_v20 = vmax.f32 %v9852_v55, %v9886_v19  ;;  %v9892_v22 = vpop.f32.mrb[17].mxu0  ;;  %v2472_v23 = vmax.f32 %v9854_v56, %v9890_v21  ;;  %v9898_v25 = vpop.f32.mrb[17].mxu1 }
 0x13e   :  { %v2471_v24 = vmax.f32 %v9856_v57, %v9892_v22  ;;  %v1848_v26 = vpop.f32.mrb[18].mxu0  ;;  %v2473_v27 = vmax.f32 %v9858_v58, %v9898_v25  ;;  %v1889_v28 = vpop.f32.mrb[18].mxu1 }
 0x13f   :  { %v1849_v29 = vpop.f32.mrb[19].mxu0  ;;  %v1890_v30 = vpop.f32.mrb[19].mxu1 }
 0x150   :  { %v9902_v31 = vpop.f32.mrb[20].mxu0  ;;  %v9906_v33 = vpop.f32.mrb[20].mxu1 }
 0x151   :  { %v2474_v32 = vmax.f32 %v9860_v63, %v9902_v31  ;;  %v9908_v34 = vpop.f32.mrb[21].mxu0  ;;  %v2476_v35 = vmax.f32 %v9862_v0, %v9906_v33  ;;  %v9914_v37 = vpop.f32.mrb[21].mxu1 }
 0x152   :  { %v2475_v36 = vmax.f32 %v9864_v1, %v9908_v34  ;;  %v1930_v8 = vpop.f32.mrb[22].mxu0  ;;  %v2477_v38 = vmax.f32 %v9866_v2, %v9914_v37  ;;  %v1971_v39 = vpop.f32.mrb[22].mxu1 }
 0x153   :  { %v1931_v40 = vpop.f32.mrb[23].mxu0  ;;  %v1972_v41 = vpop.f32.mrb[23].mxu1 }
 0x157   :  { %v10095_v34 = vpop.permute.xlu0 %2551 }
 0x158   :  { %13587 = vst [vmem:[#allocation7_spill] sm:$0xff] %v10095_v34 }
 0x164   :  { %v2008_v43 = vpop.f32.mrb[24].mxu0  ;;  %v2049_v47 = vpop.f32.mrb[24].mxu1 }
 0x165   :  { %v2010_v48 = vpop.f32.mrb[25].mxu0  ;;  %v2051_v49 = vpop.f32.mrb[25].mxu1 }
 0x166   :  { %v2012_v52 = vpop.f32.mrb[26].mxu0  ;;  %v2053_v53 = vpop.f32.mrb[26].mxu1 }
 0x167   :  { %v2013_v54 = vpop.f32.mrb[27].mxu0  ;;  %v2054_v59 = vpop.f32.mrb[27].mxu1 }
 0x178   :  { %v2090_v60 = vpop.f32.mrb[28].mxu0  ;;  %v2131_v61 = vpop.f32.mrb[28].mxu1 }
 0x179   :  { %v2092_v62 = vpop.f32.mrb[29].mxu0  ;;  %v2133_v50 = vpop.f32.mrb[29].mxu1 }
 0x17a   :  { %v2094_v3 = vpop.f32.mrb[30].mxu0  ;;  %v2135_v4 = vpop.f32.mrb[30].mxu1 }
 0x17b   :  { %v2095_v5 = vpop.f32.mrb[31].mxu0  ;;  %v2136_v15 = vpop.f32.mrb[31].mxu1 }
 0x18c   :  { %v9918_v51 = vpop.f32.mrb[32].mxu0  ;;  %v9920_v17 = vpop.f32.mrb[32].mxu1 }
 0x18d   :  { %v9922_v18 = vpop.f32.mrb[33].mxu0  ;;  %v9924_v26 = vpop.f32.mrb[33].mxu1 }
 0x18e   :  { %v2176_v28 = vpop.f32.mrb[34].mxu0  ;;  %v2217_v29 = vpop.f32.mrb[34].mxu1 }
 0x18f   :  { %v2177_v30 = vpop.f32.mrb[35].mxu0  ;;  %v2218_v8 = vpop.f32.mrb[35].mxu1 }
 0x1a0   :  { %v2254_v39 = vpop.f32.mrb[36].mxu0  ;;  %v2295_v41 = vpop.f32.mrb[36].mxu1 }
 0x1a1   :  { %v2478_v40 = vmax.f32 %v2008_v43, %v2254_v39  ;;  %v2256_v52 = vpop.f32.mrb[37].mxu0  ;;  %v2480_v53 = vmax.f32 %v2049_v47, %v2295_v41  ;;  %v2297_v59 = vpop.f32.mrb[37].mxu1 }
 0x1a2   :  { %v2479_v54 = vmax.f32 %v2010_v48, %v2256_v52  ;;  %v2258_v3 = vpop.f32.mrb[38].mxu0  ;;  %v2481_v5 = vmax.f32 %v2051_v49, %v2297_v59  ;;  %v2299_v15 = vpop.f32.mrb[38].mxu1 }
 0x1a3   :  { %v2490_v4 = vmax.f32 %v2466_v9, %v2478_v40  ;;  %v2259_v6 = vpop.f32.mrb[39].mxu0  ;;  %v2492_v28 = vmax.f32 %v2468_v12, %v2480_v53  ;;  %v2300_v29 = vpop.f32.mrb[39].mxu1 }
 0x1a4   :  { %v2491_v43 = vmax.f32 %v2467_v13, %v2479_v54  ;;  %v2493_v47 = vmax.f32 %v2469_v16, %v2481_v5 }
 0x1a5   :  { %v9938_v48 = vmax.f32 %v2492_v28, 0.0  ;;  %v9942_v7 = vmax.f32 %v2490_v4, 0.0 }
 0x1a6   :  { %v9940_v42 = vmax.f32 %v2491_v43, 0.0  ;;  %v9944_v6 = vmax.f32 %v2493_v47, 0.0 }
 0x1a8   :  { %v9948_v44 = vpack.i.bf16 %v9938_v48, %v9940_v42  ;;  %v7869_v45 = vpack.i.bf16 %v9942_v7, %v9944_v6  ;;  %v7929_v55 = vpack.i.bf16 %v9944_v6, %v9938_v48  ;;  %v7924_v56 = vpack.i.bf16 %v9940_v42, %v9942_v7 }
 0x1a9   :  { %v7939_v58 = vpack.i.bf16 %v9944_v6, %v9942_v7 }
 0x1aa   :  { %7865 = vrot.lane.b32.xlu1 %v9948_v44, %s8969_s28  ;;  %7855 = vrot.lane.b32.xlu0 %v9948_v44, %s8968_s0 }
 0x1ae   :  { %7870 = vrot.lane.b32.xlu1 %v7869_v45, %s8969_s28  ;;  %7860 = vrot.lane.b32.xlu0 %v7869_v45, %s8968_s0 }
 0x1b2   :  { %7880 = vrot.lane.b32.xlu1 %v7869_v45, %s8970_s29  ;;  %7875 = vrot.lane.b32.xlu0 %v9948_v44, %s8970_s29 }
 0x1b4   :  { %v2336_v46 = vpop.f32.mrb[40].mxu0  ;;  %v2377_v10 = vpop.f32.mrb[40].mxu1 }
 0x1b5   :  { %v2482_v9 = vmax.f32 %v2090_v60, %v2336_v46  ;;  %v2338_v11 = vpop.f32.mrb[41].mxu0  ;;  %v2484_v12 = vmax.f32 %v2131_v61, %v2377_v10  ;;  %v2379_v14 = vpop.f32.mrb[41].mxu1 }
 0x1b6   :  { %v2483_v13 = vmax.f32 %v2092_v62, %v2338_v11  ;;  %7890 = vrot.lane.b32.xlu1 %v7869_v45, %s8971_s30  ;;  %7885 = vrot.lane.b32.xlu0 %v9948_v44, %s8971_s30  ;;  %v2340_v16 = vpop.f32.mrb[42].mxu0  ;;  %v2485_v30 = vmax.f32 %v2133_v50, %v2379_v14  ;;  %v2381_v8 = vpop.f32.mrb[42].mxu1 }
 0x1b7   :  { %v2494_v49 = vmax.f32 %v2470_v20, %v2482_v9  ;;  %v2341_v39 = vpop.f32.mrb[43].mxu0  ;;  %v9970_v60 = vmax.f32 %v2472_v23, %v2484_v12  ;;  %v2382_v62 = vpop.f32.mrb[43].mxu1 }
 0x1b8   :  { %v2495_v61 = vmax.f32 %v2471_v24, %v2483_v13  ;;  %v9978_v40 = vmax.f32 %v2473_v27, %v2485_v30 }
 0x1b9   :  { %v10043_v0 = vmax.f32 %v2494_v49, 0.0  ;;  %v10059_v31 = vmax.f32 %v9970_v60, 0.0 }
 0x1ba   :  { %7900 = vrot.lane.b32.xlu1 %v7869_v45, %s8972_s11  ;;  %7895 = vrot.lane.b32.xlu0 %v9948_v44, %s8972_s11  ;;  %v10045_v1 = vmax.f32 %v2495_v61, 0.0 }
 0x1bb   :  { %13585 = vst [vmem:[#allocation5_spill] sm:$0xff] %v10059_v31 }
 0x1bc   :  { %v8019_v2 = vpack.i.bf16 %v10045_v1, %v10043_v0 }
 0x1be   :  { %7910 = vrot.lane.b32.xlu1 %v7869_v45, %s8973_s12  ;;  %7905 = vrot.lane.b32.xlu0 %v9948_v44, %s8973_s12 }
 0x1c2   :  { %7920 = vrot.lane.b32.xlu1 %v7869_v45, %s8974_s13  ;;  %7915 = vrot.lane.b32.xlu0 %v9948_v44, %s8974_s13 }
 0x1c6   :  { %7930 = vrot.lane.b32.xlu1 %v7929_v55, %s8975_s14  ;;  %7925 = vrot.lane.b32.xlu0 %v7924_v56, %s8975_s14 }
 0x1c8   :  { %v2418_v57 = vpop.f32.mrb[44].mxu0  ;;  %v2459_v20 = vpop.f32.mrb[44].mxu1 }
 0x1c9   :  { %v2486_v19 = vmax.f32 %v9918_v51, %v2418_v57  ;;  %v2420_v21 = vpop.f32.mrb[45].mxu0  ;;  %v2488_v22 = vmax.f32 %v9920_v17, %v2459_v20  ;;  %v2461_v24 = vpop.f32.mrb[45].mxu1 }
 0x1ca   :  { %v2487_v23 = vmax.f32 %v9922_v18, %v2420_v21  ;;  %7935 = vrot.lane.b32.xlu1 %v9948_v44, %s8976_s15  ;;  %7940 = vrot.lane.b32.xlu0 %v7939_v58, %s8976_s15  ;;  %v2422_v25 = vpop.f32.mrb[46].mxu0  ;;  %v2489_v50 = vmax.f32 %v9924_v26, %v2461_v24  ;;  %v2463_v41 = vpop.f32.mrb[46].mxu1 }
 0x1cb   :  { %v10006_v27 = vmax.f32 %v2474_v32, %v2486_v19  ;;  %v2423_v51 = vpop.f32.mrb[47].mxu0  ;;  %v10012_v17 = vmax.f32 %v2476_v35, %v2488_v22  ;;  %v2464_v52 = vpop.f32.mrb[47].mxu1  ;;  %v10062_v32 = vmax.f32 %v9978_v40, 0.0 }
 0x1cc   :  { %v10017_v18 = vmax.f32 %v2475_v36, %v2487_v23  ;;  %v10022_v63 = vmax.f32 %v2477_v38, %v2489_v50 }
 0x1cd   :  { %13586 = vst [vmem:[#allocation6_spill] sm:$0xff] %v10062_v32  ;;  %v10068_v33 = vpack.i.bf16 %v10062_v32, %v10059_v31  ;;  %v10109_v53 = vmax.f32 %v10006_v27, 0.0  ;;  %v10193_v55 = vmax.f32 %v10012_v17, 0.0 }
 0x1ce   :  { %7945 = vrot.lane.b32.xlu1 %v9948_v44, %s8977_s16  ;;  %7950 = vrot.lane.b32.xlu0 %v7939_v58, %s8977_s16  ;;  %v10112_v54 = vmax.f32 %v10017_v18, 0.0  ;;  %v10196_v56 = vmax.f32 %v10022_v63, 0.0 }
 0x1cf   :  { %13588 = vst [vmem:[#allocation8_spill] sm:$0xff] %v10109_v53  ;;  %13590 = vst [vmem:[#allocation10_spill] sm:$0xff] %v10193_v55 }
 0x1d0   :  { %13589 = vst [vmem:[#allocation9_spill] sm:$0xff] %v10112_v54  ;;  %v10145_v9 = vpack.i.bf16 %v10112_v54, %v10109_v53  ;;  %13591 = vst [vmem:[#allocation11_spill] sm:$0xff] %v10196_v56  ;;  %v10212_v21 = vpack.i.bf16 %v10196_v56, %v10193_v55 }
 0x1d2   :  { %7960 = vrot.lane.b32.xlu1 %v9948_v44, %s8978_s17  ;;  %7955 = vrot.lane.b32.xlu0 %v9948_v44, %s8979_s18  ;;  %13592 = vst [vmem:[#allocation12_spill] sm:$0xff] %v10212_v21 }
 0x1d6   :  { %7970 = vrot.lane.b32.xlu1 %v7939_v58, %s8978_s17  ;;  %7965 = vrot.lane.b32.xlu0 %v7939_v58, %s8979_s18 }
 0x1da   :  { %7980 = vrot.lane.b32.xlu1 %v9948_v44, %s8980_s19  ;;  %7975 = vrot.lane.b32.xlu0 %v9948_v44, %s8981_s20 }
 0x1de   :  { %7985 = vrot.lane.b32.xlu1 %v7939_v58, %s8981_s20  ;;  %7990 = vrot.lane.b32.xlu0 %v7939_v58, %s8980_s19 }
 0x1e2   :  { %7995 = vrot.lane.b32.xlu1 %v9948_v44, %s8982_s21  ;;  %8000 = vrot.lane.b32.xlu0 %v9948_v44, %s8983_s22 }
 0x1e6   :  { %8005 = vrot.lane.b32.xlu1 %v7939_v58, %s8982_s21  ;;  %8010 = vrot.lane.b32.xlu0 %v7939_v58, %s8983_s22 }
 0x1ea   :  { %8015 = vrot.lane.b32.xlu1 %v9948_v44, %s8984_s23  ;;  %8020 = vrot.lane.b32.xlu0 %v8019_v2, %s8968_s0 }
 0x1ee   :  { %8025 = vrot.lane.b32.xlu1 %v8019_v2, %s8969_s28  ;;  %8030 = vrot.lane.b32.xlu0 %v8019_v2, %s8970_s29 }
 0x1f2   :  { %8035 = vrot.lane.b32.xlu1 %v8019_v2, %s8971_s30  ;;  %8040 = vrot.lane.b32.xlu0 %v8019_v2, %s8972_s11 }
 0x1f6   :  { %8045 = vrot.lane.b32.xlu1 %v8019_v2, %s8973_s12  ;;  %8050 = vrot.lane.b32.xlu0 %v8019_v2, %s8974_s13 }
 0x1fa   :  { %8055 = vrot.lane.b32.xlu1 %v8019_v2, %s8975_s14  ;;  %8060 = vrot.lane.b32.xlu0 %v10068_v33, %s8968_s0 }
 0x1fe   :  { %8065 = vrot.lane.b32.xlu1 %v10068_v33, %s8969_s28  ;;  %8070 = vrot.lane.b32.xlu0 %v10068_v33, %s8970_s29 }
 0x202   :  { %8075 = vrot.lane.b32.xlu1 %v10068_v33, %s8971_s30  ;;  %8080 = vrot.lane.b32.xlu0 %v10068_v33, %s8972_s11 }
 0x206   :  { %8090 = vrot.lane.b32.xlu1 %v10068_v33, %s8973_s12  ;;  %8085 = vrot.lane.b32.xlu0 %v8019_v2, %s8976_s15 }
 0x20a   :  { %8115 = vrot.lane.b32.xlu1 %v8019_v2, %s8978_s17  ;;  %8095 = vrot.lane.b32.xlu0 %v10068_v33, %s8974_s13 }
 0x20e   :  { %8125 = vrot.lane.b32.xlu1 %v8019_v2, %s8980_s19  ;;  %8100 = vrot.lane.b32.xlu0 %v10068_v33, %s8975_s14 }
 0x212   :  { %8130 = vrot.lane.b32.xlu1 %v8019_v2, %s8982_s21  ;;  %8105 = vrot.lane.b32.xlu0 %v8019_v2, %s8977_s16 }
 0x216   :  { %8140 = vrot.lane.b32.xlu1 %v10068_v33, %s8976_s15  ;;  %8110 = vrot.lane.b32.xlu0 %v8019_v2, %s8979_s18 }
 0x21a   :  { %8155 = vrot.lane.b32.xlu1 %v10068_v33, %s8978_s17  ;;  %8120 = vrot.lane.b32.xlu0 %v8019_v2, %s8981_s20 }
 0x21c   :  { %v10100_v35 = vpop.permute.xlu1 %7865  ;;  %v7856_v36 = vpop.permute.xlu0 %7855 }
 0x21d   :  { %v7858_v37 = vunpack.i.h.bf16 %v7856_v36  ;;  %v7857_v38 = vunpack.i.l.bf16 %v7856_v36  ;;  %v13415_v28 = vunpack.i.h.bf16 %v10100_v35  ;;  %v7867_v43 = vunpack.i.l.bf16 %v10100_v35 }
 0x21e   :  { %8165 = vrot.lane.b32.xlu1 %v10068_v33, %s8980_s19  ;;  %8135 = vrot.lane.b32.xlu0 %v8019_v2, %s8983_s22 }
 0x21f   :  { %v10106_v26 = vsel %vm13538_vm1, %v7857_v38, %v7858_v37  ;;  %v10165_v49 = vsel %vm13447_vm2, %v7867_v43, %v13415_v28 }
 0x220   :  { %v10114_v59 = vpop.permute.xlu1 %7870  ;;  %v10116_v3 = vpop.permute.xlu0 %7860  ;;  %v3783_v4 = vpack.c.bf16 %v10106_v26, %v9940_v42 }
 0x221   :  { %v7863_v5 = vunpack.i.h.bf16 %v10116_v3  ;;  %v13417_v15 = vunpack.i.l.bf16 %v10116_v3  ;;  %v7873_v29 = vunpack.i.h.bf16 %v10114_v59 }
 0x222   :  { %3990 = vmatprep.subr.bf16.mxu0 %v3783_v4  ;;  %8175 = vrot.lane.b32.xlu1 %v10068_v33, %s8983_s22 }
 0x223   :  { %v10128_v47 = vsel %vm13538_vm1, %v7863_v5, %v7857_v38  ;;  %8145 = vrot.lane.b32.xlu0 %v10068_v33, %s8977_s16  ;;  %v10135_v42 = vsel %vm13538_vm1, %v7858_v37, %v13417_v15  ;;  %v10155_v14 = vsel %vm13447_vm2, %v7873_v29, %v7867_v43 }
 0x224   :  { %v10137_v44 = vpop.permute.xlu1 %7880  ;;  %v10139_v45 = vpop.permute.xlu0 %7875  ;;  %v3782_v46 = vpack.c.bf16 %v10128_v47, %v9942_v7 }
 0x225   :  { %v7883_v11 = vunpack.i.h.bf16 %v10137_v44  ;;  %v13421_v12 = vunpack.i.h.bf16 %v10139_v45  ;;  %v7877_v13 = vunpack.i.l.bf16 %v10139_v45 }
 0x226   :  { %3991 = vmatpush1.bf16.msra.mxu0 %v3782_v46  ;;  %8185 = vrot.lane.b32.xlu1 %v10145_v9, %s8969_s28 }
 0x227   :  { %v10158_v16 = vsel %vm2655_vm3, %v7883_v11, %v7877_v13  ;;  %8150 = vrot.lane.b32.xlu0 %v10068_v33, %s8979_s18  ;;  %v10170_v30 = vsel %vm2655_vm3, %v7877_v13, %v13421_v12 }
 0x228   :  { %v10172_v8 = vpop.permute.xlu1 %7890  ;;  %v10174_v39 = vpop.permute.xlu0 %7885  ;;  %v3795_v60 = vpack.c.bf16 %v10170_v30, %v10165_v49  ;;  %v3794_v61 = vpack.c.bf16 %v10158_v16, %v10155_v14 }
 0x229   :  { %v7893_v24 = vunpack.i.h.bf16 %v10172_v8  ;;  %v13420_v25 = vunpack.i.h.bf16 %v10174_v39  ;;  %v7887_v27 = vunpack.i.l.bf16 %v10174_v39 }
 0x22a   :  { %3992 = vmatprep.subr.bf16.mxu0 %v3795_v60  ;;  %8200 = vrot.lane.b32.xlu1 %v10145_v9, %s8972_s11 }
 0x22b   :  { %8160 = vrot.lane.b32.xlu0 %v10068_v33, %s8981_s20  ;;  %3993 = vmatpush1.bf16.msra.mxu0 %v3794_v61  ;;  %v10242_v37 = vsel %vm2757_vm4, %v7893_v24, %v7887_v27  ;;  %v10249_v38 = vsel %vm2757_vm4, %v7887_v27, %v13420_v25 }
 0x22c   :  { %v10184_v62 = vpop.permute.xlu1 %7900  ;;  %v10186_v40 = vpop.permute.xlu0 %7895 }
 0x22e   :  { %8210 = vrot.lane.b32.xlu1 %v10145_v9, %s8974_s13 }
 0x22f   :  { %8170 = vrot.lane.b32.xlu0 %v10068_v33, %s8982_s21 }
 0x230   :  { %v10198_v57 = vpop.permute.xlu1 %7910  ;;  %v10200_v58 = vpop.permute.xlu0 %7905 }
 0x231   :  { %v13414_v41 = vunpack.i.h.bf16 %v10200_v58  ;;  %v7907_v17 = vunpack.i.l.bf16 %v10200_v58  ;;  %v7913_v4 = vunpack.i.h.bf16 %v10198_v57 }
 0x232   :  { %8215 = vrot.lane.b32.xlu1 %v10145_v9, %s8975_s14 }
 0x233   :  { %8180 = vrot.lane.b32.xlu0 %v10145_v9, %s8968_s0 }
 0x234   :  { %v10206_v19 = vpop.permute.xlu1 %7920  ;;  %v10208_v20 = vpop.permute.xlu0 %7915 }
 0x235   :  { %v13416_v50 = vunpack.i.h.bf16 %v10208_v20  ;;  %v7917_v51 = vunpack.i.l.bf16 %v10208_v20  ;;  %v7923_v63 = vunpack.i.h.bf16 %v10206_v19 }
 0x236   :  { %8230 = vrot.lane.b32.xlu1 %v10212_v21, %s8970_s29 }
 0x237   :  { %8190 = vrot.lane.b32.xlu0 %v10145_v9, %s8970_s29  ;;  %v10261_v29 = vsel %vm2859_vm6, %v7917_v51, %v13416_v50  ;;  %v10272_v27 = vsel %vm2859_vm6, %v7923_v63, %v7917_v51  ;;  %v10286_v51 = vsel %vm2808_vm5, %v7913_v4, %v7907_v17 }
 0x238   :  { %v10218_v22 = vpop.permute.xlu1 %7930  ;;  %v10220_v23 = vpop.permute.xlu0 %7925  ;;  %v3818_v28 = vpack.c.bf16 %v10272_v27, %v10286_v51 }
 0x239   :  { %v13419_v46 = vunpack.i.l.bf16 %v10218_v22  ;;  %v7928_v11 = vunpack.i.h.bf16 %v10220_v23 }
 0x23a   :  { %8240 = vrot.lane.b32.xlu1 %v10212_v21, %s8972_s11 }
 0x23b   :  { %8195 = vrot.lane.b32.xlu0 %v10145_v9, %s8971_s30 }
 0x23c   :  { %v10233_v18 = vpop.permute.xlu1 %7935  ;;  %v10235_v52 = vpop.permute.xlu0 %7940 }
 0x23d   :  { %v13413_v2 = vunpack.i.h.bf16 %v10233_v18  ;;  %v7937_v33 = vunpack.i.l.bf16 %v10233_v18  ;;  %v7942_v36 = vunpack.i.l.bf16 %v10235_v52 }
 0x23e   :  { %8250 = vrot.lane.b32.xlu1 %v10212_v21, %s8973_s12 }
 0x23f   :  { %v2707_v5 = vsel %vm2706_vm8, %v7942_v36, %v7937_v33  ;;  %8205 = vrot.lane.b32.xlu0 %v10145_v9, %s8973_s12  ;;  %v2708_v43 = vsel %vm2706_vm8, %v7937_v33, %v13413_v2  ;;  %v10279_v2 = vsel %vm2808_vm5, %v7907_v17, %v13414_v41  ;;  %v10300_v17 = vsel %vm2910_vm7, %v7928_v11, %v13419_v46 }
 0x240   :  { %v10265_v13 = vpop.permute.xlu1 %7945  ;;  %v10267_v60 = vpop.permute.xlu0 %7950  ;;  %v3807_v61 = vpack.c.bf16 %v10249_v38, %v2708_v43  ;;  %v3806_v24 = vpack.c.bf16 %v10242_v37, %v2707_v5  ;;  %v3819_v43 = vpack.c.bf16 %v10261_v29, %v10279_v2 }
 0x241   :  { %v13418_v33 = vunpack.i.h.bf16 %v10265_v13  ;;  %v7947_v36 = vunpack.i.l.bf16 %v10265_v13  ;;  %v7952_v63 = vunpack.i.l.bf16 %v10267_v60 }
 0x242   :  { %3994 = vmatprep.subr.bf16.mxu0 %v3807_v61  ;;  %8260 = vrot.lane.b32.xlu1 %v10212_v21, %s8975_s14  ;;  %v7927_v61 = vunpack.i.l.bf16 %v10220_v23 }
 0x243   :  { %8220 = vrot.lane.b32.xlu0 %v10212_v21, %s8968_s0  ;;  %3995 = vmatpush1.bf16.msra.mxu0 %v3806_v24  ;;  %v2963_v5 = vsel %vm2961_vm9, %v7947_v36, %v13418_v33  ;;  %v2962_v33 = vsel %vm2961_vm9, %v7952_v63, %v7947_v36 }
 0x244   :  { %v7961_v41 = vpop.permute.xlu1 %7960  ;;  %v7956_v10 = vpop.permute.xlu0 %7955  ;;  %3996 = vmatprep.subr.bf16.mxu0 %v3819_v43  ;;  %v3831_v23 = vpack.c.bf16 %v2963_v5, %v10300_v17 }
 0x245   :  { %v7963_v4 = vunpack.i.h.bf16 %v7961_v41  ;;  %v7962_v50 = vunpack.i.l.bf16 %v7961_v41  ;;  %v7958_v24 = vunpack.i.h.bf16 %v7956_v10  ;;  %v7957_v15 = vunpack.i.l.bf16 %v7956_v10 }
 0x246   :  { %8275 = vrot.lane.b32.xlu1 %v10145_v9, %s8978_s17  ;;  %v10315_v10 = vsel %vm2910_vm7, %v7927_v61, %v7928_v11 }
 0x247   :  { %8225 = vrot.lane.b32.xlu0 %v10212_v21, %s8969_s28  ;;  %3997 = vmatpush1.bf16.msra.mxu0 %v3818_v28  ;;  %v3014_v43 = vsel %vm3012_vm11, %v7957_v15, %v7958_v24  ;;  %v3065_v46 = vsel %vm3063_vm10, %v7962_v50, %v7963_v4  ;;  %v3830_v12 = vpack.c.bf16 %v2962_v33, %v10315_v10  ;;  %v13434_v33 = vunpack.i.l.bf16 %v10137_v44 }
 0x248   :  { %v10310_v25 = vpop.permute.xlu1 %7970  ;;  %v10312_v41 = vpop.permute.xlu0 %7965  ;;  %3998 = vmatprep.subr.bf16.mxu0 %v3831_v23  ;;  %v3843_v34 = vpack.c.bf16 %v3065_v46, %v3014_v43 }
 0x249   :  { %v13425_v5 = vunpack.i.h.bf16 %v10310_v25  ;;  %v7972_v36 = vunpack.i.l.bf16 %v10310_v25  ;;  %v13426_v63 = vunpack.i.h.bf16 %v10312_v41  ;;  %v7967_v28 = vunpack.i.l.bf16 %v10312_v41 }
 0x24a   :  { %8285 = vrot.lane.b32.xlu1 %v10145_v9, %s8980_s19 }
 0x24b   :  { %v3064_v56 = vsel %vm3063_vm10, %v7972_v36, %v7962_v50  ;;  %v10328_v11 = vsel %vm3063_vm10, %v7963_v4, %v13425_v5  ;;  %v3013_v61 = vsel %vm3012_vm11, %v7967_v28, %v7957_v15  ;;  %v10334_v23 = vsel %vm3012_vm11, %v7958_v24, %v13426_v63  ;;  %8235 = vrot.lane.b32.xlu0 %v10212_v21, %s8971_s30 }
 0x24c   :  { %3999 = vmatpush1.bf16.msra.mxu0 %v3830_v12  ;;  %v7981_v46 = vpop.permute.xlu1 %7980  ;;  %v7976_v50 = vpop.permute.xlu0 %7975  ;;  %v3842_v43 = vpack.c.bf16 %v3064_v56, %v3013_v61 }
 0x24d   :  { %v7983_v36 = vunpack.i.h.bf16 %v7981_v46  ;;  %v7982_v15 = vunpack.i.l.bf16 %v7981_v46  ;;  %v7978_v28 = vunpack.i.h.bf16 %v7976_v50  ;;  %v7977_v5 = vunpack.i.l.bf16 %v7976_v50  ;;  %4000 = vmatprep.subr.bf16.mxu0 %v3843_v34 }
 0x24e   :  { %8290 = vrot.lane.b32.xlu1 %v10145_v9, %s8982_s21  ;;  %v8299_v46 = vpack.i.bf16 %v10128_v47, %v9942_v7  ;;  %v13593_v34 = vunpack.i.h.bf16 %v10139_v45 }
 0x24f   :  { %8245 = vrot.lane.b32.xlu0 %v10145_v9, %s8976_s15  ;;  %v3116_v12 = vsel %vm3114_vm12, %v7977_v5, %v7978_v28  ;;  %v3167_v24 = vsel %vm3165_vm13, %v7982_v15, %v7983_v36 }
 0x250   :  { %4001 = vmatpush1.bf16.msra.mxu0 %v3842_v43  ;;  %v10347_v56 = vpop.permute.xlu1 %7985  ;;  %v10349_v61 = vpop.permute.xlu0 %7990  ;;  %v3855_v4 = vpack.c.bf16 %v3167_v24, %v3116_v12  ;;  %v10358_v50 = vsel %vm2655_vm3, %v13593_v34, %v13434_v33  ;;  %v7897_v33 = vunpack.i.l.bf16 %v10186_v40 }
 0x251   :  { %v13432_v63 = vunpack.i.h.bf16 %v10347_v56  ;;  %v7987_v54 = vunpack.i.l.bf16 %v10347_v56  ;;  %v13431_v43 = vunpack.i.h.bf16 %v10349_v61  ;;  %v7992_v53 = vunpack.i.l.bf16 %v10349_v61 }
 0x252   :  { %4002 = vmatprep.subr.bf16.mxu0 %v3855_v4  ;;  %8300 = vrot.lane.b32.xlu1 %v8299_v46, %s8984_s23  ;;  %v13438_v4 = vunpack.i.l.bf16 %v10172_v8 }
 0x253   :  { %v3115_v7 = vsel %vm3114_vm12, %v7987_v54, %v7977_v5  ;;  %v10369_v47 = vsel %vm3114_vm12, %v7978_v28, %v13432_v63  ;;  %v10374_v45 = vsel %vm3165_vm13, %v7983_v36, %v13431_v43  ;;  %v3166_v12 = vsel %vm3165_vm13, %v7992_v53, %v7982_v15  ;;  %8255 = vrot.lane.b32.xlu0 %v10212_v21, %s8974_s13 }
 0x254   :  { %v10380_v24 = vpop.permute.xlu1 %7995  ;;  %v10382_v54 = vpop.permute.xlu0 %8000  ;;  %v3854_v5 = vpack.c.bf16 %v3166_v12, %v3115_v7  ;;  %v8309_v28 = vpack.i.bf16 %v10358_v50, %v10170_v30 }
 0x255   :  { %v13433_v36 = vunpack.i.h.bf16 %v10380_v24  ;;  %v7997_v53 = vunpack.i.l.bf16 %v10380_v24  ;;  %v13435_v15 = vunpack.i.h.bf16 %v10382_v54  ;;  %v8002_v34 = vunpack.i.l.bf16 %v10382_v54 }
 0x256   :  { %4003 = vmatpush1.bf16.msra.mxu0 %v3854_v5  ;;  %8310 = vrot.lane.b32.xlu1 %v8309_v28, %s8984_s23  ;;  %v8314_v5 = vpack.i.bf16 %v10158_v16, %v10155_v14  ;;  %v13594_v28 = vunpack.i.h.bf16 %v10174_v39  ;;  %v13443_v39 = vunpack.i.l.bf16 %v10206_v19 }
 0x257   :  { %8265 = vrot.lane.b32.xlu0 %v10145_v9, %s8977_s16  ;;  %v3218_v30 = vsel %vm13483_vm14, %v7997_v53, %v13433_v36  ;;  %v3269_v7 = vsel %vm13482_vm15, %v8002_v34, %v13435_v15  ;;  %v7903_v36 = vunpack.i.h.bf16 %v10184_v62 }
 0x258   :  { %v10401_v12 = vpop.permute.xlu1 %8005  ;;  %v10403_v46 = vpop.permute.xlu0 %8010  ;;  %v3867_v43 = vpack.c.bf16 %v3269_v7, %v3218_v30  ;;  %v10412_v63 = vsel %vm2757_vm4, %v13594_v28, %v13438_v4 }
 0x259   :  { %v8007_v15 = vunpack.i.l.bf16 %v10401_v12  ;;  %v8012_v55 = vunpack.i.l.bf16 %v10403_v46  ;;  %v8324_v4 = vpack.i.bf16 %v10412_v63, %v10249_v38 }
 0x25a   :  { %4004 = vmatprep.subr.bf16.mxu0 %v3867_v43  ;;  %8315 = vrot.lane.b32.xlu1 %v8314_v5, %s8984_s23  ;;  %v3319_v5 = vsel %vm3318_vm0, %v7903_v36, %v7897_v33  ;;  %v3784_v36 = vpack.c.bf16 %v10135_v42, %v9938_v48 }
 0x25b   :  { %v3217_v14 = vsel %vm13483_vm14, %v8007_v15, %v7997_v53  ;;  %v3268_v16 = vsel %vm13482_vm15, %v8012_v55, %v8002_v34  ;;  %8270 = vrot.lane.b32.xlu0 %v10145_v9, %s8979_s18  ;;  %v7872_v53 = vunpack.i.l.bf16 %v10114_v59  ;;  %v13442_v55 = vunpack.i.l.bf16 %v10184_v62 }
 0x25c   :  { %v10424_v30 = vpop.permute.xlu1 %8015  ;;  %v10426_v7 = vpop.permute.xlu0 %8020  ;;  %v3866_v28 = vpack.c.bf16 %v3268_v16, %v3217_v14  ;;  %v13596_v15 = vunpack.i.l.bf16 %v10116_v3  ;;  %v7898_v59 = vunpack.i.h.bf16 %v10186_v40  ;;  %v8329_v16 = vpack.i.bf16 %v10242_v37, %v3319_v5 }
 0x25d   :  { %13595 = vst [vmem:[#allocation13_spill] sm:$0xff] %v10424_v30  ;;  %v13439_v43 = vunpack.i.l.bf16 %v10426_v7  ;;  %v13597_v3 = vunpack.i.h.bf16 %v10208_v20  ;;  %v13598_v37 = vunpack.i.h.bf16 %v10100_v35 }
 0x25e   :  { %4005 = vmatpush1.bf16.msra.mxu0 %v3866_v28  ;;  %8325 = vrot.lane.b32.xlu1 %v8324_v4, %s8984_s23 }
 0x25f   :  { %8280 = vrot.lane.b32.xlu0 %v10145_v9, %s8981_s20  ;;  %v10442_v38 = vsel %vm13538_vm1, %v13596_v15, %v13439_v43  ;;  %v10459_v28 = vsel %vm2859_vm6, %v13597_v3, %v13443_v39  ;;  %v2607_v5 = vsel %vm13447_vm2, %v13598_v37, %v7872_v53  ;;  %v13599_v3 = vpack.i.bf16 %v10135_v42, %v10106_v26 }
 0x260   :  { %v10447_v34 = vpop.permute.xlu1 %8025  ;;  %v10449_v4 = vpop.permute.xlu0 %8030  ;;  %v3785_v14 = vpack.c.bf16 %v10442_v38, %v9944_v6  ;;  %v8339_v26 = vpack.i.bf16 %v10459_v28, %v10261_v29  ;;  %v3796_v29 = vpack.c.bf16 %v10358_v50, %v2607_v5 }
 0x261   :  { %v8028_v48 = vunpack.i.h.bf16 %v10447_v34  ;;  %v8027_v40 = vunpack.i.l.bf16 %v10447_v34  ;;  %v8033_v15 = vunpack.i.h.bf16 %v10449_v4  ;;  %v8032_v43 = vunpack.i.l.bf16 %v10449_v4 }
 0x262   :  { %4033 = vmatprep.subr.bf16.mxu1 %v3785_v14  ;;  %8330 = vrot.lane.b32.xlu1 %v8329_v16, %s8984_s23  ;;  %v13600_v16 = vunpack.i.l.bf16 %v10137_v44 }
 0x263   :  { %v10470_v20 = vsel %vm2655_vm3, %v8032_v43, %v8033_v15  ;;  %8295 = vrot.lane.b32.xlu0 %v13599_v3, %s8984_s23  ;;  %4034 = vmatpush1.bf16.msra.mxu1 %v3784_v36  ;;  %v10477_v34 = vsel %vm13447_vm2, %v7872_v53, %v8027_v40  ;;  %v10480_v4 = vsel %vm13447_vm2, %v8027_v40, %v8028_v48  ;;  %v13445_v3 = vunpack.i.l.bf16 %v10198_v57 }
 0x264   :  { %v10482_v14 = vpop.permute.xlu1 %8035  ;;  %v10484_v35 = vpop.permute.xlu0 %8040  ;;  %v10489_v37 = vsel %vm2655_vm3, %v13600_v16, %v8032_v43  ;;  %v3321_v53 = vsel %vm3318_vm0, %v7898_v59, %v13442_v55  ;;  %v3320_v36 = vsel %vm3318_vm0, %v7897_v33, %v7898_v59  ;;  %v8304_v40 = vpack.i.bf16 %v2607_v5, %v10165_v49 }
 0x265   :  { %v3797_v44 = vpack.c.bf16 %v10489_v37, %v10477_v34  ;;  %v8344_v33 = vpack.i.bf16 %v10272_v27, %v10286_v51  ;;  %v8319_v49 = vpack.i.bf16 %v3321_v53, %v3320_v36  ;;  %v13601_v5 = vunpack.i.h.bf16 %v10200_v58 }
 0x266   :  { %8340 = vrot.lane.b32.xlu1 %v8339_v26, %s8984_s23  ;;  %v13444_v53 = vunpack.i.h.bf16 %v10218_v22 }
 0x267   :  { %8305 = vrot.lane.b32.xlu0 %v8304_v40, %s8984_s23  ;;  %4035 = vmatprep.subr.bf16.mxu1 %v3797_v44  ;;  %v10521_v40 = vsel %vm2808_vm5, %v13601_v5, %v13445_v3  ;;  %v7943_v3 = vunpack.i.h.bf16 %v10235_v52  ;;  %v8042_v52 = vunpack.i.l.bf16 %v10484_v35 }
 0x268   :  { %v10506_v43 = vpop.permute.xlu1 %8045  ;;  %v10508_v16 = vpop.permute.xlu0 %8050  ;;  %4036 = vmatpush1.bf16.msra.mxu1 %v3796_v29  ;;  %v8334_v29 = vpack.i.bf16 %v10521_v40, %v10279_v2 }
 0x269   :  { %v13441_v59 = vunpack.i.h.bf16 %v10506_v43  ;;  %v8047_v42 = vunpack.i.l.bf16 %v10506_v43  ;;  %v13440_v26 = vunpack.i.h.bf16 %v10508_v16  ;;  %v8052_v50 = vunpack.i.l.bf16 %v10508_v16 }
 0x26a   :  { %8345 = vrot.lane.b32.xlu1 %v8344_v33, %s8984_s23  ;;  %v13602_v33 = vmov 0.0  }
 0x26b   :  { %8320 = vrot.lane.b32.xlu0 %v8319_v49, %s8984_s23  ;;  %v10528_v27 = vsel %vm2808_vm5, %v8047_v42, %v13441_v59  ;;  %v10533_v51 = vsel %vm2859_vm6, %v8052_v50, %v13440_v26  ;;  %v13603_v49 = vunpack.i.l.bf16 %v10218_v22  ;;  %v8349_v26 = vpack.i.bf16 %v10300_v17, %v10315_v10 }
 0x26c   :  { %v10536_v58 = vpop.permute.xlu1 %8055  ;;  %v10538_v36 = vpop.permute.xlu0 %8060 }
 0x26d   :  { %v10552_v5 = vsel %vm2910_vm7, %v13603_v49, %v13444_v53 }
 0x26e   :  { %2602 = vrot.lane.b32.xlu1 %v13602_v33, %s8969_s28 }
 0x26f   :  { %8335 = vrot.lane.b32.xlu0 %v8334_v29, %s8984_s23 }
 0x270   :  { %v10556_v59 = vpop.permute.xlu1 %8065  ;;  %v10558_v44 = vpop.permute.xlu0 %8070 }
 0x271   :  { %13604 = vst [vmem:[#allocation14_spill] sm:$0xff] %v10556_v59  ;;  %13605 = vst [vmem:[#allocation15_spill] sm:$0xff] %v10558_v44  ;;  %v13448_v2 = vunpack.i.h.bf16 %v10556_v59  ;;  %v8067_v55 = vunpack.i.l.bf16 %v10556_v59  ;;  %v13449_v29 = vunpack.i.h.bf16 %v10558_v44  ;;  %v8072_v39 = vunpack.i.l.bf16 %v10558_v44 }
 0x272   :  { %8360 = vrot.lane.b32.xlu1 %v10212_v21, %s8976_s15  ;;  %v13614_v21 = vunpack.i.h.bf16 %v10482_v14 }
 0x273   :  { %v10567_v49 = vsel %vm13447_vm2, %v8028_v48, %v8067_v55  ;;  %v10572_v17 = vsel %vm13447_vm2, %v8067_v55, %v13448_v2  ;;  %v10575_v10 = vsel %vm2655_vm3, %v8033_v15, %v8072_v39  ;;  %v10580_v53 = vsel %vm2655_vm3, %v8072_v39, %v13449_v29  ;;  %8350 = vrot.lane.b32.xlu0 %v8349_v26, %s8984_s23  ;;  %v10586_v48 = vld [vmem:[%s13402_s2 + $0x4] ss:$8 sps:$4 sm:$0xff]  }
 0x274   :  { %13606 = vst [vmem:[#allocation16_spill] sm:$0xff] %v10572_v17  ;;  %13607 = vst [vmem:[#allocation17_spill] sm:$0xff] %v10575_v10  ;;  %v10589_v30 = vpop.permute.xlu1 %8075  ;;  %v10591_v55 = vpop.permute.xlu0 %8080  ;;  %v8364_v15 = vpack.i.bf16 %v9944_v6, %v10552_v5  ;;  %vm3949_vm2 = vcmask 588800   ;;  %v8037_v2 = vunpack.i.l.bf16 %v10482_v14  ;;  %v13610_v39 = vunpack.i.h.bf16 %v10233_v18 }
 0x275   :  { %13608 = vst [vmem:[#allocation18_spill] sm:$0xff] %v10580_v53  ;;  %13609 = vst [vmem:[#allocation19_spill] sm:$0xff] %v10586_v48  ;;  %7257 = vmatprep.mubr.msk.bf16.mxu0 %vm3949_vm2, %v10586_v48  ;;  %7259 = vmatprep.mubr.msk.bf16.mxu1 %vm3949_vm2, %v10586_v48  ;;  %v13611_v48 = vunpack.i.h.bf16 %v10426_v7 }
 0x276   :  { %8365 = vrot.lane.b32.xlu1 %v8364_v15, %s8984_s23  ;;  %v2709_v29 = vsel %vm2706_vm8, %v13610_v39, %v7943_v3  ;;  %v13612_v15 = vunpack.i.l.bf16 %v10426_v7  ;;  %v13613_v39 = vunpack.i.l.bf16 %v10172_v8  ;;  %v10635_v10 = vsel %vm2757_vm4, %v8037_v2, %v13614_v21 }
 0x277   :  { %8355 = vrot.lane.b32.xlu0 %v10145_v9, %s8983_s22  ;;  %v13617_v21 = vunpack.i.l.bf16 %v10206_v19  ;;  %v13619_v19 = vunpack.i.l.bf16 %v10184_v62 }
 0x278   :  { %v10612_v26 = vpop.permute.xlu1 %8090  ;;  %v10614_v59 = vpop.permute.xlu0 %8085  ;;  %v10622_v44 = vsel %vm13538_vm1, %v13612_v15, %v13611_v48  ;;  %v2761_v32 = vsel %vm2757_vm4, %v13613_v39, %v8037_v2  ;;  %v13615_v48 = vunpack.i.l.bf16 %v10198_v57  ;;  %v3808_v57 = vpack.c.bf16 %v10412_v63, %v2709_v29 }
 0x279   :  { %v8087_v9 = vunpack.i.l.bf16 %v10614_v59  ;;  %v8092_v18 = vunpack.i.l.bf16 %v10612_v26  ;;  %v13616_v17 = vunpack.i.h.bf16 %v10614_v59  ;;  %v10654_v2 = vsel %vm2859_vm6, %v13617_v21, %v8052_v50 }
 0x27a   :  { %3316 = vrot.lane.b32.xlu1 %v13602_v33, %s8972_s11  ;;  %v10640_v15 = vsel %vm2808_vm5, %v13615_v48, %v8047_v42  ;;  %v8374_v42 = vpack.i.bf16 %v10477_v34, %v10622_v44  ;;  %v3322_v50 = vsel %vm3318_vm0, %v13619_v19, %v8042_v52  ;;  %v13620_v34 = vunpack.i.h.bf16 %v10506_v43 }
 0x27b   :  { %v10646_v53 = vsel %vm2706_vm8, %v8087_v9, %v13616_v17  ;;  %2653 = vrot.lane.b32.xlu0 %v13602_v33, %s8970_s29  ;;  %v2710_v8 = vsel %vm2706_vm8, %v7943_v3, %v8087_v9  ;;  %v13464_v3 = vunpack.i.h.bf16 %v10484_v35  ;;  %v13621_v21 = vunpack.i.h.bf16 %v10612_v26 }
 0x27c   :  { %v10659_v39 = vpop.permute.xlu1 %8115  ;;  %v10661_v48 = vpop.permute.xlu0 %8095  ;;  %v3809_v17 = vpack.c.bf16 %v2761_v32, %v2710_v8  ;;  %v10674_v29 = vsel %vm2808_vm5, %v13620_v34, %v8092_v18  ;;  %v3821_v8 = vpack.c.bf16 %v10654_v2, %v10640_v15  ;;  %v13623_v19 = vunpack.i.h.bf16 %v10508_v16 }
 0x27d   :  { %13618 = vst [vmem:[#allocation20_spill] sm:$0xff] %v10659_v39  ;;  %v13463_v9 = vunpack.i.h.bf16 %v10661_v48  ;;  %v8097_v63 = vunpack.i.l.bf16 %v10661_v48  ;;  %v10682_v62 = vsel %vm2808_vm5, %v8092_v18, %v13621_v21  ;;  %v8384_v18 = vpack.i.bf16 %v3322_v50, %v10470_v20 }
 0x27e   :  { %4037 = vmatprep.subr.bf16.mxu1 %v3809_v17  ;;  %8375 = vrot.lane.b32.xlu1 %v8374_v42, %s8984_s23  ;;  %13622 = vst [vmem:[#allocation21_spill] sm:$0xff] %v10682_v62  ;;  %v3820_v21 = vpack.c.bf16 %v10459_v28, %v10521_v40  ;;  %v13465_v50 = vunpack.i.h.bf16 %v10536_v58  ;;  %v8379_v28 = vpack.i.bf16 %v10489_v37, %v10480_v4 }
 0x27f   :  { %v10687_v6 = vsel %vm2859_vm6, %v13623_v19, %v8097_v63  ;;  %v10692_v43 = vsel %vm2859_vm6, %v8097_v63, %v13463_v9  ;;  %2755 = vrot.lane.b32.xlu0 %v13602_v33, %s8971_s30  ;;  %4038 = vmatpush1.bf16.msra.mxu1 %v3808_v57  ;;  %v8369_v63 = vpack.i.bf16 %v10442_v38, %v10043_v0  ;;  %v8057_v19 = vunpack.i.l.bf16 %v10536_v58 }
 0x280   :  { %13624 = vst [vmem:[#allocation22_spill] sm:$0xff] %v10692_v43  ;;  %v10696_v42 = vpop.permute.xlu1 %8125  ;;  %v10698_v17 = vpop.permute.xlu0 %8100  ;;  %4039 = vmatprep.subr.bf16.mxu1 %v3821_v8  ;;  %v3323_v57 = vsel %vm3318_vm0, %v8042_v52, %v13464_v3  ;;  %v7953_v8 = vunpack.i.h.bf16 %v10267_v60  ;;  %v13627_v52 = vunpack.i.h.bf16 %v10265_v13  ;;  %v13630_v13 = vunpack.i.h.bf16 %v10218_v22 }
 0x281   :  { %13625 = vst [vmem:[#allocation23_spill] sm:$0xff] %v10696_v42  ;;  %v8389_v34 = vpack.i.bf16 %v2761_v32, %v3323_v57  ;;  %v10734_v32 = vsel %vm2910_vm7, %v8057_v19, %v13465_v50  ;;  %v8013_v50 = vunpack.i.h.bf16 %v10403_v46  ;;  %v8062_v46 = vunpack.i.l.bf16 %v10538_v36 }
 0x282   :  { %8385 = vrot.lane.b32.xlu1 %v8384_v18, %s8984_s23  ;;  %v2964_v18 = vsel %vm2961_vm9, %v13627_v52, %v7953_v8  ;;  %13628 = vst [vmem:[#allocation25_spill] sm:$0xff] %v10734_v32 }
 0x283   :  { %8370 = vrot.lane.b32.xlu0 %v8369_v63, %s8984_s23  ;;  %4040 = vmatpush1.bf16.msra.mxu1 %v3820_v21  ;;  %v8117_v63 = vunpack.i.l.bf16 %v10659_v39  ;;  %v2914_v21 = vsel %vm2910_vm7, %v13630_v13, %v8057_v19  ;;  %v3832_v22 = vpack.c.bf16 %v2964_v18, %v10552_v5  ;;  %v13631_v19 = vunpack.i.h.bf16 %v10659_v39 }
 0x284   :  { %v10717_v38 = vpop.permute.xlu1 %8130  ;;  %v10719_v16 = vpop.permute.xlu0 %8105  ;;  %v8127_v13 = vunpack.i.l.bf16 %v10696_v42  ;;  %v13634_v5 = vunpack.i.h.bf16 %v10312_v41 }
 0x285   :  { %13626 = vst [vmem:[#allocation24_spill] sm:$0xff] %v10717_v38  ;;  %v13466_v40 = vunpack.i.h.bf16 %v10719_v16  ;;  %v8107_v60 = vunpack.i.l.bf16 %v10719_v16 }
 0x286   :  { %8390 = vrot.lane.b32.xlu1 %v8389_v34, %s8984_s23 }
 0x287   :  { %v10739_v37 = vsel %vm2961_vm9, %v8107_v60, %v13466_v40  ;;  %8380 = vrot.lane.b32.xlu0 %v8379_v28, %s8984_s23  ;;  %v2965_v57 = vsel %vm2961_vm9, %v7953_v8, %v8107_v60  ;;  %v8394_v40 = vpack.i.bf16 %v10640_v15, %v10635_v10  ;;  %v10760_v8 = vsel %vm3063_vm10, %v8117_v63, %v13631_v19 }
 0x288   :  { %13629 = vst [vmem:[#allocation26_spill] sm:$0xff] %v10739_v37  ;;  %v10746_v52 = vpop.permute.xlu1 %8140  ;;  %v10748_v34 = vpop.permute.xlu0 %8110  ;;  %v3833_v3 = vpack.c.bf16 %v2965_v57, %v2914_v21  ;;  %13632 = vst [vmem:[#allocation27_spill] sm:$0xff] %v10760_v8  ;;  %v8008_v15 = vunpack.i.h.bf16 %v10401_v12  ;;  %v13635_v19 = vunpack.i.h.bf16 %v10310_v25  ;;  %v8404_v12 = vpack.i.bf16 %v2914_v21, %v10533_v51 }
 0x289   :  { %v13468_v9 = vunpack.i.h.bf16 %v10748_v34  ;;  %v8112_v28 = vunpack.i.l.bf16 %v10748_v34  ;;  %v13637_v21 = vunpack.i.h.bf16 %v10696_v42 }
 0x28a   :  { %4041 = vmatprep.subr.bf16.mxu1 %v3833_v3  ;;  %2857 = vrot.lane.b32.xlu1 %v13602_v33, %s8974_s13  ;;  %v3067_v3 = vsel %vm3063_vm10, %v13635_v19, %v8117_v63  ;;  %v13640_v19 = vpack.c.bf16 %v10328_v11, %v10334_v23  ;;  %v8409_v11 = vpack.i.bf16 %v10045_v1, %v10734_v32  ;;  %v8077_v23 = vunpack.i.l.bf16 %v10589_v30 }
 0x28b   :  { %v10770_v57 = vsel %vm3012_vm11, %v8112_v28, %v13468_v9  ;;  %8395 = vrot.lane.b32.xlu0 %v8394_v40, %s8984_s23  ;;  %4042 = vmatpush1.bf16.msra.mxu1 %v3832_v22  ;;  %v3016_v18 = vsel %vm3012_vm11, %v13634_v5, %v8112_v28  ;;  %v8399_v28 = vpack.i.bf16 %v10654_v2, %v10528_v27  ;;  %v13642_v40 = vunpack.i.h.bf16 %v10349_v61 }
 0x28c   :  { %13633 = vst [vmem:[#allocation28_spill] sm:$0xff] %v10770_v57  ;;  %v10781_v60 = vpop.permute.xlu1 %8155  ;;  %v10783_v37 = vpop.permute.xlu0 %8120  ;;  %v3845_v9 = vpack.c.bf16 %v3067_v3, %v3016_v18  ;;  %v10796_v22 = vsel %vm3165_vm13, %v8127_v13, %v13637_v21  ;;  %v8132_v18 = vunpack.i.l.bf16 %v10717_v38  ;;  %v13641_v3 = vunpack.i.h.bf16 %v10347_v56 }
 0x28d   :  { %13636 = vst [vmem:[#allocation29_spill] sm:$0xff] %v10783_v37  ;;  %v13469_v25 = vunpack.i.h.bf16 %v10783_v37  ;;  %v8122_v63 = vunpack.i.l.bf16 %v10783_v37  ;;  %13638 = vst [vmem:[#allocation30_spill] sm:$0xff] %v10796_v22  ;;  %v13646_v56 = vunpack.i.h.bf16 %v10382_v54  ;;  %v13650_v54 = vunpack.i.h.bf16 %v10717_v38 }
 0x28e   :  { %4043 = vmatprep.subr.bf16.mxu1 %v3845_v9  ;;  %8405 = vrot.lane.b32.xlu1 %v8404_v12, %s8984_s23  ;;  %v3169_v9 = vsel %vm3165_vm13, %v13642_v40, %v8127_v13  ;;  %v13643_v12 = vunpack.i.h.bf16 %v10380_v24  ;;  %v8082_v13 = vunpack.i.l.bf16 %v10591_v55  ;;  %v13683_v57 = vunpack.i.h.bf16 %v10661_v48 }
 0x28f   :  { %v10804_v2 = vsel %vm3114_vm12, %v8122_v63, %v13469_v25  ;;  %8400 = vrot.lane.b32.xlu0 %v8399_v28, %s8984_s23  ;;  %4044 = vmatpush1.bf16.msra.mxu1 %v13640_v19  ;;  %v3118_v21 = vsel %vm3114_vm12, %v13641_v3, %v8122_v63  ;;  %v3270_v61 = vsel %vm13482_vm15, %v13646_v56, %v8013_v50  ;;  %v13647_v63 = vunpack.i.h.bf16 %v10426_v7 }
 0x290   :  { %13639 = vst [vmem:[#allocation31_spill] sm:$0xff] %v10804_v2  ;;  %v3219_v5 = vsel %vm13483_vm14, %v13643_v12, %v8008_v15  ;;  %v10819_v25 = vpop.permute.xlu1 %8165  ;;  %v10821_v41 = vpop.permute.xlu0 %8135  ;;  %v3857_v28 = vpack.c.bf16 %v3169_v9, %v3118_v21  ;;  %v13648_v3 = vunpack.i.h.bf16 %v10538_v36  ;;  %v10846_v9 = vsel %vm13483_vm14, %v8132_v18, %v13650_v54 }
 0x291   :  { %13644 = vst [vmem:[#allocation32_spill] sm:$0xff] %v10819_v25  ;;  %13645 = vst [vmem:[#allocation33_spill] sm:$0xff] %v10821_v41  ;;  %v13470_v24 = vunpack.i.h.bf16 %v10821_v41  ;;  %v8137_v40 = vunpack.i.l.bf16 %v10821_v41  ;;  %v10836_v19 = vsel %vm13538_vm1, %v13647_v63, %v8062_v46  ;;  %v3220_v12 = vsel %vm13483_vm14, %v8008_v15, %v8132_v18 }
 0x292   :  { %v10841_v21 = vsel %vm13538_vm1, %v8062_v46, %v13648_v3  ;;  %13651 = vst [vmem:[#allocation35_spill] sm:$0xff] %v10846_v9  ;;  %4045 = vmatprep.subr.bf16.mxu1 %v3857_v28  ;;  %8410 = vrot.lane.b32.xlu1 %v8409_v11, %s8984_s23  ;;  %v13653_v46 = vpack.c.bf16 %v10374_v45, %v10369_v47  ;;  %v13655_v47 = vunpack.i.h.bf16 %v10484_v35  ;;  %v13657_v35 = vunpack.i.h.bf16 %v10482_v14 }
 0x293   :  { %13649 = vst [vmem:[#allocation34_spill] sm:$0xff] %v10841_v21  ;;  %v10852_v7 = vsel %vm13482_vm15, %v8137_v40, %v13470_v24  ;;  %2806 = vrot.lane.b32.xlu0 %v13602_v33, %s8973_s12  ;;  %v3271_v56 = vsel %vm13482_vm15, %v8013_v50, %v8137_v40  ;;  %v8419_v11 = vpack.i.bf16 %v10567_v49, %v10841_v21  ;;  %v13472_v24 = vunpack.i.h.bf16 %v10591_v55 }
 0x294   :  { %13652 = vst [vmem:[#allocation36_spill] sm:$0xff] %v10852_v7  ;;  %4046 = vmatpush1.bf16.msra.mxu1 %v13653_v46  ;;  %v10861_v63 = vpop.permute.xlu1 %8175  ;;  %v3869_v28 = vpack.c.bf16 %v3271_v56, %v3220_v12  ;;  %v3868_v3 = vpack.c.bf16 %v3270_v61, %v3219_v5  ;;  %v3324_v45 = vsel %vm3318_vm0, %v13655_v47, %v8082_v13  ;;  %v13471_v5 = vunpack.i.h.bf16 %v10589_v30  ;;  %v13656_v61 = vld [vmem:[#allocation18_spill] sm:$0xff] }
 0x295   :  { %13654 = vst [vmem:[#allocation37_spill] sm:$0xff] %v10861_v63  ;;  %v10872_v15 = vpop.permute.xlu0 %8145  ;;  %v8414_v50 = vpack.i.bf16 %v10836_v19, %v10059_v31  ;;  %v8429_v40 = vpack.i.bf16 %v3324_v45, %v13656_v61  ;;  %v10885_v46 = vsel %vm2757_vm4, %v13657_v35, %v8077_v23  ;;  %v3325_v12 = vsel %vm3318_vm0, %v8082_v13, %v13472_v24  ;;  %v13664_v24 = vld [vmem:[#allocation12_spill] sm:$0xff]  ;;  %v13670_v31 = vld [vmem:[#allocation14_spill] sm:$0xff] }
 0x296   :  { %4047 = vmatprep.subr.bf16.mxu1 %v3869_v28  ;;  %8420 = vrot.lane.b32.xlu1 %v8419_v11, %s8984_s23  ;;  %v13658_v28 = vld [vmem:[#allocation16_spill] sm:$0xff]  ;;  %v13659_v11 = vld [vmem:[#allocation17_spill] sm:$0xff]  ;;  %v10899_v14 = vsel %vm2757_vm4, %v8077_v23, %v13471_v5  ;;  %v8434_v45 = vpack.i.bf16 %v10885_v46, %v3325_v12  ;;  %v8102_v13 = vunpack.i.l.bf16 %v10698_v17  ;;  %v13477_v23 = vunpack.i.h.bf16 %v10698_v17 }
 0x297   :  { %8415 = vrot.lane.b32.xlu0 %v8414_v50, %s8984_s23  ;;  %13660 = vst [vmem:[#allocation17_spill] sm:$0xff] %v10899_v14  ;;  %v8439_v35 = vpack.i.bf16 %v10674_v29, %v10899_v14  ;;  %v8444_v5 = vpack.i.bf16 %v10687_v6, %v10682_v62  ;;  %vm13672_vm15 = vcmask 1031168   ;;  %v13677_v41 = vunpack.i.h.bf16 %v10538_v36 }
 0x298   :  { %4048 = vmatpush1.bf16.msra.mxu1 %v3868_v3  ;;  %v10879_v18 = vpop.permute.xlu1 %8185  ;;  %v8424_v3 = vpack.i.bf16 %v13659_v11, %v13658_v28  ;;  %vm13674_vm14 = vmmov %vm13672_vm15 }
 0x299   :  { %v10890_v56 = vpop.permute.xlu0 %8150  ;;  %v8188_v28 = vunpack.i.h.bf16 %v10879_v18 }
 0x29a   :  { %8430 = vrot.lane.b32.xlu1 %v8429_v40, %s8984_s23 }
 0x29b   :  { %8425 = vrot.lane.b32.xlu0 %v8424_v3, %s8984_s23  ;;  %v13661_v3 = vunpack.i.h.bf16 %v10536_v58  ;;  %v10933_v58 = vsel %vm2910_vm7, %v8102_v13, %v13477_v23 }
 0x29c   :  { %v10901_v47 = vpop.permute.xlu1 %8200  ;;  %13663 = vst [vmem:[#allocation39_spill] sm:$0xff] %v10933_v58 }
 0x29d   :  { %v10905_v50 = vpop.permute.xlu0 %8160  ;;  %v10917_v54 = vsel %vm2910_vm7, %v13661_v3, %v8102_v13 }
 0x29e   :  { %8435 = vrot.lane.b32.xlu1 %v8434_v45, %s8984_s23 }
 0x29f   :  { %8440 = vrot.lane.b32.xlu0 %v8439_v35, %s8984_s23  ;;  %v8459_v35 = vpack.i.bf16 %v10917_v54, %v10692_v43  ;;  %v8187_v43 = vunpack.i.l.bf16 %v10879_v18  ;;  %v13671_v18 = vunpack.i.h.bf16 %v13670_v31 }
 0x2a0   :  { %v10911_v40 = vpop.permute.xlu1 %8210 }
 0x2a1   :  { %v10919_v12 = vpop.permute.xlu0 %8170  ;;  %v13685_v42 = vunpack.i.h.bf16 %v10911_v40 }
 0x2a2   :  { %13662 = vst [vmem:[#allocation38_spill] sm:$0xff] %v10919_v12  ;;  %2908 = vrot.lane.b32.xlu1 %v13602_v33, %s8975_s14  ;;  %v13691_v12 = vunpack.i.h.bf16 %v10591_v55 }
 0x2a3   :  { %8445 = vrot.lane.b32.xlu0 %v8444_v5, %s8984_s23  ;;  %v13665_v5 = vld [vmem:[#allocation6_spill] sm:$0xff] }
 0x2a4   :  { %v10926_v45 = vpop.permute.xlu1 %8215  ;;  %v8464_v14 = vpack.i.bf16 %v13665_v5, %v10933_v58  ;;  %v10962_v5 = vsel %vm13672_vm15, %v13671_v18, %v8187_v43  ;;  %v8212_v18 = vunpack.i.l.bf16 %v10911_v40  ;;  %vm13696_vm15 = vmmov %vm13674_vm14 }
 0x2a5   :  { %v10935_v3 = vpop.permute.xlu0 %8180  ;;  %13673 = vst [vmem:[#allocation14_spill] sm:$0xff] %v10962_v5 }
 0x2a6   :  { %8460 = vrot.lane.b32.xlu1 %v8459_v35, %s8984_s23  ;;  %v13666_v35 = vld [vmem:[#allocation15_spill] sm:$0xff]  ;;  %v11011_v8 = vsel %vm2859_vm6, %v13683_v57, %v8212_v18  ;;  %v11016_v63 = vsel %vm2859_vm6, %v8212_v18, %v13685_v42  ;;  %v8202_v57 = vunpack.i.l.bf16 %v10901_v47 }
 0x2a7   :  { %8450 = vrot.lane.b32.xlu0 %v13664_v24, %s8977_s16  ;;  %v13667_v23 = vunpack.i.h.bf16 %v13666_v35  ;;  %13684 = vst [vmem:[#allocation45_spill] sm:$0xff] %v11011_v8  ;;  %13686 = vst [vmem:[#allocation46_spill] sm:$0xff] %v11016_v63 }
 0x2a8   :  { %v10940_v62 = vpop.permute.xlu1 %8230 }
 0x2a9   :  { %v8191_v61 = vpop.permute.xlu0 %8190  ;;  %v8232_v48 = vunpack.i.l.bf16 %v10940_v62 }
 0x2aa   :  { %v8193_v9 = vunpack.i.h.bf16 %v8191_v61  ;;  %v8192_v13 = vunpack.i.l.bf16 %v8191_v61  ;;  %8465 = vrot.lane.b32.xlu1 %v8464_v14, %s8984_s23  ;;  %v10965_v61 = vsel %vm13674_vm14, %v8187_v43, %v8188_v28  ;;  %v13679_v43 = vunpack.i.h.bf16 %v10612_v26 }
 0x2ab   :  { %8455 = vrot.lane.b32.xlu0 %v13664_v24, %s8979_s18  ;;  %13675 = vst [vmem:[#allocation40_spill] sm:$0xff] %v10965_v61  ;;  %v8182_v24 = vunpack.i.l.bf16 %v10935_v3  ;;  %v13687_v26 = vunpack.i.h.bf16 %v10935_v3 }
 0x2ac   :  { %v10952_v7 = vsel %vm2655_vm3, %v13667_v23, %v8192_v13  ;;  %v10955_v21 = vsel %vm2655_vm3, %v8192_v13, %v8193_v9  ;;  %v10957_v58 = vpop.permute.xlu1 %8240  ;;  %v13676_v23 = vld [vmem:[#allocation10_spill] sm:$0xff] }
 0x2ad   :  { %13668 = vst [vmem:[#allocation12_spill] sm:$0xff] %v10952_v7  ;;  %13669 = vst [vmem:[#allocation15_spill] sm:$0xff] %v10955_v21  ;;  %v10967_v14 = vpop.permute.xlu0 %8195  ;;  %v10988_v13 = vsel %vm13538_vm1, %v13677_v41, %v8182_v24  ;;  %v8479_v42 = vpack.i.bf16 %v10952_v7, %v10965_v61  ;;  %v13699_v7 = vunpack.i.h.bf16 %v10940_v62 }
 0x2ae   :  { %3057 = vrot.lane.b32.xlu1 %v13676_v23, %s8978_s17  ;;  %13678 = vst [vmem:[#allocation41_spill] sm:$0xff] %v10988_v13  ;;  %v8197_v18 = vunpack.i.l.bf16 %v10967_v14 }
 0x2af   :  { %3108 = vrot.lane.b32.xlu0 %v13676_v23, %s8981_s20 }
 0x2b0   :  { %v10978_v31 = vpop.permute.xlu1 %8250 }
 0x2b1   :  { %v10983_v22 = vpop.permute.xlu0 %8205 }
 0x2b2   :  { %v13493_v35 = vunpack.i.h.bf16 %v10983_v22  ;;  %v8207_v38 = vunpack.i.l.bf16 %v10983_v22  ;;  %3159 = vrot.lane.b32.xlu1 %v13676_v23, %s8980_s19 }
 0x2b3   :  { %3261 = vrot.lane.b32.xlu0 %v13676_v23, %s8983_s22 }
 0x2b4   :  { %v10999_v2 = vsel %vm2808_vm5, %v13679_v43, %v8207_v38  ;;  %v11004_v36 = vsel %vm2808_vm5, %v8207_v38, %v13493_v35  ;;  %v11006_v41 = vpop.permute.xlu1 %8260  ;;  %v11021_v43 = vsel %vm13538_vm1, %v8182_v24, %v13687_v26  ;;  %v13689_v38 = vld [vmem:[#allocation8_spill] sm:$0xff] }
 0x2b5   :  { %13680 = vst [vmem:[#allocation42_spill] sm:$0xff] %v10999_v2  ;;  %13681 = vst [vmem:[#allocation43_spill] sm:$0xff] %v11004_v36  ;;  %v11023_v37 = vpop.permute.xlu0 %8220  ;;  %v8469_v35 = vpack.i.bf16 %v10988_v13, %v13689_v38  ;;  %v8474_v38 = vpack.i.bf16 %v10962_v5, %v11021_v43  ;;  %v8217_v13 = vunpack.i.l.bf16 %v10926_v45  ;;  %v13692_v5 = vunpack.i.h.bf16 %v10967_v14 }
 0x2b6   :  { %13682 = vst [vmem:[#allocation44_spill] sm:$0xff] %v11006_v41  ;;  %13688 = vst [vmem:[#allocation47_spill] sm:$0xff] %v11021_v43  ;;  %3210 = vrot.lane.b32.xlu1 %v13676_v23, %s8982_s21  ;;  %v3326_v43 = vsel %vm3318_vm0, %v13691_v12, %v8202_v57 }
 0x2b7   :  { %8470 = vrot.lane.b32.xlu0 %v8469_v35, %s8984_s23  ;;  %v11059_v61 = vsel %vm2757_vm4, %v8197_v18, %v13692_v5  ;;  %v8484_v12 = vpack.i.bf16 %v3326_v43, %v10955_v21  ;;  %v11078_v5 = vsel %vm2655_vm3, %v8193_v9, %v8232_v48  ;;  %v13506_v43 = vunpack.i.h.bf16 %v10926_v45 }
 0x2b8   :  { %v11037_v26 = vpop.permute.xlu1 %8275  ;;  %13693 = vst [vmem:[#allocation49_spill] sm:$0xff] %v11059_v61  ;;  %13701 = vst [vmem:[#allocation54_spill] sm:$0xff] %v11078_v5  ;;  %v13711_v21 = vunpack.i.h.bf16 %v10911_v40 }
 0x2b9   :  { %13690 = vst [vmem:[#allocation48_spill] sm:$0xff] %v11037_v26  ;;  %v11043_v32 = vpop.permute.xlu0 %8225  ;;  %v8203_v26 = vunpack.i.h.bf16 %v10901_v47 }
 0x2ba   :  { %v8227_v24 = vunpack.i.l.bf16 %v11043_v32  ;;  %8475 = vrot.lane.b32.xlu1 %v8474_v38, %s8984_s23  ;;  %v13695_v38 = vunpack.i.h.bf16 %v11043_v32 }
 0x2bb   :  { %8480 = vrot.lane.b32.xlu0 %v8479_v42, %s8984_s23  ;;  %v11075_v42 = vsel %vm2655_vm3, %v8232_v48, %v13699_v7  ;;  %v8499_v7 = vpack.i.bf16 %v11011_v8, %v11004_v36  ;;  %v8252_v36 = vunpack.i.l.bf16 %v10978_v31 }
 0x2bc   :  { %v11062_v35 = vsel %vm13674_vm14, %v8188_v28, %v8227_v24  ;;  %v11067_v47 = vsel %vm13696_vm15, %v8227_v24, %v13695_v38  ;;  %v11069_v55 = vpop.permute.xlu1 %8285  ;;  %13700 = vst [vmem:[#allocation53_spill] sm:$0xff] %v11075_v42  ;;  %v13702_v28 = vunpack.i.h.bf16 %v10589_v30  ;;  %v8494_v24 = vpack.i.bf16 %v10999_v2, %v11059_v61 }
 0x2bd   :  { %13694 = vst [vmem:[#allocation50_spill] sm:$0xff] %v11062_v35  ;;  %13697 = vst [vmem:[#allocation51_spill] sm:$0xff] %v11067_v47  ;;  %v11085_v39 = vpop.permute.xlu0 %8235  ;;  %v3327_v30 = vsel %vm3318_vm0, %v8202_v57, %v8203_v26  ;;  %v13705_v38 = vunpack.i.h.bf16 %v10698_v17  ;;  %v11112_v57 = vsel %vm2910_vm7, %v8217_v13, %v13506_v43  ;;  %v8222_v17 = vunpack.i.l.bf16 %v11023_v37 }
 0x2be   :  { %13698 = vst [vmem:[#allocation52_spill] sm:$0xff] %v11069_v55  ;;  %v11083_v25 = vsel %vm2757_vm4, %v13702_v28, %v8197_v18  ;;  %8485 = vrot.lane.b32.xlu1 %v8484_v12, %s8984_s23  ;;  %13707 = vst [vmem:[#allocation58_spill] sm:$0xff] %v11112_v57  ;;  %vm3565_vm14 = vcmask 302080   ;;  %v13729_v2 = vunpack.i.h.bf16 %v11006_v41 }
 0x2bf   :  { %13703 = vst [vmem:[#allocation55_spill] sm:$0xff] %v11083_v25  ;;  %8495 = vrot.lane.b32.xlu0 %v8494_v24, %s8984_s23  ;;  %v8489_v18 = vpack.i.bf16 %v11083_v25, %v3327_v30  ;;  %v11103_v28 = vsel %vm2910_vm7, %v13705_v38, %v8217_v13  ;;  %v13708_v13 = vld [vmem:[#allocation9_spill] sm:$0xff] }
 0x2c0   :  { %v11097_v48 = vpop.permute.xlu1 %8290  ;;  %13706 = vst [vmem:[#allocation57_spill] sm:$0xff] %v11103_v28  ;;  %v8504_v38 = vpack.i.bf16 %v11103_v28, %v11016_v63  ;;  %v13709_v63 = vunpack.i.h.bf16 %v11023_v37 }
 0x2c1   :  { %13704 = vst [vmem:[#allocation56_spill] sm:$0xff] %v11097_v48  ;;  %v11105_v12 = vpop.permute.xlu0 %8245 }
 0x2c2   :  { %8490 = vrot.lane.b32.xlu1 %v8489_v18, %s8984_s23  ;;  %v8509_v18 = vpack.i.bf16 %v13708_v13, %v11112_v57  ;;  %v11136_v9 = vsel %vm13538_vm1, %v8222_v17, %v13709_v63  ;;  %v13716_v63 = vunpack.i.h.bf16 %v10983_v22 }
 0x2c3   :  { %8500 = vrot.lane.b32.xlu0 %v8499_v7, %s8984_s23  ;;  %v8242_v7 = vunpack.i.l.bf16 %v10957_v58  ;;  %13710 = vst [vmem:[#allocation59_spill] sm:$0xff] %v11136_v9 }
 0x2c4   :  { %v11118_v30 = vpop.permute.xlu1 %8300  ;;  %v11158_v55 = vsel %vm2808_vm5, %v13716_v63, %v8252_v36 }
 0x2c5   :  { %v11124_v61 = vpop.permute.xlu0 %8255  ;;  %13717 = vst [vmem:[#allocation63_spill] sm:$0xff] %v11158_v55 }
 0x2c6   :  { %v13513_v43 = vunpack.i.h.bf16 %v11124_v61  ;;  %v8257_v24 = vunpack.i.l.bf16 %v11124_v61  ;;  %8505 = vrot.lane.b32.xlu1 %v8504_v38, %s8984_s23  ;;  %v13714_v38 = vunpack.i.h.bf16 %v10978_v31 }
 0x2c7   :  { %8510 = vrot.lane.b32.xlu0 %v8509_v18, %s8984_s23 }
 0x2c8   :  { %v11141_v48 = vsel %vm2859_vm6, %v13711_v21, %v8257_v24  ;;  %v11146_v57 = vsel %vm2859_vm6, %v8257_v24, %v13513_v43  ;;  %v11148_v13 = vpop.permute.xlu1 %8310  ;;  %v11153_v18 = vsel %vm2808_vm5, %v8252_v36, %v13714_v38  ;;  %v13718_v21 = vunpack.i.h.bf16 %v10935_v3 }
 0x2c9   :  { %13712 = vst [vmem:[#allocation60_spill] sm:$0xff] %v11141_v48  ;;  %13713 = vst [vmem:[#allocation61_spill] sm:$0xff] %v11146_v57  ;;  %v11165_v28 = vpop.permute.xlu0 %8265  ;;  %v8519_v24 = vpack.i.bf16 %v11062_v35, %v11136_v9  ;;  %v3328_v43 = vsel %vm3318_vm0, %v8203_v26, %v8242_v7  ;;  %v8237_v38 = vunpack.i.l.bf16 %v11085_v39  ;;  %v13518_v36 = vunpack.i.h.bf16 %v10957_v58 }
 0x2ca   :  { %13715 = vst [vmem:[#allocation62_spill] sm:$0xff] %v11153_v18  ;;  %v11163_v40 = vsel %vm13538_vm1, %v13718_v21, %v8222_v17  ;;  %13720 = vst [vmem:[#allocation65_spill] sm:$0xff] %v11165_v28  ;;  %2704 = vrot.lane.b32.xlu1 %v13602_v33, %s8976_s15  ;;  %v8529_v9 = vpack.i.bf16 %v3328_v43, %v11075_v42  ;;  %v13722_v35 = vunpack.i.h.bf16 %v10967_v14  ;;  %v8302_v43 = vunpack.i.l.bf16 %v11118_v30 }
 0x2cb   :  { %13719 = vst [vmem:[#allocation64_spill] sm:$0xff] %v11163_v40  ;;  %8520 = vrot.lane.b32.xlu0 %v8519_v24, %s8984_s23  ;;  %v8514_v63 = vpack.i.bf16 %v11163_v40, %v13676_v23  ;;  %v3329_v24 = vsel %vm3318_vm0, %v8242_v7, %v13518_v36  ;;  %v8524_v26 = vpack.i.bf16 %v11078_v5, %v11067_v47  ;;  %v13723_v23 = vld [vmem:[#allocation13_spill] sm:$0xff]  ;;  %v8262_v7 = vunpack.i.l.bf16 %v11006_v41 }
 0x2cc   :  { %v8316_v17 = vpop.permute.xlu1 %8315  ;;  %v11188_v22 = vsel %vm2757_vm4, %v13722_v35, %v8237_v38  ;;  %v8017_v14 = vunpack.i.l.bf16 %v13723_v23  ;;  %v13724_v35 = vunpack.i.h.bf16 %v11085_v39  ;;  %v13726_v5 = vunpack.i.h.bf16 %v13723_v23 }
 0x2cd   :  { %v11182_v21 = vpop.permute.xlu0 %8270 }
 0x2ce   :  { %13721 = vst [vmem:[#allocation66_spill] sm:$0xff] %v11182_v21  ;;  %8515 = vrot.lane.b32.xlu1 %v8514_v63, %s8984_s23  ;;  %v11204_v42 = vsel %vm2757_vm4, %v8237_v38, %v13724_v35  ;;  %v3567_v40 = vsel %vm3565_vm14, %v8017_v14, %v13726_v5  ;;  %v3566_v5 = vsel %vm3565_vm14, %v8302_v43, %v8017_v14 }
 0x2cf   :  { %8530 = vrot.lane.b32.xlu0 %v8529_v9, %s8984_s23  ;;  %v8534_v9 = vpack.i.bf16 %v11188_v22, %v3329_v24  ;;  %v8539_v38 = vpack.i.bf16 %v11158_v55, %v11204_v42  ;;  %v8544_v24 = vpack.i.bf16 %v11141_v48, %v11153_v18  ;;  %v11235_v18 = vsel %vm2910_vm7, %v8262_v7, %v13729_v2 }
 0x2d0   :  { %v11195_v3 = vpop.permute.xlu1 %8325  ;;  %13730 = vst [vmem:[#allocation68_spill] sm:$0xff] %v11235_v18 }
 0x2d1   :  { %v11206_v63 = vpop.permute.xlu0 %8280  ;;  %v8327_v41 = vunpack.i.l.bf16 %v11195_v3 }
 0x2d2   :  { %13725 = vst [vmem:[#allocation13_spill] sm:$0xff] %v11206_v63  ;;  %8525 = vrot.lane.b32.xlu1 %v8524_v26, %s8984_s23  ;;  %v13727_v26 = vunpack.i.h.bf16 %v10926_v45  ;;  %v8317_v45 = vunpack.i.l.bf16 %v8316_v17 }
 0x2d3   :  { %8535 = vrot.lane.b32.xlu0 %v8534_v9, %s8984_s23  ;;  %v8303_v9 = vunpack.i.h.bf16 %v11118_v30  ;;  %v8318_v30 = vunpack.i.h.bf16 %v8316_v17 }
 0x2d4   :  { %v8331_v47 = vpop.permute.xlu1 %8330  ;;  %v11226_v36 = vsel %vm2910_vm7, %v13727_v26, %v8262_v7  ;;  %v8312_v26 = vunpack.i.l.bf16 %v11148_v13 }
 0x2d5   :  { %v11216_v35 = vpop.permute.xlu0 %8295  ;;  %13728 = vst [vmem:[#allocation67_spill] sm:$0xff] %v11226_v36  ;;  %v8549_v2 = vpack.i.bf16 %v11226_v36, %v11146_v57  ;;  %v8333_v25 = vunpack.i.h.bf16 %v8331_v47  ;;  %v8332_v36 = vunpack.i.l.bf16 %v8331_v47 }
 0x2d6   :  { %v8297_v55 = vunpack.i.l.bf16 %v11216_v35  ;;  %8540 = vrot.lane.b32.xlu1 %v8539_v38, %s8984_s23  ;;  %v13731_v38 = vunpack.i.h.bf16 %v11216_v35 }
 0x2d7   :  { %8545 = vrot.lane.b32.xlu0 %v8544_v24, %s8984_s23 }
 0x2d8   :  { %v3578_v63 = vsel %vm3565_vm14, %v8303_v9, %v8297_v55  ;;  %v11242_v48 = vpop.permute.xlu1 %8340  ;;  %v3579_v8 = vsel %vm3565_vm14, %v8297_v55, %v13731_v38  ;;  %v13732_v55 = vld [vmem:[#allocation11_spill] sm:$0xff]  ;;  %v13733_v38 = vunpack.i.h.bf16 %v11148_v13 }
 0x2d9   :  { %v11249_v7 = vpop.permute.xlu0 %8305  ;;  %v3879_v43 = vpack.c.bf16 %v3579_v8, %v3567_v40  ;;  %v3878_v14 = vpack.c.bf16 %v3578_v63, %v3566_v5  ;;  %v8554_v8 = vpack.i.bf16 %v13732_v55, %v11235_v18  ;;  %v3602_v40 = vsel %vm3565_vm14, %v8318_v30, %v8312_v26 }
 0x2da   :  { %v13534_v21 = vunpack.i.h.bf16 %v11249_v7  ;;  %v8307_v24 = vunpack.i.l.bf16 %v11249_v7  ;;  %8550 = vrot.lane.b32.xlu1 %v8549_v2, %s8984_s23  ;;  %v3603_v2 = vsel %vm3565_vm14, %v8312_v26, %v13733_v38  ;;  %v13734_v26 = vunpack.i.h.bf16 %v11195_v3 }
 0x2db   :  { %4006 = vmatprep.subr.bf16.mxu0 %v3879_v43  ;;  %2959 = vrot.lane.b32.xlu0 %v13602_v33, %s8977_s16  ;;  %v8559_v47 = vpack.i.bf16 %v13602_v33, %v13732_v55 }
 0x2dc   :  { %v3590_v17 = vsel %vm3565_vm14, %v8317_v45, %v8307_v24  ;;  %4007 = vmatpush1.bf16.msra.mxu0 %v3878_v14  ;;  %v8346_v63 = vpop.permute.xlu1 %8345  ;;  %v3591_v5 = vsel %vm3565_vm14, %v8307_v24, %v13534_v21  ;;  %v3626_v45 = vsel %vm3565_vm14, %v8333_v25, %v8327_v41  ;;  %v13540_v14 = vunpack.i.h.bf16 %v11242_v48 }
 0x2dd   :  { %v11268_v43 = vpop.permute.xlu0 %8320  ;;  %v3891_v9 = vpack.c.bf16 %v3603_v2, %v3591_v5  ;;  %v3890_v57 = vpack.c.bf16 %v3602_v40, %v3590_v17  ;;  %v3627_v24 = vsel %vm3565_vm14, %v8327_v41, %v13734_v26  ;;  %v8342_v40 = vunpack.i.l.bf16 %v11242_v48 }
 0x2de   :  { %v13535_v18 = vunpack.i.h.bf16 %v11268_v43  ;;  %v8322_v30 = vunpack.i.l.bf16 %v11268_v43  ;;  %8555 = vrot.lane.b32.xlu1 %v8554_v8, %s8984_s23  ;;  %v8348_v17 = vunpack.i.h.bf16 %v8346_v63  ;;  %v8347_v41 = vunpack.i.l.bf16 %v8346_v63 }
 0x2df   :  { %4008 = vmatprep.subr.bf16.mxu0 %v3891_v9  ;;  %3010 = vrot.lane.b32.xlu0 %v13602_v33, %s8979_s18 }
 0x2e0   :  { %v3614_v8 = vsel %vm3565_vm14, %v8332_v36, %v8322_v30  ;;  %4009 = vmatpush1.bf16.msra.mxu0 %v3890_v57  ;;  %v11284_v25 = vpop.permute.xlu1 %2602  ;;  %v3615_v9 = vsel %vm3565_vm14, %v8322_v30, %v13535_v18  ;;  %v3650_v57 = vsel %vm3565_vm14, %v8348_v17, %v8342_v40  ;;  %v13735_v36 = vld [vmem:[#allocation7_spill] sm:$0xff] }
 0x2e1   :  { %v3902_v5 = vpack.c.bf16 %v3626_v45, %v3614_v8  ;;  %v11289_v38 = vpop.permute.xlu0 %8335  ;;  %v3903_v2 = vpack.c.bf16 %v3627_v24, %v3615_v9  ;;  %v3651_v24 = vsel %vm3565_vm14, %v8342_v40, %v13540_v14  ;;  %v13737_v40 = vunpack.i.h.bf16 %v11105_v12 }
 0x2e2   :  { %v8338_v26 = vunpack.i.h.bf16 %v11289_v38  ;;  %v8337_v21 = vunpack.i.l.bf16 %v11289_v38  ;;  %8560 = vrot.lane.b32.xlu1 %v8559_v47, %s8978_s17 }
 0x2e3   :  { %4010 = vmatprep.subr.bf16.mxu0 %v3903_v2  ;;  %8565 = vrot.lane.b32.xlu0 %v8559_v47, %s8981_s20 }
 0x2e4   :  { %v3638_v30 = vsel %vm3565_vm14, %v8347_v41, %v8337_v21  ;;  %4011 = vmatpush1.bf16.msra.mxu0 %v3902_v5  ;;  %v11298_v45 = vpop.permute.xlu1 %8360  ;;  %v3639_v63 = vsel %vm3565_vm14, %v8337_v21, %v8338_v26  ;;  %v13736_v5 = vunpack.i.h.bf16 %v11023_v37 }
 0x2e5   :  { %v3914_v8 = vpack.c.bf16 %v3650_v57, %v3638_v30  ;;  %v13539_v9 = vunpack.i.h.bf16 %v11298_v45  ;;  %v8362_v2 = vunpack.i.l.bf16 %v11298_v45  ;;  %v8351_v18 = vpop.permute.xlu0 %8350  ;;  %v3915_v17 = vpack.c.bf16 %v3651_v24, %v3639_v63 }
 0x2e6   :  { %v11312_v41 = vsel %vm13538_vm1, %v13736_v5, %v13735_v36  ;;  %v8353_v55 = vunpack.i.h.bf16 %v8351_v18  ;;  %v8352_v28 = vunpack.i.l.bf16 %v8351_v18  ;;  %8570 = vrot.lane.b32.xlu1 %v8559_v47, %s8980_s19  ;;  %v13738_v24 = vunpack.i.h.bf16 %v11043_v32 }
 0x2e7   :  { %v11318_v21 = vsel %vm2706_vm8, %v8362_v2, %v13539_v9  ;;  %4012 = vmatprep.subr.bf16.mxu0 %v3915_v17  ;;  %8575 = vrot.lane.b32.xlu0 %v8559_v47, %s8982_s21  ;;  %v11324_v57 = vsel %vm2706_vm8, %v13737_v40, %v8362_v2  ;;  %vm3953_vm1 = vcmask 1043456   ;;  %v13739_v9 = vunpack.i.h.bf16 %v10957_v58  ;;  %v11367_v58 = vld [vmem:[%s13402_s2] ss:$8 sps:$4 sm:$0xff]  }
 0x2e8   :  { %4013 = vmatpush1.bf16.msra.mxu0 %v3914_v8  ;;  %v11328_v18 = vpop.permute.xlu1 %8365  ;;  %v3662_v30 = vsel %vm3565_vm14, %v8352_v28, %v8353_v55  ;;  %v11337_v17 = vsel %vm13696_vm15, %v13738_v24, %v11284_v25  ;;  %v8584_v8 = vpack.i.bf16 %v11312_v41, %v13602_v33  ;;  %v12458_v33 = vld [vmem:[%s13403_s3 + $0xb0] sm:$0xff]  }
 0x2e9   :  { %v8367_v2 = vunpack.i.l.bf16 %v11328_v18  ;;  %v11340_v5 = vpop.permute.xlu0 %8355  ;;  %v3926_v40 = vpack.c.bf16 %v3662_v30, %v3662_v30  ;;  %v8589_v32 = vpack.i.bf16 %v11337_v17, %v13735_v36 }
 0x2ea   :  { %8580 = vrot.lane.b32.xlu1 %v8559_v47, %s8983_s22  ;;  %v13740_v47 = vunpack.i.h.bf16 %v10940_v62 }
 0x2eb   :  { %v3663_v28 = vsel %vm3565_vm14, %v8353_v55, %v8367_v2  ;;  %8585 = vrot.lane.b32.xlu0 %v8584_v8, %s8984_s23  ;;  %v3955_v55 = vsel %vm3953_vm1, %v3926_v40, 0  ;;  %v3787_v8 = vpack.c.bf16 %v10836_v19, %v10045_v1  ;;  %v3786_v1 = vpack.c.bf16 %v10622_v44, %v10043_v0  ;;  %v13743_v0 = vld [vmem:[#allocation19_spill] sm:$0xff] }
 0x2ec   :  { %v3927_v24 = vpack.c.bf16 %v3663_v28, %v3663_v28  ;;  %v3317_v37 = vpop.permute.xlu1 %3316  ;;  %v13741_v19 = vunpack.i.h.bf16 %v11085_v39  ;;  %v8368_v44 = vunpack.i.h.bf16 %v11328_v18 }
 0x2ed   :  { %v3330_v63 = vsel %vm3318_vm0, %v13739_v9, %v3317_v37  ;;  %v2654_v14 = vpop.permute.xlu0 %2653  ;;  %v8142_v9 = vunpack.i.l.bf16 %v10746_v52 }
 0x2ee   :  { %v11357_v30 = vsel %vm2655_vm3, %v13740_v47, %v2654_v14  ;;  %7256 = vmatprep.subr.msk.bf16.mxu0 %vm3953_vm1, %v3927_v24  ;;  %8590 = vrot.lane.b32.xlu1 %v8589_v32, %s8984_s23  ;;  %v8599_v32 = vpack.i.bf16 %v3330_v63, %v2654_v14  ;;  %v13742_v63 = vunpack.i.h.bf16 %v10614_v59  ;;  %vm13777_vm3 = vcmask 523264  }
 0x2ef   :  { %v8594_v62 = vpack.i.bf16 %v11357_v30, %v11284_v25  ;;  %4015 = vmatpush1.bf16.msra.mxu0 %v3955_v55  ;;  %v13744_v55 = vpack.c.bf16 %v13659_v11, %v10567_v49  ;;  %v13745_v49 = vpack.c.bf16 %v10470_v20, %v10480_v4  ;;  %v13746_v11 = vunpack.i.h.bf16 %v13723_v23  ;;  %vm13831_vm0 = vmmov %vm13777_vm3 }
 0x2f0   :  { %v11374_v24 = vpop.permute.xlu1 %8375  ;;  %4076 = vmatprep.subr.bf16.mxu0 %v3787_v8  ;;  %v2712_v47 = vsel %vm2706_vm8, %v13742_v63, %v8142_v9  ;;  %v13747_v63 = vunpack.i.h.bf16 %v11216_v35 }
 0x2f1   :  { %v11376_v40 = vpop.permute.xlu0 %2755  ;;  %8595 = vrot.lane.b32.xlu0 %v8594_v62, %s8984_s23 }
 0x2f2   :  { %v11385_v25 = vsel %vm2757_vm4, %v13741_v19, %v11376_v40  ;;  %8600 = vrot.lane.b32.xlu1 %v8599_v32, %s8984_s23  ;;  %4023 = vmatmul.mubr.bf16.vlgmr.msra.gmra.mrb[48].mxu0 %v11367_v58  ;;  %v3811_v32 = vpack.c.bf16 %v10885_v46, %v2712_v47  ;;  %v8378_v19 = vunpack.i.h.bf16 %v11374_v24 }
 0x2f3   :  { %v8604_v14 = vpack.i.bf16 %v11385_v25, %v3317_v37  ;;  %4077 = vmatpush1.bf16.msra.mxu0 %v3786_v1  ;;  %7261 = vmatprep.mubr.msk.bf16.mxu0 %vm3949_vm2, %v13743_v0  ;;  %v8377_v37 = vunpack.i.l.bf16 %v11374_v24  ;;  %v13541_v1 = vunpack.i.l.bf16 %v10872_v15 }
 0x2f4   :  { %v11398_v39 = vpop.permute.xlu1 %8385  ;;  %4078 = vmatprep.subr.bf16.mxu0 %v13744_v55 }
 0x2f5   :  { %v11403_v8 = vpop.permute.xlu0 %8370  ;;  %8605 = vrot.lane.b32.xlu0 %v8604_v14, %s8984_s23  ;;  %v3568_v14 = vsel %vm3565_vm14, %v13746_v11, %v8368_v44  ;;  %v8387_v28 = vunpack.i.l.bf16 %v11398_v39 }
 0x2f6   :  { %v8373_v59 = vunpack.i.h.bf16 %v11403_v8  ;;  %v8372_v62 = vunpack.i.l.bf16 %v11403_v8  ;;  %v13791_v8 = vld [vmem:[#allocation12_spill] sm:$0xff] }
 0x2f7   :  { %4079 = vmatpush1.bf16.msra.mxu0 %v13745_v49  ;;  %v13542_v49 = vunpack.i.l.bf16 %v10781_v60 }
 0x2f8   :  { %v3580_v0 = vsel %vm3565_vm14, %v13747_v63, %v8373_v59  ;;  %v11421_v55 = vpop.permute.xlu1 %8390  ;;  %4080 = vmatprep.subr.bf16.mxu0 %v3811_v32  ;;  %v3569_v46 = vsel %vm3565_vm14, %v8368_v44, %v8372_v62  ;;  %v3581_v20 = vsel %vm3565_vm14, %v8373_v59, %v8377_v37  ;;  %v13543_v32 = vunpack.i.l.bf16 %v10890_v56 }
 0x2f9   :  { %v3880_v4 = vpack.c.bf16 %v3580_v0, %v3568_v14  ;;  %v11429_v47 = vpop.permute.xlu0 %8380  ;;  %v3881_v23 = vpack.c.bf16 %v3581_v20, %v3569_v46  ;;  %v13748_v63 = vunpack.i.h.bf16 %v11249_v7  ;;  %v13749_v59 = vpack.c.bf16 %v10635_v10, %v10646_v53 }
 0x2fa   :  { %v8383_v35 = vunpack.i.h.bf16 %v11429_v47  ;;  %v13546_v11 = vunpack.i.l.bf16 %v11429_v47  ;;  %v13750_v14 = vunpack.i.h.bf16 %v10719_v16  ;;  %v8393_v46 = vunpack.i.h.bf16 %v11421_v55 }
 0x2fb   :  { %v3592_v44 = vsel %vm3565_vm14, %v13748_v63, %v8378_v19  ;;  %4049 = vmatprep.subr.bf16.mxu1 %v3881_v23  ;;  %4081 = vmatpush1.bf16.msra.mxu0 %v13749_v59  ;;  %v13544_v20 = vunpack.i.l.bf16 %v11421_v55  ;;  %v13751_v7 = vunpack.i.h.bf16 %v11148_v13  ;;  %v13752_v53 = vpack.c.bf16 %v10687_v6, %v10674_v29 }
 0x2fc   :  { %v2967_v0 = vsel %vm2961_vm9, %v13750_v14, %v13541_v1  ;;  %4050 = vmatpush1.bf16.msra.mxu1 %v3880_v4  ;;  %v11452_v23 = vpop.permute.xlu1 %2857  ;;  %v3593_v10 = vsel %vm3565_vm14, %v8378_v19, %v13546_v11  ;;  %v3605_v13 = vsel %vm3565_vm14, %v8383_v35, %v8387_v28  ;;  %v8388_v14 = vunpack.i.h.bf16 %v11398_v39 }
 0x2fd   :  { %v3604_v63 = vsel %vm3565_vm14, %v13751_v7, %v8383_v35  ;;  %4082 = vmatprep.subr.bf16.mxu0 %v13752_v53  ;;  %v11460_v59 = vpop.permute.xlu0 %8395  ;;  %v3893_v7 = vpack.c.bf16 %v3605_v13, %v3593_v10  ;;  %v3835_v1 = vpack.c.bf16 %v2967_v0, %v10917_v54  ;;  %v13552_v6 = vunpack.i.l.bf16 %v10905_v50  ;;  %v13755_v35 = vld [vmem:[#allocation20_spill] sm:$0xff] }
 0x2fe   :  { %v3892_v16 = vpack.c.bf16 %v3604_v63, %v3592_v44  ;;  %v13545_v4 = vunpack.i.l.bf16 %v11460_v59  ;;  %v13753_v29 = vpack.c.bf16 %v10533_v51, %v10528_v27  ;;  %v13754_v19 = vunpack.i.h.bf16 %v10748_v34  ;;  %v13758_v13 = vld [vmem:[#allocation32_spill] sm:$0xff] }
 0x2ff   :  { %v13756_v63 = vunpack.i.h.bf16 %v13755_v35  ;;  %v13757_v54 = vunpack.i.h.bf16 %v11195_v3  ;;  %v8398_v10 = vunpack.i.h.bf16 %v11460_v59  ;;  %4051 = vmatprep.subr.bf16.mxu1 %v3893_v7  ;;  %v3617_v51 = vsel %vm3565_vm14, %v8388_v14, %v13544_v20 }
 0x300   :  { %4083 = vmatpush1.bf16.msra.mxu0 %v13753_v29  ;;  %v3018_v44 = vsel %vm3012_vm11, %v13754_v19, %v13543_v32  ;;  %v11486_v27 = vpop.permute.xlu1 %8405  ;;  %v3629_v34 = vsel %vm3565_vm14, %v8393_v46, %v13545_v4  ;;  %v13548_v29 = vunpack.i.l.bf16 %v13758_v13  ;;  %4052 = vmatpush1.bf16.msra.mxu1 %v3892_v16  ;;  %v13761_v16 = vunpack.i.h.bf16 %v11124_v61 }
 0x301   :  { %v3069_v53 = vsel %vm3063_vm10, %v13756_v63, %v13542_v49  ;;  %v3628_v0 = vsel %vm3565_vm14, %v13757_v54, %v8393_v46  ;;  %4084 = vmatprep.subr.bf16.mxu0 %v3835_v1  ;;  %v8408_v3 = vunpack.i.h.bf16 %v11486_v27  ;;  %v8407_v19 = vunpack.i.l.bf16 %v11486_v27  ;;  %v11497_v35 = vpop.permute.xlu0 %8400  ;;  %v13760_v46 = vld [vmem:[#allocation38_spill] sm:$0xff] }
 0x302   :  { %v3905_v7 = vpack.c.bf16 %v3629_v34, %v3617_v51  ;;  %v13759_v1 = vunpack.i.h.bf16 %v11268_v43  ;;  %v8403_v54 = vunpack.i.h.bf16 %v11497_v35  ;;  %v13553_v49 = vunpack.i.l.bf16 %v11497_v35  ;;  %v13762_v51 = vld [vmem:[#allocation26_spill] sm:$0xff]  ;;  %v13763_v34 = vld [vmem:[#allocation25_spill] sm:$0xff] }
 0x303   :  { %v3847_v32 = vpack.c.bf16 %v3069_v53, %v3018_v44  ;;  %v13547_v20 = vunpack.i.l.bf16 %v13760_v46  ;;  %v11509_v11 = vsel %vm2859_vm6, %v13761_v16, %v11452_v23  ;;  %v13764_v43 = vpack.c.bf16 %v13762_v51, %v13763_v34  ;;  %13906 = vst [vmem:[#allocation26_spill] sm:$0xff] %v12458_v33 }
 0x304   :  { %v3616_v63 = vsel %vm3565_vm14, %v13759_v1, %v8388_v14  ;;  %4053 = vmatprep.subr.bf16.mxu1 %v3905_v7  ;;  %v13765_v14 = vld [vmem:[#allocation29_spill] sm:$0xff]  ;;  %v3640_v53 = vsel %vm3565_vm14, %v8338_v26, %v8398_v10  ;;  %v13767_v61 = vunpack.i.h.bf16 %v11242_v48  ;;  %v3641_v7 = vsel %vm3565_vm14, %v8398_v10, %v13553_v49 }
 0x305   :  { %v3904_v4 = vpack.c.bf16 %v3628_v0, %v3616_v63  ;;  %4085 = vmatpush1.bf16.msra.mxu0 %v13764_v43  ;;  %v13766_v1 = vunpack.i.h.bf16 %v13765_v14  ;;  %v11525_v63 = vpop.permute.xlu1 %8410  ;;  %v3653_v16 = vsel %vm3565_vm14, %v8403_v54, %v8407_v19  ;;  %v2807_v26 = vpop.permute.xlu0 %2806  ;;  %v3664_v48 = vsel %vm3565_vm14, %v8367_v2, %v8408_v3  ;;  %v13768_v43 = vld [vmem:[#allocation37_spill] sm:$0xff] }
 0x306   :  { %v3652_v0 = vsel %vm3565_vm14, %v13767_v61, %v8403_v54  ;;  %4086 = vmatprep.subr.bf16.mxu0 %v3847_v32  ;;  %v8412_v38 = vunpack.i.l.bf16 %v11525_v63  ;;  %v3917_v34 = vpack.c.bf16 %v3653_v16, %v3641_v7  ;;  %v13551_v32 = vunpack.i.l.bf16 %v13768_v43  ;;  %v13772_v7 = vld [vmem:[#allocation27_spill] sm:$0xff]  ;;  %v13773_v16 = vld [vmem:[#allocation28_spill] sm:$0xff] }
 0x307   :  { %v3120_v44 = vsel %vm3114_vm12, %v13766_v1, %v13552_v6  ;;  %v3916_v51 = vpack.c.bf16 %v3652_v0, %v3640_v53  ;;  %4054 = vmatpush1.bf16.msra.mxu1 %v3904_v4  ;;  %v13769_v14 = vunpack.i.h.bf16 %v10978_v31  ;;  %v8614_v1 = vpack.i.bf16 %v11509_v11, %v2807_v26  ;;  %v13770_v4 = vld [vmem:[#allocation23_spill] sm:$0xff] }
 0x308   :  { %v13771_v54 = vunpack.i.h.bf16 %v13770_v4  ;;  %v3665_v18 = vsel %vm3565_vm14, %v8408_v3, %v8412_v38  ;;  %4055 = vmatprep.subr.bf16.mxu1 %v3917_v34  ;;  %v3928_v4 = vpack.c.bf16 %v3664_v48, %v3664_v48  ;;  %v13775_v3 = vld [vmem:[#allocation24_spill] sm:$0xff]  ;;  %v13778_v48 = vld [vmem:[#allocation33_spill] sm:$0xff] }
 0x309   :  { %v11541_v10 = vsel %vm2808_vm5, %v13769_v14, %v2807_v26  ;;  %v3929_v0 = vpack.c.bf16 %v3665_v18, %v3665_v18  ;;  %v13774_v26 = vpack.c.bf16 %v13772_v7, %v13773_v16  ;;  %8615 = vrot.lane.b32.xlu0 %v8614_v1, %s8984_s23  ;;  %v11560_v14 = vpop.permute.xlu1 %8420  ;;  %v13779_v7 = vunpack.i.h.bf16 %v13778_v48 }
 0x30a   :  { %v3171_v53 = vsel %vm3165_vm13, %v13771_v54, %v13548_v29  ;;  %v8609_v2 = vpack.i.bf16 %v11541_v10, %v11376_v40  ;;  %v13776_v54 = vunpack.i.h.bf16 %v13775_v3  ;;  %v13550_v34 = vunpack.i.l.bf16 %v11560_v14  ;;  %v13782_v3 = vld [vmem:[#allocation31_spill] sm:$0xff]  ;;  %v13785_v29 = vld [vmem:[#allocation41_spill] sm:$0xff] }
 0x30b   :  { %v3859_v61 = vpack.c.bf16 %v3171_v53, %v3120_v44  ;;  %4087 = vmatpush1.bf16.msra.mxu0 %v13774_v26  ;;  %4056 = vmatpush1.bf16.msra.mxu1 %v3916_v51  ;;  %v11568_v44 = vpop.permute.xlu0 %8415  ;;  %v8413_v53 = vunpack.i.h.bf16 %v11525_v63  ;;  %vm13780_vm5 = vcmask 310272   ;;  %v3961_v26 = vsel %vm3953_vm1, %v3928_v4, 0 }
 0x30c   :  { %v3222_v40 = vsel %vm13777_vm3, %v13776_v54, %v13547_v20  ;;  %v8418_v18 = vunpack.i.h.bf16 %v11568_v44  ;;  %v13549_v1 = vunpack.i.l.bf16 %v11568_v44  ;;  %8610 = vrot.lane.b32.xlu1 %v8609_v2, %s8984_s23  ;;  %7258 = vmatprep.subr.msk.bf16.mxu1 %vm3953_vm1, %v3929_v0  ;;  %v3273_v51 = vsel %vm13780_vm5, %v13779_v7, %v13551_v32  ;;  %v13784_v20 = vld [vmem:[#allocation6_spill] sm:$0xff]  ;;  %v13789_v32 = vld [vmem:[#allocation35_spill] sm:$0xff]  ;;  %vm13825_vm6 = vmmov %vm13780_vm5 }
 0x30d   :  { %4088 = vmatprep.subr.bf16.mxu0 %v3859_v61  ;;  %v3871_v16 = vpack.c.bf16 %v3273_v51, %v3222_v40  ;;  %v13781_v61 = vld [vmem:[#allocation30_spill] sm:$0xff]  ;;  %v11584_v31 = vpop.permute.xlu1 %8430  ;;  %v3789_v2 = vpack.c.bf16 %v13785_v29, %v13784_v20  ;;  %v13561_v40 = vunpack.i.l.bf16 %v11105_v12  ;;  %v8423_v51 = vunpack.i.h.bf16 %v11560_v14  ;;  %vm13836_vm15 = vmmov %vm13780_vm5 }
 0x30e   :  { %v13783_v54 = vpack.c.bf16 %v13781_v61, %v13782_v3  ;;  %v3571_v0 = vsel %vm3565_vm14, %v8413_v53, %v13549_v1  ;;  %v3583_v48 = vsel %vm3565_vm14, %v8418_v18, %v13550_v34  ;;  %v13554_v4 = vunpack.i.l.bf16 %v11584_v31  ;;  %v13786_v3 = vld [vmem:[#allocation5_spill] sm:$0xff]  ;;  %v13788_v34 = vld [vmem:[#allocation36_spill] sm:$0xff] }
 0x30f   :  { %4058 = vmatpush1.bf16.msra.mxu1 %v3961_v26  ;;  %v11596_v7 = vpop.permute.xlu0 %8425  ;;  %v8143_v61 = vunpack.i.h.bf16 %v10746_v52  ;;  %v3582_v26 = vsel %vm3565_vm14, %v8377_v37, %v8418_v18  ;;  %v13790_v6 = vpack.c.bf16 %v13788_v34, %v13789_v32  ;;  %v3570_v37 = vsel %vm3565_vm14, %v8372_v62, %v8413_v53  ;;  %v11639_v53 = vld [vmem:[%s13402_s2 + $0x4] ss:$8 sps:$4 sm:$0xff]  }
 0x310   :  { %4089 = vmatpush1.bf16.msra.mxu0 %v13783_v54  ;;  %v8428_v20 = vunpack.i.h.bf16 %v11596_v7  ;;  %v13557_v29 = vunpack.i.l.bf16 %v11596_v7  ;;  %3537 = vrot.lane.b32.xlu1 %v11452_v23, %s8984_s23  ;;  %v13787_v54 = vld [vmem:[#allocation34_spill] sm:$0xff] }
 0x311   :  { %4090 = vmatprep.subr.bf16.mxu0 %v3871_v16  ;;  %4119 = vmatprep.subr.bf16.mxu1 %v3789_v2  ;;  %v3788_v1 = vpack.c.bf16 %v13787_v54, %v13786_v3  ;;  %v3883_v16 = vpack.c.bf16 %v3583_v48, %v3571_v0  ;;  %v11613_v49 = vpop.permute.xlu1 %8435  ;;  %v2714_v34 = vsel %vm2706_vm8, %v8143_v61, %v13561_v40  ;;  %v8433_v0 = vunpack.i.h.bf16 %v11584_v31  ;;  %v13792_v3 = vld [vmem:[#allocation14_spill] sm:$0xff] }
 0x312   :  { %4066 = vmatmul.mubr.bf16.vlgmr.msra.gmra.mrb[48].mxu1 %v11367_v58  ;;  %v3595_v23 = vsel %vm3565_vm14, %v8423_v51, %v13557_v29  ;;  %v3607_v24 = vsel %vm3565_vm14, %v8428_v20, %v13554_v4  ;;  %v8438_v18 = vunpack.i.h.bf16 %v11613_v49  ;;  %v13555_v32 = vunpack.i.l.bf16 %v11613_v49 }
 0x313   :  { %4120 = vmatpush1.bf16.msra.mxu1 %v3788_v1  ;;  %v3882_v2 = vpack.c.bf16 %v3582_v26, %v3570_v37  ;;  %v13793_v62 = vpack.c.bf16 %v13791_v8, %v13792_v3  ;;  %7263 = vmatprep.mubr.msk.bf16.mxu1 %vm3949_vm2, %v11639_v53  ;;  %v2713_v1 = vsel %vm2706_vm8, %v8142_v9, %v8143_v61  ;;  %v13795_v3 = vld [vmem:[#allocation55_spill] sm:$0xff]  ;;  %v13796_v9 = vunpack.i.l.bf16 %v11429_v47  ;;  %v13802_v47 = vld [vmem:[#allocation17_spill] sm:$0xff] }
 0x314   :  { %4091 = vmatpush1.bf16.msra.mxu0 %v13790_v6  ;;  %v11626_v6 = vpop.permute.xlu0 %8440  ;;  %v3606_v26 = vsel %vm3565_vm14, %v8387_v28, %v8428_v20  ;;  %v3895_v54 = vpack.c.bf16 %v3607_v24, %v3595_v23  ;;  %v3619_v4 = vsel %vm3565_vm14, %v8433_v0, %v13555_v32  ;;  %v13797_v28 = vld [vmem:[#allocation18_spill] sm:$0xff]  ;;  %v13798_v20 = vld [vmem:[#allocation16_spill] sm:$0xff] }
 0x315   :  { %4092 = vmatprep.subr.bf16.mxu0 %v3883_v16  ;;  %v13556_v48 = vunpack.i.l.bf16 %v11626_v6  ;;  %4121 = vmatprep.subr.bf16.mxu1 %v13793_v62  ;;  %v13794_v16 = vld [vmem:[#allocation65_spill] sm:$0xff]  ;;  %v2909_v8 = vpop.permute.xlu1 %2908  ;;  %v3813_v62 = vpack.c.bf16 %v13795_v3, %v2714_v34  ;;  %v3594_v39 = vsel %vm3565_vm14, %v13796_v9, %v8423_v51  ;;  %v13799_v61 = vpack.c.bf16 %v13797_v28, %v13798_v20  ;;  %v13800_v23 = vld [vmem:[#allocation44_spill] sm:$0xff] }
 0x316   :  { %v13559_v37 = vunpack.i.l.bf16 %v13794_v16  ;;  %v13801_v24 = vunpack.i.h.bf16 %v13800_v23  ;;  %v8148_v3 = vunpack.i.h.bf16 %v10872_v15  ;;  %v3894_v32 = vpack.c.bf16 %v3606_v26, %v3594_v39 }
 0x317   :  { %v3631_v52 = vsel %vm3565_vm14, %v8438_v18, %v13556_v48  ;;  %4122 = vmatpush1.bf16.msra.mxu1 %v13799_v61  ;;  %v3812_v51 = vpack.c.bf16 %v13802_v47, %v2713_v1  ;;  %v13803_v9 = vunpack.i.l.bf16 %v11460_v59  ;;  %v13805_v59 = vunpack.i.l.bf16 %v11421_v55  ;;  %v13807_v55 = vld [vmem:[#allocation45_spill] sm:$0xff]  ;;  %v13808_v47 = vld [vmem:[#allocation42_spill] sm:$0xff] }
 0x318   :  { %4093 = vmatpush1.bf16.msra.mxu0 %v3882_v2  ;;  %v11666_v34 = vsel %vm2910_vm7, %v13801_v24, %v2909_v8  ;;  %v11668_v2 = vpop.permute.xlu0 %8445  ;;  %4123 = vmatprep.subr.bf16.mxu1 %v3813_v62  ;;  %v3907_v23 = vpack.c.bf16 %v3631_v52, %v3619_v4  ;;  %v13804_v24 = vld [vmem:[#allocation66_spill] sm:$0xff]  ;;  %v2969_v1 = vsel %vm2961_vm9, %v8148_v3, %v13559_v37  ;;  %v8443_v26 = vunpack.i.h.bf16 %v11626_v6  ;;  %vm13829_vm7 = vmmov %vm13777_vm3 }
 0x319   :  { %4094 = vmatprep.subr.bf16.mxu0 %v3895_v54  ;;  %v8619_v48 = vpack.i.bf16 %v2909_v8, %v11666_v34  ;;  %v3630_v28 = vsel %vm3565_vm14, %v13803_v9, %v8438_v18  ;;  %v8448_v20 = vunpack.i.h.bf16 %v11668_v2  ;;  %v13558_v61 = vunpack.i.l.bf16 %v11668_v2  ;;  %v11679_v54 = vpop.permute.xlu1 %8460  ;;  %v13810_v9 = vld [vmem:[#allocation48_spill] sm:$0xff]  ;;  %v13814_v37 = vld [vmem:[#allocation22_spill] sm:$0xff]  ;;  %vm13862_vm3 = vmmov %vm13831_vm0 }
 0x31a   :  { %v8272_v29 = vunpack.i.l.bf16 %v13804_v24  ;;  %v3618_v18 = vsel %vm3565_vm14, %v13805_v59, %v8433_v0  ;;  %v8463_v4 = vunpack.i.h.bf16 %v11679_v54  ;;  %v13560_v8 = vunpack.i.l.bf16 %v11679_v54 }
 0x31b   :  { %8620 = vrot.lane.b32.xlu0 %v8619_v48, %s8984_s23  ;;  %4124 = vmatpush1.bf16.msra.mxu1 %v3812_v51  ;;  %v13806_v48 = vunpack.i.l.bf16 %v10872_v15  ;;  %v8153_v52 = vunpack.i.h.bf16 %v10890_v56  ;;  %v3906_v39 = vpack.c.bf16 %v3630_v28, %v3618_v18  ;;  %v13809_v0 = vpack.c.bf16 %v13807_v55, %v13808_v47  ;;  %v13811_v18 = vld [vmem:[#allocation57_spill] sm:$0xff] }
 0x31c   :  { %4095 = vmatpush1.bf16.msra.mxu0 %v3894_v32  ;;  %v11691_v32 = vpop.permute.xlu0 %8450  ;;  %v8277_v51 = vunpack.i.l.bf16 %v13810_v9  ;;  %v3654_v59 = vsel %vm3565_vm14, %v8407_v19, %v8448_v20  ;;  %v3655_v15 = vsel %vm3565_vm14, %v8448_v20, %v13560_v8  ;;  %v3666_v27 = vsel %vm3565_vm14, %v8412_v38, %v8463_v4  ;;  %v13812_v19 = vld [vmem:[#allocation13_spill] sm:$0xff] }
 0x31d   :  { %4096 = vmatprep.subr.bf16.mxu0 %v3907_v23  ;;  %v2968_v62 = vsel %vm2961_vm9, %v13806_v48, %v8148_v3  ;;  %4125 = vmatprep.subr.bf16.mxu1 %v13809_v0  ;;  %v3643_v23 = vsel %vm3565_vm14, %v8443_v26, %v13558_v61  ;;  %v8158_v3 = vunpack.i.h.bf16 %v10781_v60  ;;  %v11711_v28 = vpop.permute.xlu1 %8465  ;;  %v3837_v48 = vpack.c.bf16 %v2969_v1, %v13811_v18  ;;  %v13815_v20 = vld [vmem:[#allocation21_spill] sm:$0xff] }
 0x31e   :  { %v3919_v55 = vpack.c.bf16 %v3655_v15, %v3643_v23  ;;  %v8282_v47 = vunpack.i.l.bf16 %v13812_v19  ;;  %v13813_v0 = vunpack.i.l.bf16 %v11497_v35  ;;  %v13816_v8 = vpack.c.bf16 %v13814_v37, %v13815_v20 }
 0x31f   :  { %v3020_v63 = vsel %vm3012_vm11, %v8153_v52, %v8272_v29  ;;  %v13817_v38 = vunpack.i.l.bf16 %v10890_v56  ;;  %v8163_v35 = vunpack.i.h.bf16 %v10905_v50  ;;  %v3930_v56 = vpack.c.bf16 %v3666_v27, %v3666_v27 }
 0x320   :  { %4097 = vmatpush1.bf16.msra.mxu0 %v3906_v39  ;;  %v3642_v61 = vsel %vm3565_vm14, %v13813_v0, %v8443_v26  ;;  %4126 = vmatpush1.bf16.msra.mxu1 %v13816_v8  ;;  %v13562_v39 = vunpack.i.l.bf16 %v11711_v28  ;;  %v11725_v40 = vpop.permute.xlu0 %8455  ;;  %v13818_v26 = vld [vmem:[#allocation39_spill] sm:$0xff]  ;;  %v13819_v8 = vld [vmem:[#allocation52_spill] sm:$0xff]  ;;  %v3071_v0 = vsel %vm3063_vm10, %v8158_v3, %v8277_v51 }
 0x321   :  { %v3019_v1 = vsel %vm3012_vm11, %v13817_v38, %v8153_v52  ;;  %v3918_v23 = vpack.c.bf16 %v3654_v59, %v3642_v61  ;;  %4127 = vmatprep.subr.bf16.mxu1 %v3837_v48  ;;  %4098 = vmatprep.subr.bf16.mxu0 %v3919_v55  ;;  %v3836_v37 = vpack.c.bf16 %v2968_v62, %v13818_v26  ;;  %v13567_v15 = vunpack.i.l.bf16 %v13819_v8  ;;  %v11742_v52 = vpop.permute.xlu1 %3057 }
 0x322   :  { %v3667_v18 = vsel %vm3565_vm14, %v8463_v4, %v13562_v39  ;;  %v3849_v61 = vpack.c.bf16 %v3071_v0, %v3020_v63  ;;  %v13820_v59 = vunpack.i.l.bf16 %v10781_v60  ;;  %v8168_v48 = vunpack.i.h.bf16 %v13758_v13  ;;  %v13821_v60 = vld [vmem:[#allocation56_spill] sm:$0xff] }
 0x323   :  { %v3931_v20 = vpack.c.bf16 %v3667_v18, %v3667_v18  ;;  %v13565_v55 = vunpack.i.l.bf16 %v11340_v5  ;;  %v3122_v27 = vsel %vm3114_vm12, %v8163_v35, %v8282_v47  ;;  %v8178_v38 = vunpack.i.h.bf16 %v13768_v43  ;;  %v13823_v18 = vld [vmem:[#allocation64_spill] sm:$0xff] }
 0x324   :  { %4099 = vmatpush1.bf16.msra.mxu0 %v3918_v23  ;;  %v3070_v62 = vsel %vm3063_vm10, %v13820_v59, %v8158_v3  ;;  %4128 = vmatpush1.bf16.msra.mxu1 %v3836_v37  ;;  %v11749_v4 = vpop.permute.xlu0 %3108  ;;  %v13563_v23 = vunpack.i.l.bf16 %v13821_v60  ;;  %v3967_v3 = vsel %vm3953_vm1, %v3930_v56, 0  ;;  %v3173_v26 = vsel %vm3165_vm13, %v8168_v48, %v13567_v15  ;;  %v13822_v37 = vld [vmem:[#allocation9_spill] sm:$0xff] }
 0x325   :  { %4129 = vmatprep.subr.bf16.mxu1 %v3849_v61  ;;  %7260 = vmatprep.subr.msk.bf16.mxu0 %vm3953_vm1, %v3931_v20  ;;  %v3848_v63 = vpack.c.bf16 %v3070_v62, %v3019_v1  ;;  %v3791_v0 = vpack.c.bf16 %v13823_v18, %v13822_v37  ;;  %v13824_v59 = vunpack.i.l.bf16 %v10905_v50  ;;  %v8173_v61 = vunpack.i.h.bf16 %v13760_v46  ;;  %v11767_v20 = vpop.permute.xlu1 %3159  ;;  %v13828_v18 = vld [vmem:[#allocation47_spill] sm:$0xff] }
 0x326   :  { %v3861_v1 = vpack.c.bf16 %v3173_v26, %v3122_v27  ;;  %v3275_v56 = vsel %vm13825_vm6, %v8178_v38, %v13565_v55  ;;  %v13826_v37 = vunpack.i.l.bf16 %v13758_v13  ;;  %v13846_v55 = vunpack.i.l.bf16 %v13794_v16  ;;  %vm13866_vm6 = vmmov %vm13780_vm5 }
 0x327   :  { %v3121_v39 = vsel %vm3114_vm12, %v13824_v59, %v8163_v35  ;;  %v13827_v35 = vld [vmem:[#allocation8_spill] sm:$0xff]  ;;  %v3224_v27 = vsel %vm13829_vm7, %v8173_v61, %v13563_v23  ;;  %vm13869_vm7 = vmmov %vm13831_vm0 }
 0x328   :  { %4101 = vmatpush1.bf16.msra.mxu0 %v3967_v3  ;;  %4130 = vmatpush1.bf16.msra.mxu1 %v3848_v63  ;;  %v11769_v62 = vpop.permute.xlu0 %3261  ;;  %v3172_v50 = vsel %vm3165_vm13, %v13826_v37, %v8168_v48  ;;  %v3790_v59 = vpack.c.bf16 %v13828_v18, %v13827_v35  ;;  %v13830_v63 = vunpack.i.l.bf16 %v13760_v46  ;;  %v3873_v13 = vpack.c.bf16 %v3275_v56, %v3224_v27 }
 0x329   :  { %4162 = vmatprep.subr.bf16.mxu0 %v3791_v0  ;;  %4131 = vmatprep.subr.bf16.mxu1 %v3861_v1  ;;  %v3860_v3 = vpack.c.bf16 %v3172_v50, %v3121_v39  ;;  %v11786_v0 = vpop.permute.xlu1 %3210  ;;  %v8278_v48 = vunpack.i.h.bf16 %v13810_v9  ;;  %v13832_v1 = vld [vmem:[#allocation54_spill] sm:$0xff]  ;;  %v13835_v46 = vunpack.i.l.bf16 %v13768_v43  ;;  %v13837_v56 = vunpack.i.h.bf16 %v11105_v12  ;;  %v13840_v43 = vld [vmem:[#allocation40_spill] sm:$0xff] }
 0x32a   :  { %v3223_v26 = vsel %vm13831_vm0, %v13830_v63, %v8173_v61  ;;  %v13833_v39 = vld [vmem:[#allocation50_spill] sm:$0xff]  ;;  %v13838_v18 = vunpack.i.l.bf16 %v11105_v12  ;;  %v13568_v63 = vunpack.i.l.bf16 %v11691_v32  ;;  %v8268_v12 = vunpack.i.h.bf16 %v13794_v16 }
 0x32b   :  { %4109 = vmatmul.mubr.bf16.vlgmr.msra.gmra.mrb[52].mxu0 %v11367_v58  ;;  %v13834_v37 = vpack.c.bf16 %v13832_v1, %v13833_v39  ;;  %v3274_v61 = vsel %vm13836_vm15, %v13835_v46, %v8178_v38  ;;  %v8468_v1 = vunpack.i.h.bf16 %v11711_v28  ;;  %v13839_v39 = vld [vmem:[#allocation15_spill] sm:$0xff]  ;;  %v13842_v46 = vpack.c.bf16 %v11188_v22, %v11324_v57 }
 0x32c   :  { %4163 = vmatpush1.bf16.msra.mxu0 %v3790_v59  ;;  %7265 = vmatprep.mubr.msk.bf16.mxu0 %vm3949_vm2, %v11639_v53  ;;  %v11794_v50 = vpop.permute.xlu0 %8470  ;;  %v2715_v59 = vsel %vm2706_vm8, %v13838_v18, %v13837_v56  ;;  %v3872_v27 = vpack.c.bf16 %v3274_v61, %v3223_v26  ;;  %v13843_v56 = vunpack.i.l.bf16 %v11560_v14  ;;  %v13845_v14 = vunpack.i.l.bf16 %v11568_v44 }
 0x32d   :  { %4132 = vmatpush1.bf16.msra.mxu1 %v3860_v3  ;;  %4164 = vmatprep.subr.bf16.mxu0 %v13834_v37  ;;  %v8473_v35 = vunpack.i.h.bf16 %v11794_v50  ;;  %v13564_v3 = vunpack.i.l.bf16 %v11794_v50  ;;  %v13841_v37 = vpack.c.bf16 %v13839_v39, %v13840_v43  ;;  %v11811_v38 = vpop.permute.xlu1 %8475  ;;  %v13844_v39 = vld [vmem:[#allocation49_spill] sm:$0xff]  ;;  %v2971_v23 = vsel %vm2961_vm9, %v8268_v12, %v13568_v63 }
 0x32e   :  { %4133 = vmatprep.subr.bf16.mxu1 %v3873_v13  ;;  %v11816_v13 = vsel %vm3063_vm10, %v8277_v51, %v8278_v48  ;;  %v13566_v26 = vunpack.i.l.bf16 %v11811_v38  ;;  %v8478_v9 = vunpack.i.h.bf16 %v11811_v38  ;;  %v3814_v43 = vpack.c.bf16 %v13844_v39, %v2715_v59 }
 0x32f   :  { %v3584_v18 = vsel %vm3565_vm14, %v13843_v56, %v8473_v35  ;;  %v3573_v22 = vsel %vm3565_vm14, %v8468_v1, %v13564_v3  ;;  %v8457_v56 = vunpack.i.l.bf16 %v11725_v40  ;;  %v13851_v3 = vunpack.i.l.bf16 %v11584_v31 }
 0x330   :  { %4165 = vmatpush1.bf16.msra.mxu0 %v13841_v37  ;;  %v11823_v61 = vpop.permute.xlu0 %8480  ;;  %v3585_v57 = vsel %vm3565_vm14, %v8473_v35, %v13566_v26  ;;  %v2970_v35 = vsel %vm2961_vm9, %v13846_v55, %v8268_v12  ;;  %v3073_v12 = vsel %vm3063_vm10, %v8278_v48, %v11742_v52  ;;  %v8283_v31 = vunpack.i.h.bf16 %v13812_v19 }
 0x331   :  { %4134 = vmatpush1.bf16.msra.mxu1 %v3872_v27  ;;  %4166 = vmatprep.subr.bf16.mxu0 %v13842_v46  ;;  %v8483_v51 = vunpack.i.h.bf16 %v11823_v61  ;;  %v8288_v27 = vunpack.i.h.bf16 %v13819_v8  ;;  %v13570_v37 = vunpack.i.l.bf16 %v11823_v61  ;;  %v3572_v46 = vsel %vm3565_vm14, %v13845_v14, %v8468_v1  ;;  %v11843_v59 = vpop.permute.xlu1 %8485  ;;  %v13847_v1 = vld [vmem:[#allocation60_spill] sm:$0xff]  ;;  %v13848_v14 = vld [vmem:[#allocation63_spill] sm:$0xff] }
 0x332   :  { %v3885_v39 = vpack.c.bf16 %v3585_v57, %v3573_v22  ;;  %v3884_v26 = vpack.c.bf16 %v3584_v18, %v3572_v46  ;;  %v13569_v44 = vunpack.i.l.bf16 %v11843_v59  ;;  %v13849_v15 = vpack.c.bf16 %v13847_v1, %v13848_v14  ;;  %v13854_v1 = vld [vmem:[#allocation43_spill] sm:$0xff]  ;;  %v13856_v14 = vld [vmem:[#allocation58_spill] sm:$0xff] }
 0x333   :  { %v8273_v22 = vunpack.i.h.bf16 %v13804_v24  ;;  %v13850_v57 = vunpack.i.l.bf16 %v11596_v7  ;;  %v3608_v16 = vsel %vm3565_vm14, %v13851_v3, %v8483_v51  ;;  %v8488_v55 = vunpack.i.h.bf16 %v11843_v59 }
 0x334   :  { %4167 = vmatpush1.bf16.msra.mxu0 %v3814_v43  ;;  %v11856_v43 = vpop.permute.xlu0 %8495  ;;  %4135 = vmatprep.subr.bf16.mxu1 %v3885_v39  ;;  %v3597_v46 = vsel %vm3565_vm14, %v8478_v9, %v13570_v37  ;;  %v3609_v7 = vsel %vm3565_vm14, %v8483_v51, %v13569_v44  ;;  %v13853_v39 = vld [vmem:[#allocation46_spill] sm:$0xff] }
 0x335   :  { %4168 = vmatprep.subr.bf16.mxu0 %v13849_v15  ;;  %v3596_v63 = vsel %vm3565_vm14, %v13850_v57, %v8478_v9  ;;  %4136 = vmatpush1.bf16.msra.mxu1 %v3884_v26  ;;  %v13852_v15 = vld [vmem:[#allocation67_spill] sm:$0xff]  ;;  %v3022_v3 = vsel %vm3012_vm11, %v8273_v22, %v8457_v56  ;;  %v13855_v48 = vpack.c.bf16 %v13853_v39, %v13854_v1  ;;  %v11882_v26 = vpop.permute.xlu1 %8490 }
 0x336   :  { %v3839_v18 = vpack.c.bf16 %v2971_v23, %v13852_v15  ;;  %v3897_v23 = vpack.c.bf16 %v3609_v7, %v3597_v46  ;;  %v3838_v57 = vpack.c.bf16 %v2970_v35, %v13856_v14  ;;  %v3896_v9 = vpack.c.bf16 %v3608_v16, %v3596_v63 }
 0x337   :  { %v8497_v15 = vunpack.i.l.bf16 %v11856_v43  ;;  %v8493_v51 = vunpack.i.h.bf16 %v11882_v26  ;;  %v8492_v44 = vunpack.i.l.bf16 %v11882_v26  ;;  %v3021_v39 = vsel %vm3012_vm11, %v8272_v29, %v8273_v22 }
 0x338   :  { %4169 = vmatpush1.bf16.msra.mxu0 %v13855_v48  ;;  %v11888_v37 = vpop.permute.xlu0 %8500  ;;  %v3851_v1 = vpack.c.bf16 %v3073_v12, %v3022_v3  ;;  %v13857_v48 = vunpack.i.l.bf16 %v11613_v49  ;;  %4137 = vmatprep.subr.bf16.mxu1 %v3897_v23  ;;  %v13858_v35 = vunpack.i.l.bf16 %v11626_v6  ;;  %v3175_v29 = vsel %vm3165_vm13, %v8288_v27, %v11767_v20 }
 0x339   :  { %4170 = vmatprep.subr.bf16.mxu0 %v3839_v18  ;;  %v8503_v63 = vunpack.i.h.bf16 %v11888_v37  ;;  %v8502_v18 = vunpack.i.l.bf16 %v11888_v37  ;;  %4138 = vmatpush1.bf16.msra.mxu1 %v3896_v9  ;;  %v3621_v24 = vsel %vm3565_vm14, %v8488_v55, %v8492_v44  ;;  %v3633_v49 = vsel %vm3565_vm14, %v8493_v51, %v8497_v15  ;;  %v11912_v12 = vpop.permute.xlu1 %8505 }
 0x33a   :  { %v3620_v46 = vsel %vm3565_vm14, %v13857_v48, %v8488_v55  ;;  %v3632_v16 = vsel %vm3565_vm14, %v13858_v35, %v8493_v51  ;;  %v8498_v6 = vunpack.i.h.bf16 %v11856_v43  ;;  %v3909_v7 = vpack.c.bf16 %v3633_v49, %v3621_v24 }
 0x33b   :  { %v3908_v22 = vpack.c.bf16 %v3632_v16, %v3620_v46  ;;  %v3123_v55 = vsel %vm3114_vm12, %v8282_v47, %v8283_v31  ;;  %v8508_v3 = vunpack.i.h.bf16 %v11912_v12  ;;  %v8507_v23 = vunpack.i.l.bf16 %v11912_v12 }
 0x33c   :  { %4171 = vmatpush1.bf16.msra.mxu0 %v3838_v57  ;;  %v11919_v14 = vpop.permute.xlu0 %8510  ;;  %v3850_v9 = vpack.c.bf16 %v11816_v13, %v3021_v39  ;;  %v8358_v51 = vunpack.i.h.bf16 %v11340_v5  ;;  %v3124_v57 = vsel %vm3114_vm12, %v8283_v31, %v11749_v4  ;;  %v13859_v48 = vunpack.i.l.bf16 %v11679_v54  ;;  %4139 = vmatprep.subr.bf16.mxu1 %v3909_v7 }
 0x33d   :  { %4172 = vmatprep.subr.bf16.mxu0 %v3851_v1  ;;  %v8512_v47 = vunpack.i.l.bf16 %v11919_v14  ;;  %v3863_v46 = vpack.c.bf16 %v3175_v29, %v3124_v57  ;;  %4140 = vmatpush1.bf16.msra.mxu1 %v3908_v22  ;;  %v3645_v1 = vsel %vm3565_vm14, %v8498_v6, %v8502_v18  ;;  %v3657_v13 = vsel %vm3565_vm14, %v8503_v63, %v8507_v23  ;;  %v2705_v29 = vpop.permute.xlu1 %2704 }
 0x33e   :  { %v3656_v19 = vsel %vm3565_vm14, %v13859_v48, %v8503_v63  ;;  %v13860_v39 = vunpack.i.l.bf16 %v11711_v28  ;;  %v13861_v54 = vunpack.i.h.bf16 %v13821_v60  ;;  %v13863_v16 = vunpack.i.l.bf16 %v11668_v2 }
 0x33f   :  { %v3669_v49 = vsel %vm3565_vm14, %v8508_v3, %v8512_v47  ;;  %v3921_v63 = vpack.c.bf16 %v3657_v13, %v3645_v1  ;;  %v13864_v28 = vunpack.i.l.bf16 %v13819_v8  ;;  %v3277_v2 = vsel %vm13780_vm5, %v8358_v51, %v11769_v62 }
 0x340   :  { %v3668_v31 = vsel %vm3565_vm14, %v13860_v39, %v8508_v3  ;;  %v3226_v35 = vsel %vm13862_vm3, %v13861_v54, %v11786_v0  ;;  %v3644_v24 = vsel %vm3565_vm14, %v13863_v16, %v8498_v6  ;;  %4173 = vmatpush1.bf16.msra.mxu0 %v3850_v9  ;;  %v11953_v57 = vpop.permute.xlu0 %8520  ;;  %v3933_v6 = vpack.c.bf16 %v3669_v49, %v3669_v49 }
 0x341   :  { %v3174_v22 = vsel %vm3165_vm13, %v13864_v28, %v8288_v27  ;;  %v3920_v7 = vpack.c.bf16 %v3656_v19, %v3644_v24  ;;  %4174 = vmatprep.subr.bf16.mxu0 %v3863_v46  ;;  %4141 = vmatprep.subr.bf16.mxu1 %v3921_v63  ;;  %v3932_v3 = vpack.c.bf16 %v3668_v31, %v3668_v31  ;;  %v13865_v9 = vunpack.i.l.bf16 %v11340_v5  ;;  %v11961_v27 = vpop.permute.xlu1 %8515  ;;  %v13870_v24 = vld [vmem:[#allocation11_spill] sm:$0xff] }
 0x342   :  { %v3862_v48 = vpack.c.bf16 %v3174_v22, %v3123_v55  ;;  %v3875_v13 = vpack.c.bf16 %v3277_v2, %v3226_v35  ;;  %v8513_v8 = vunpack.i.h.bf16 %v11919_v14  ;;  %v13867_v19 = vmov %v13861_v54  ;;  %v13886_v14 = vld [vmem:[#allocation62_spill] sm:$0xff] }
 0x343   :  { %v3276_v1 = vsel %vm13866_vm6, %v13865_v9, %v8358_v51  ;;  %4142 = vmatpush1.bf16.msra.mxu1 %v3920_v7  ;;  %v13868_v46 = vunpack.i.l.bf16 %v13821_v60  ;;  %v8522_v39 = vunpack.i.l.bf16 %v11953_v57  ;;  %v8518_v5 = vunpack.i.h.bf16 %v11961_v27 }
 0x344   :  { %4175 = vmatpush1.bf16.msra.mxu0 %v3862_v48  ;;  %7262 = vmatprep.subr.msk.bf16.mxu1 %vm3953_vm1, %v3933_v6  ;;  %v8517_v51 = vunpack.i.l.bf16 %v11961_v27  ;;  %v11972_v31 = vpop.permute.xlu0 %8530  ;;  %v8523_v35 = vunpack.i.h.bf16 %v11953_v57  ;;  %v3973_v16 = vsel %vm3953_vm1, %v3932_v3, 0  ;;  %v3793_v49 = vpack.c.bf16 %v11312_v41, %v13870_v24 }
 0x345   :  { %v3225_v55 = vsel %vm13869_vm7, %v13868_v46, %v13867_v19  ;;  %4176 = vmatprep.subr.bf16.mxu0 %v3875_v13  ;;  %v13871_v60 = vunpack.i.l.bf16 %v11794_v50  ;;  %v13872_v28 = vunpack.i.l.bf16 %v11811_v38  ;;  %v3587_v2 = vsel %vm3565_vm14, %v8518_v5, %v8522_v39  ;;  %v11990_v41 = vpop.permute.xlu1 %8525  ;;  %v13874_v13 = vld [vmem:[#allocation59_spill] sm:$0xff] }
 0x346   :  { %v3874_v54 = vpack.c.bf16 %v3276_v1, %v3225_v55  ;;  %v3575_v7 = vsel %vm3565_vm14, %v8513_v8, %v8517_v51  ;;  %v8532_v48 = vunpack.i.l.bf16 %v11972_v31  ;;  %v8528_v38 = vunpack.i.h.bf16 %v11990_v41  ;;  %v13873_v1 = vld [vmem:[#allocation10_spill] sm:$0xff] }
 0x347   :  { %v3574_v63 = vsel %vm3565_vm14, %v13871_v60, %v8513_v8  ;;  %v3586_v22 = vsel %vm3565_vm14, %v13872_v28, %v8518_v5  ;;  %4144 = vmatpush1.bf16.msra.mxu1 %v3973_v16  ;;  %v3887_v50 = vpack.c.bf16 %v3587_v2, %v3575_v7  ;;  %v8527_v3 = vunpack.i.l.bf16 %v11990_v41 }
 0x348   :  { %v3886_v6 = vpack.c.bf16 %v3586_v22, %v3574_v63  ;;  %4177 = vmatpush1.bf16.msra.mxu0 %v3874_v54  ;;  %4205 = vmatprep.subr.bf16.mxu1 %v3793_v49  ;;  %v11995_v9 = vpop.permute.xlu0 %8535  ;;  %v3792_v8 = vpack.c.bf16 %v13874_v13, %v13873_v1  ;;  %v13875_v19 = vunpack.i.h.bf16 %v11298_v45  ;;  %v13876_v55 = vunpack.i.l.bf16 %v11823_v61 }
 0x349   :  { %v8538_v54 = vunpack.i.h.bf16 %v11995_v9  ;;  %4178 = vmatprep.subr.bf16.mxu0 %v3887_v50  ;;  %v13877_v16 = vunpack.i.l.bf16 %v11843_v59  ;;  %v8537_v49 = vunpack.i.l.bf16 %v11995_v9  ;;  %v3599_v45 = vsel %vm3565_vm14, %v8523_v35, %v8527_v3  ;;  %v12019_v60 = vpop.permute.xlu1 %8540  ;;  %v13880_v50 = vld [vmem:[#allocation51_spill] sm:$0xff] }
 0x34a   :  { %v2718_v46 = vsel %vm2706_vm8, %v13875_v19, %v2705_v29  ;;  %v3598_v5 = vsel %vm3565_vm14, %v13876_v55, %v8523_v35  ;;  %4152 = vmatmul.mubr.bf16.vlgmr.msra.gmra.mrb[52].mxu1 %v11367_v58  ;;  %v3611_v61 = vsel %vm3565_vm14, %v8528_v38, %v8532_v48  ;;  %v13878_v59 = vpack.c.bf16 %v11357_v30, %v11337_v17  ;;  %v13879_v30 = vld [vmem:[#allocation53_spill] sm:$0xff]  ;;  %vm13890_vm8 = vmmov %vm13780_vm5 }
 0x34b   :  { %v3610_v24 = vsel %vm3565_vm14, %v13877_v16, %v8528_v38  ;;  %4206 = vmatpush1.bf16.msra.mxu1 %v3792_v8  ;;  %7267 = vmatprep.mubr.msk.bf16.mxu1 %vm3949_vm2, %v11639_v53  ;;  %v3899_v63 = vpack.c.bf16 %v3611_v61, %v3599_v45  ;;  %v8533_v28 = vunpack.i.h.bf16 %v11972_v31  ;;  %v8542_v35 = vunpack.i.l.bf16 %v12019_v60  ;;  %vm13889_vm2 = vmmov %vm13831_vm0 }
 0x34c   :  { %v3898_v29 = vpack.c.bf16 %v3610_v24, %v3598_v5  ;;  %4179 = vmatpush1.bf16.msra.mxu0 %v3886_v6  ;;  %4207 = vmatprep.subr.bf16.mxu1 %v13878_v59  ;;  %v12026_v22 = vpop.permute.xlu0 %8545  ;;  %v3817_v7 = vpack.c.bf16 %v11385_v25, %v2718_v46  ;;  %v3634_v53 = vsel %vm3565_vm14, %v8497_v15, %v8538_v54  ;;  %v8543_v2 = vunpack.i.h.bf16 %v12019_v60 }
 0x34d   :  { %4180 = vmatprep.subr.bf16.mxu0 %v3899_v63  ;;  %v8548_v6 = vunpack.i.h.bf16 %v12026_v22  ;;  %v8547_v17 = vunpack.i.l.bf16 %v12026_v22  ;;  %v13881_v38 = vpack.c.bf16 %v13879_v30, %v13880_v50  ;;  %v3623_v1 = vsel %vm3565_vm14, %v8533_v28, %v8537_v49  ;;  %v12044_v43 = vpop.permute.xlu1 %8550 }
 0x34e   :  { %v3635_v25 = vsel %vm3565_vm14, %v8538_v54, %v8542_v35  ;;  %v8453_v13 = vunpack.i.h.bf16 %v11691_v32  ;;  %v3622_v8 = vsel %vm3565_vm14, %v8492_v44, %v8533_v28  ;;  %v8553_v19 = vunpack.i.h.bf16 %v12044_v43 }
 0x34f   :  { %4208 = vmatpush1.bf16.msra.mxu1 %v13881_v38  ;;  %v3911_v15 = vpack.c.bf16 %v3635_v25, %v3623_v1  ;;  %v8552_v46 = vunpack.i.l.bf16 %v12044_v43  ;;  %v3910_v5 = vpack.c.bf16 %v3634_v53, %v3622_v8  ;;  %v3646_v54 = vsel %vm3565_vm14, %v8502_v18, %v8543_v2 }
 0x350   :  { %4181 = vmatpush1.bf16.msra.mxu0 %v3898_v29  ;;  %4209 = vmatprep.subr.bf16.mxu1 %v3817_v7  ;;  %v2960_v55 = vpop.permute.xlu0 %2959  ;;  %v3658_v16 = vsel %vm3565_vm14, %v8507_v23, %v8548_v6  ;;  %v13882_v44 = vpack.c.bf16 %v11204_v42, %v11318_v21  ;;  %v3647_v26 = vsel %vm3565_vm14, %v8543_v2, %v8547_v17  ;;  %v13884_v61 = vunpack.i.l.bf16 %v11691_v32  ;;  %v13888_v2 = vld [vmem:[#allocation68_spill] sm:$0xff] }
 0x351   :  { %4182 = vmatprep.subr.bf16.mxu0 %v3911_v15  ;;  %v2973_v24 = vsel %vm2961_vm9, %v8453_v13, %v2960_v55  ;;  %v3659_v37 = vsel %vm3565_vm14, %v8548_v6, %v8552_v46  ;;  %v12068_v18 = vpop.permute.xlu1 %8555  ;;  %v13883_v12 = vpack.c.bf16 %v11509_v11, %v11541_v10  ;;  %v3670_v42 = vsel %vm3565_vm14, %v8512_v47, %v8553_v19  ;;  %v13885_v10 = vld [vmem:[#allocation61_spill] sm:$0xff] }
 0x352   :  { %v3923_v23 = vpack.c.bf16 %v3659_v37, %v3647_v26  ;;  %v8557_v21 = vunpack.i.l.bf16 %v12068_v18  ;;  %v2972_v29 = vsel %vm2961_vm9, %v13884_v61, %v8453_v13  ;;  %v8458_v59 = vunpack.i.h.bf16 %v11725_v40  ;;  %vm13891_vm9 = vmmov %vm13831_vm0 }
 0x353   :  { %4210 = vmatpush1.bf16.msra.mxu1 %v13882_v44  ;;  %v3922_v63 = vpack.c.bf16 %v3658_v16, %v3646_v54  ;;  %v3841_v28 = vpack.c.bf16 %v2973_v24, %v11666_v34  ;;  %v13887_v47 = vpack.c.bf16 %v13885_v10, %v13886_v14  ;;  %v3934_v7 = vpack.c.bf16 %v3670_v42, %v3670_v42 }
 0x354   :  { %4183 = vmatpush1.bf16.msra.mxu0 %v3910_v5  ;;  %4211 = vmatprep.subr.bf16.mxu1 %v13883_v12  ;;  %v3011_v45 = vpop.permute.xlu0 %3010  ;;  %v3671_v11 = vsel %vm3565_vm14, %v8553_v19, %v8557_v21  ;;  %v3840_v6 = vpack.c.bf16 %v2972_v29, %v13888_v2  ;;  %v3023_v34 = vsel %vm3012_vm11, %v8457_v56, %v8458_v59 }
 0x355   :  { %4184 = vmatprep.subr.bf16.mxu0 %v3923_v23  ;;  %v3935_v53 = vpack.c.bf16 %v3671_v11, %v3671_v11  ;;  %v8561_v32 = vpop.permute.xlu1 %8560  ;;  %v3024_v1 = vsel %vm3012_vm11, %v8458_v59, %v3011_v45  ;;  %v3979_v8 = vsel %vm3953_vm1, %v3934_v7, 0 }
 0x356   :  { %v8563_v30 = vunpack.i.h.bf16 %v8561_v32  ;;  %v8562_v50 = vunpack.i.l.bf16 %v8561_v32 }
 0x357   :  { %4212 = vmatpush1.bf16.msra.mxu1 %v13887_v47 }
 0x358   :  { %4185 = vmatpush1.bf16.msra.mxu0 %v3922_v63  ;;  %4213 = vmatprep.subr.bf16.mxu1 %v3841_v28  ;;  %v8566_v38 = vpop.permute.xlu0 %8565  ;;  %v3074_v15 = vsel %vm3063_vm10, %v11742_v52, %v8562_v50  ;;  %v3075_v19 = vsel %vm3063_vm10, %v8562_v50, %v8563_v30  ;;  %vm13892_vm10 = vmmov %vm13780_vm5 }
 0x359   :  { %v8567_v25 = vunpack.i.l.bf16 %v8566_v38  ;;  %7264 = vmatprep.subr.msk.bf16.mxu0 %vm3953_vm1, %v3935_v53  ;;  %v8568_v13 = vunpack.i.h.bf16 %v8566_v38  ;;  %v3852_v55 = vpack.c.bf16 %v3074_v15, %v3023_v34  ;;  %v8571_v5 = vpop.permute.xlu1 %8570  ;;  %v3853_v40 = vpack.c.bf16 %v3075_v19, %v3024_v1 }
 0x35a   :  { %v8573_v54 = vunpack.i.h.bf16 %v8571_v5  ;;  %v8572_v56 = vunpack.i.l.bf16 %v8571_v5 }
 0x35b   :  { %4214 = vmatpush1.bf16.msra.mxu1 %v3840_v6  ;;  %v3125_v24 = vsel %vm3114_vm12, %v11749_v4, %v8567_v25  ;;  %v3126_v37 = vsel %vm3114_vm12, %v8567_v25, %v8568_v13  ;;  %v8558_v4 = vunpack.i.h.bf16 %v12068_v18 }
 0x35c   :  { %4187 = vmatpush1.bf16.msra.mxu0 %v3979_v8  ;;  %v8576_v16 = vpop.permute.xlu0 %8575  ;;  %4215 = vmatprep.subr.bf16.mxu1 %v3853_v40  ;;  %v3176_v52 = vsel %vm3165_vm13, %v11767_v20, %v8572_v56  ;;  %v3177_v12 = vsel %vm3165_vm13, %v8572_v56, %v8573_v54 }
 0x35d   :  { %v8577_v44 = vunpack.i.l.bf16 %v8576_v16  ;;  %v8578_v26 = vunpack.i.h.bf16 %v8576_v16  ;;  %v3864_v23 = vpack.c.bf16 %v3176_v52, %v3125_v24  ;;  %v8581_v42 = vpop.permute.xlu1 %8580  ;;  %v3865_v45 = vpack.c.bf16 %v3177_v12, %v3126_v37 }
 0x35e   :  { %v8583_v61 = vunpack.i.h.bf16 %v8581_v42  ;;  %v8582_v29 = vunpack.i.l.bf16 %v8581_v42 }
 0x35f   :  { %4195 = vmatmul.mubr.bf16.vlgmr.msra.gmra.mrb[56].mxu0 %v11367_v58  ;;  %4216 = vmatpush1.bf16.msra.mxu1 %v3852_v55  ;;  %v3227_v63 = vsel %vm13889_vm2, %v11786_v0, %v8577_v44  ;;  %v3228_v11 = vsel %vm13891_vm9, %v8577_v44, %v8578_v26  ;;  %v3576_v0 = vsel %vm3565_vm14, %v8517_v51, %v8558_v4 }
 0x360   :  { %v8586_v59 = vpop.permute.xlu0 %8585  ;;  %4217 = vmatprep.subr.bf16.mxu1 %v3865_v45  ;;  %v3278_v58 = vsel %vm13890_vm8, %v11769_v62, %v8582_v29  ;;  %v3279_v10 = vsel %vm13892_vm10, %v8582_v29, %v8583_v61 }
 0x361   :  { %v8588_v20 = vunpack.i.h.bf16 %v8586_v59  ;;  %v8587_v28 = vunpack.i.l.bf16 %v8586_v59  ;;  %v3876_v14 = vpack.c.bf16 %v3278_v58, %v3227_v63  ;;  %v8591_v47 = vpop.permute.xlu1 %8590  ;;  %v3877_v7 = vpack.c.bf16 %v3279_v10, %v3228_v11 }
 0x362   :  { %v8592_v53 = vunpack.i.l.bf16 %v8591_v47  ;;  %v8593_v30 = vunpack.i.h.bf16 %v8591_v47 }
 0x363   :  { %4218 = vmatpush1.bf16.msra.mxu1 %v3864_v23  ;;  %v3588_v32 = vsel %vm3565_vm14, %v8522_v39, %v8588_v20  ;;  %v3577_v2 = vsel %vm3565_vm14, %v8558_v4, %v8587_v28 }
 0x364   :  { %4219 = vmatprep.subr.bf16.mxu1 %v3877_v7  ;;  %v8596_v62 = vpop.permute.xlu0 %8595  ;;  %v3589_v6 = vsel %vm3565_vm14, %v8588_v20, %v8592_v53  ;;  %v3888_v25 = vpack.c.bf16 %v3588_v32, %v3576_v0  ;;  %v3600_v15 = vsel %vm3565_vm14, %v8527_v3, %v8593_v30 }
 0x365   :  { %v8598_v50 = vunpack.i.h.bf16 %v8596_v62  ;;  %v8597_v38 = vunpack.i.l.bf16 %v8596_v62  ;;  %v8601_v34 = vpop.permute.xlu1 %8600  ;;  %v3889_v1 = vpack.c.bf16 %v3589_v6, %v3577_v2 }
 0x366   :  { %v8602_v57 = vunpack.i.l.bf16 %v8601_v34  ;;  %v8603_v40 = vunpack.i.h.bf16 %v8601_v34 }
 0x367   :  { %4220 = vmatpush1.bf16.msra.mxu1 %v3876_v14  ;;  %v3612_v39 = vsel %vm3565_vm14, %v8532_v48, %v8598_v50  ;;  %v3601_v27 = vsel %vm3565_vm14, %v8593_v30, %v8597_v38 }
 0x368   :  { %4221 = vmatprep.subr.bf16.mxu1 %v3889_v1  ;;  %v3613_v51 = vsel %vm3565_vm14, %v8598_v50, %v8602_v57  ;;  %v3900_v8 = vpack.c.bf16 %v3612_v39, %v3600_v15  ;;  %v8606_v19 = vpop.permute.xlu0 %8605  ;;  %v3624_v52 = vsel %vm3565_vm14, %v8537_v49, %v8603_v40 }
 0x369   :  { %v3901_v13 = vpack.c.bf16 %v3613_v51, %v3601_v27  ;;  %v8608_v55 = vunpack.i.h.bf16 %v8606_v19  ;;  %v8607_v31 = vunpack.i.l.bf16 %v8606_v19  ;;  %v12214_v27 = vld [vmem:[%s13403_s3 + $0x40] sm:$0xff]  }
 0x36a   :  { %v12219_v51 = vld [vmem:[%s13403_s3] sm:$0xff]   ;;  %7467 = vmatprep.subr.bf16.mxu0 %v12214_v27 }
 0x36b   :  { %4222 = vmatpush1.bf16.msra.mxu1 %v3888_v25  ;;  %v3636_v24 = vsel %vm3565_vm14, %v8542_v35, %v8608_v55  ;;  %v3625_v3 = vsel %vm3565_vm14, %v8603_v40, %v8607_v31  ;;  %7468 = vmatpush3.bf16.msra.mxu0 %v12219_v51  ;;  %v12238_v31 = vld [vmem:[%s13403_s3 + $0x48] sm:$0xff]  }
 0x36c   :  { %4223 = vmatprep.subr.bf16.mxu1 %v3901_v13  ;;  %v3912_v12 = vpack.c.bf16 %v3636_v24, %v3624_v52  ;;  %v12243_v40 = vld [vmem:[%s13403_s3 + $0x8] sm:$0xff]   ;;  %7469 = vmatprep.subr.bf16.mxu0 %v12238_v31  ;;  %v12278_v52 = vld [vmem:[%s13403_s3 + $0x58] sm:$0xff]  }
 0x36f   :  { %4224 = vmatpush1.bf16.msra.mxu1 %v3900_v8  ;;  %7470 = vmatpush3.bf16.msra.mxu0 %v12243_v40 }
 0x37b   :  { %v8616_v5 = vpop.permute.xlu0 %8615 }
 0x37c   :  { %v8617_v54 = vunpack.i.l.bf16 %v8616_v5  ;;  %v8618_v41 = vunpack.i.h.bf16 %v8616_v5 }
 0x37e   :  { %v8611_v48 = vpop.permute.xlu1 %8610  ;;  %v3660_v60 = vsel %vm3565_vm14, %v8552_v46, %v8618_v41 }
 0x37f   :  { %v8613_v56 = vunpack.i.h.bf16 %v8611_v48  ;;  %v8612_v16 = vunpack.i.l.bf16 %v8611_v48  ;;  %v12248_v48 = vld [vmem:[%s13403_s3 + $0x50] sm:$0xff]  }
 0x380   :  { %7471 = vmatprep.subr.bf16.mxu0 %v12248_v48 }
 0x381   :  { %v3637_v44 = vsel %vm3565_vm14, %v8608_v55, %v8612_v16  ;;  %v3649_v23 = vsel %vm3565_vm14, %v8613_v56, %v8617_v54  ;;  %v3648_v35 = vsel %vm3565_vm14, %v8547_v17, %v8613_v56  ;;  %v8941_v17 = vld [vmem:[%s13402_s2] ss:$8 sps:$4 sm:$0xff]  }
 0x382   :  { %v3538_v26 = vpop.permute.xlu1 %3537  ;;  %v3913_v37 = vpack.c.bf16 %v3637_v44, %v3625_v3  ;;  %v3924_v9 = vpack.c.bf16 %v3660_v60, %v3648_v35  ;;  %v12253_v54 = vld [vmem:[%s13403_s3 + $0xc0] sm:$0xff]   ;;  %v12264_v16 = vld [vmem:[%s13403_s3 + $0xc8] sm:$0xff]   ;;  %v12294_v60 = vld [vmem:[%s13403_s3 + $0x18] sm:$0xff]  }
 0x383   :  { %v3661_v42 = vsel %vm3565_vm14, %v8618_v41, %v3538_v26  ;;  %v12258_v56 = vld [vmem:[%s13403_s3 + $0x80] sm:$0xff]   ;;  %v12271_v41 = vld [vmem:[%s13403_s3 + $0x10] sm:$0xff]  }
 0x384   :  { %v3925_v45 = vpack.c.bf16 %v3661_v42, %v3649_v23  ;;  %4225 = vmatprep.subr.bf16.mxu1 %v3913_v37  ;;  %7472 = vmatpush3.bf16.msra.mxu0 %v12271_v41 }
 0x385   :  { %4226 = vmatpush1.bf16.msra.mxu1 %v3912_v12  ;;  %v12286_v12 = vld [vmem:[%s13403_s3 + $0x88] sm:$0xff]   ;;  %7473 = vmatprep.subr.bf16.mxu0 %v12278_v52 }
 0x386   :  { %4227 = vmatprep.subr.bf16.mxu1 %v3925_v45 }
 0x388   :  { %7474 = vmatpush3.bf16.msra.mxu0 %v12294_v60 }
 0x389   :  { %4228 = vmatpush1.bf16.msra.mxu1 %v3924_v9 }
 0x38d   :  { %v8621_v49 = vpop.permute.xlu0 %8620 }
 0x38e   :  { %v8623_v61 = vunpack.i.h.bf16 %v8621_v49  ;;  %v8622_v29 = vunpack.i.l.bf16 %v8621_v49 }
 0x390   :  { %v3673_v59 = vsel %vm3565_vm14, %v8622_v29, %v8623_v61  ;;  %v3672_v43 = vsel %vm3565_vm14, %v8557_v21, %v8622_v29  ;;  %v12314_v29 = vld [vmem:[%s13403_s3 + $0x60] sm:$0xff]  }
 0x391   :  { %v3937_v46 = vpack.c.bf16 %v3673_v59, %v3673_v59  ;;  %v3936_v4 = vpack.c.bf16 %v3672_v43, %v3672_v43  ;;  %v12319_v59 = vld [vmem:[%s13403_s3 + $0xd0] sm:$0xff]   ;;  %v12324_v43 = vld [vmem:[%s13403_s3 + $0x20] sm:$0xff]   ;;  %7475 = vmatprep.subr.bf16.mxu0 %v12314_v29 }
 0x392   :  { %7476 = vmatpush3.bf16.msra.mxu0 %v12324_v43 }
 0x393   :  { %7266 = vmatprep.subr.msk.bf16.mxu1 %vm3953_vm1, %v3937_v46  ;;  %v3985_v22 = vsel %vm3953_vm1, %v3936_v4, 0  ;;  %vm13893_vm1 = vcmask 1039360  }
 0x394   :  { %4230 = vmatpush1.bf16.msra.mxu1 %v3985_v22  ;;  %vm13894_vm11 = vmmov %vm13893_vm1  ;;  %v12331_v22 = vld [vmem:[%s13403_s3 + $0x90] sm:$0xff]  }
 0x395   :  { %7489 = vmatprep.subr.bf16.mxu1 %v12253_v54  ;;  %vm13895_vm12 = vmmov %vm13893_vm1 }
 0x396   :  { %vm13896_vm13 = vmmov %vm13893_vm1 }
 0x397   :  { %4238 = vmatmul.mubr.bf16.vlgmr.msra.gmra.mrb[56].mxu1 %v8941_v17  ;;  %vm13897_vm14 = vmmov %vm13893_vm1 }
 0x398   :  { %7490 = vmatpush3.bf16.msra.mxu1 %v12258_v56  ;;  %vm13898_vm0 = vmmov %vm13893_vm1 }
 0x399   :  { %7491 = vmatprep.subr.bf16.mxu1 %v12264_v16  ;;  %vm13904_vm15 = vmmov %vm13898_vm0 }
 0x39a   :  { %vm13905_vm3 = vmmov %vm13898_vm0 }
 0x39b   :  { %vm13909_vm5 = vmmov %vm13898_vm0 }
 0x39c   :  { %7492 = vmatpush3.bf16.msra.mxu1 %v12286_v12  ;;  %vm13910_vm6 = vmmov %vm13898_vm0 }
 0x39d   :  { %7493 = vmatprep.subr.bf16.mxu1 %v12319_v59  ;;  %vm13912_vm7 = vmmov %vm13898_vm0 }
 0x39e   :  { %vm13913_vm2 = vmmov %vm13898_vm0 }
 0x39f   :  { %vm13914_vm8 = vmmov %vm13898_vm0 }
 0x3a0   :  { %7494 = vmatpush3.bf16.msra.mxu1 %v12331_v22  ;;  %vm13915_vm9 = vmmov %vm13898_vm0 }
 0x3a1   :  { %vm13917_vm10 = vmmov %vm13898_vm0 }
 0x3c5   :  { %v12153_v63 = vpop.f32.mrb[48].mxu0 }
 0x3c6   :  { %v12155_v20 = vpop.f32.mrb[49].mxu0 }
 0x3c7   :  { %v12157_v58 = vpop.f32.mrb[50].mxu0 }
 0x3c8   :  { %v8624_v18 = vpack.i.bf16 %v12157_v58, %v12153_v63  ;;  %v12161_v21 = vpop.f32.mrb[51].mxu0 }
 0x3ca   :  { %8625 = vrot.lane.b32.xlu0 %v8624_v18, %s8968_s0 }
 0x3e5   :  { %v12164_v28 = vpop.f32.mrb[48].mxu1 }
 0x3e6   :  { %v8629_v11 = vpack.i.bf16 %v12164_v28, %v12155_v20  ;;  %v12168_v10 = vpop.f32.mrb[49].mxu1 }
 0x3e7   :  { %v8634_v14 = vpack.i.bf16 %v12161_v21, %v12168_v10  ;;  %v12172_v47 = vpop.f32.mrb[50].mxu1 }
 0x3e8   :  { %8630 = vrot.lane.b32.xlu1 %v8629_v11, %s8968_s0  ;;  %v12175_v7 = vpop.f32.mrb[51].mxu1 }
 0x3e9   :  { %v8639_v53 = vpack.i.bf16 %v12175_v7, %v12172_v47  ;;  %8635 = vrot.lane.b32.xlu0 %v8634_v14, %s8968_s0  ;;  %v12347_v14 = vld [vmem:[%s13403_s3 + $0x68] sm:$0xff]  }
 0x3ea   :  { %7477 = vmatprep.subr.bf16.mxu0 %v12347_v14 }
 0x3ec   :  { %8640 = vrot.lane.b32.xlu1 %v8639_v53, %s8968_s0  ;;  %v12352_v53 = vld [vmem:[%s13403_s3 + $0xd8] sm:$0xff]  }
 0x3ed   :  { %7495 = vmatprep.subr.bf16.mxu1 %v12352_v53 }
 0x3fe   :  { %v12181_v32 = vpop.f32.mrb[52].mxu0 }
 0x3ff   :  { %v12183_v0 = vpop.f32.mrb[53].mxu0 }
 0x400   :  { %v8644_v62 = vpack.i.bf16 %v12183_v0, %v12181_v32  ;;  %v12187_v2 = vpop.f32.mrb[54].mxu0 }
 0x401   :  { %v12189_v6 = vpop.f32.mrb[55].mxu0 }
 0x402   :  { %v8649_v30 = vpack.i.bf16 %v12189_v6, %v12187_v2  ;;  %8645 = vrot.lane.b32.xlu1 %v8644_v62, %s8968_s0  ;;  %v12357_v62 = vld [vmem:[%s13403_s3 + $0x28] sm:$0xff]  }
 0x403   :  { %7478 = vmatpush3.bf16.msra.mxu0 %v12357_v62 }
 0x404   :  { %8650 = vrot.lane.b32.xlu0 %v8649_v30, %s8968_s0 }
 0x41d   :  { %v12195_v50 = vpop.f32.mrb[52].mxu1 }
 0x41e   :  { %v12197_v38 = vpop.f32.mrb[53].mxu1 }
 0x41f   :  { %v8654_v34 = vpack.i.bf16 %v12197_v38, %v12195_v50  ;;  %v12201_v1 = vpop.f32.mrb[54].mxu1 }
 0x420   :  { %v12203_v25 = vpop.f32.mrb[55].mxu1 }
 0x421   :  { %v8659_v57 = vpack.i.bf16 %v12203_v25, %v12201_v1  ;;  %8655 = vrot.lane.b32.xlu1 %v8654_v34, %s8968_s0 }
 0x423   :  { %8660 = vrot.lane.b32.xlu0 %v8659_v57, %s8968_s0 }
 0x432   :  { %v12209_v39 = vpop.f32.mrb[56].mxu0 }
 0x433   :  { %v12221_v15 = vpop.f32.mrb[57].mxu0 }
 0x434   :  { %v8664_v13 = vpack.i.bf16 %v12221_v15, %v12209_v39  ;;  %v12225_v8 = vpop.f32.mrb[58].mxu0 }
 0x435   :  { %v12228_v19 = vpop.f32.mrb[59].mxu0 }
 0x436   :  { %v8669_v55 = vpack.i.bf16 %v12228_v19, %v12225_v8  ;;  %8665 = vrot.lane.b32.xlu1 %v8664_v13, %s8968_s0  ;;  %v12366_v13 = vld [vmem:[%s13403_s3 + $0x98] sm:$0xff]  }
 0x437   :  { %7496 = vmatpush3.bf16.msra.mxu1 %v12366_v13 }
 0x438   :  { %8670 = vrot.lane.b32.xlu0 %v8669_v55, %s8968_s0 }
 0x43c   :  { %v8626_v5 = vpop.permute.xlu0 %8625 }
 0x43d   :  { %v8627_v24 = vunpack.i.l.bf16 %v8626_v5  ;;  %v8628_v3 = vunpack.i.h.bf16 %v8626_v5 }
 0x45a   :  { %v8631_v44 = vpop.permute.xlu1 %8630 }
 0x45b   :  { %v8632_v26 = vunpack.i.l.bf16 %v8631_v44  ;;  %v12280_v37 = vpop.permute.xlu0 %8635  ;;  %v8633_v17 = vunpack.i.h.bf16 %v8631_v44 }
 0x45c   :  { %v8638_v23 = vunpack.i.h.bf16 %v12280_v37 }
 0x45d   :  { %v4320_v42 = vsel %vm13893_vm1, %v8627_v24, %v8632_v26  ;;  %v4321_v30 = vsel %vm13897_vm14, %v8632_v26, %v8633_v17  ;;  %v12397_v26 = vld [vmem:[%s13403_s3 + $0x30] sm:$0xff]   ;;  %vm13918_vm1 = vmmov %vm13898_vm0 }
 0x45e   :  { %v12297_v35 = vmax.f32 %v12153_v63, %v4320_v42  ;;  %v4332_v45 = vsel %vm13894_vm11, %v8628_v3, %v8638_v23  ;;  %v12305_v49 = vpop.permute.xlu1 %8640  ;;  %v8637_v63 = vunpack.i.l.bf16 %v12280_v37  ;;  %v12400_v37 = vmax.f32 %v12155_v20, %v4321_v30  ;;  %vm13920_vm11 = vmmov %vm13898_vm0 }
 0x45f   :  { %v12302_v9 = vmax.f32 %v12157_v58, %v4332_v45  ;;  %v13571_v46 = vunpack.i.h.bf16 %v12305_v49  ;;  %v8642_v4 = vunpack.i.l.bf16 %v12305_v49  ;;  %v12411_v45 = vld [vmem:[%s13403_s3 + $0xa0] sm:$0xff]   ;;  %vm13925_vm14 = vmmov %vm13898_vm0 }
 0x460   :  { %v4322_v34 = vsel %vm13898_vm0, %v8633_v17, %v8637_v63  ;;  %13900 = vst [vmem:[#allocation19_spill] sm:$0xff] %v12411_v45  ;;  %v12431_v17 = vld [vmem:[%s13403_s3 + $0xe8] sm:$0xff]  }
 0x461   :  { %v8674_v61 = vpack.i.bf16 %v12302_v9, %v12297_v35  ;;  %v4333_v58 = vsel %vm13895_vm12, %v8638_v23, %v8642_v4  ;;  %v4334_v18 = vsel %vm13896_vm13, %v8642_v4, %v13571_v46  ;;  %v12403_v23 = vmax.f32 %v12164_v28, %v4322_v34  ;;  %v12426_v4 = vld [vmem:[%s13403_s3 + $0x78] sm:$0xff]   ;;  %13901 = vst [vmem:[#allocation20_spill] sm:$0xff] %v12431_v17  ;;  %v12442_v34 = vld [vmem:[%s13403_s3 + $0xa8] sm:$0xff]   ;;  %vm13921_vm12 = vmmov %vm13898_vm0 }
 0x462   :  { %v12369_v55 = vmax.f32 %v12161_v21, %v4333_v58  ;;  %v12372_v5 = vmax.f32 %v12172_v47, %v4334_v18  ;;  %v12387_v21 = vld [vmem:[%s13403_s3 + $0x70] sm:$0xff]   ;;  %v12392_v47 = vld [vmem:[%s13403_s3 + $0xe0] sm:$0xff]   ;;  %v12436_v58 = vld [vmem:[%s13403_s3 + $0x38] sm:$0xff]   ;;  %13902 = vst [vmem:[#allocation32_spill] sm:$0xff] %v12442_v34 }
 0x463   :  { %8675 = vrot.lane.b32.xlu1 %v8674_v61, %s8971_s30  ;;  %13899 = vst [vmem:[#allocation7_spill] sm:$0xff] %v12392_v47  ;;  %7479 = vmatprep.subr.bf16.mxu0 %v12387_v21  ;;  %v8689_v28 = vpack.i.bf16 %v12403_v23, %v12400_v37  ;;  %vm13924_vm13 = vmmov %vm13898_vm0 }
 0x464   :  { %7497 = vmatprep.subr.bf16.mxu1 %v12392_v47  ;;  %v8694_v20 = vpack.i.bf16 %v12372_v5, %v12369_v55  ;;  %7480 = vmatpush3.bf16.msra.mxu0 %v12397_v26 }
 0x465   :  { %7498 = vmatpush3.bf16.msra.mxu1 %v12411_v45  ;;  %7481 = vmatprep.subr.bf16.mxu0 %v12426_v4 }
 0x466   :  { %7499 = vmatprep.subr.bf16.mxu1 %v12431_v17 }
 0x468   :  { %7482 = vmatpush3.bf16.msra.mxu0 %v12436_v58 }
 0x469   :  { %7500 = vmatpush3.bf16.msra.mxu1 %v12442_v34 }
 0x46a   :  { %v12342_v11 = vpop.f32.mrb[56].mxu1 }
 0x46b   :  { %v12361_v57 = vpop.f32.mrb[57].mxu1 }
 0x46c   :  { %v8679_v24 = vpack.i.bf16 %v12361_v57, %v12342_v11  ;;  %v12376_v3 = vpop.f32.mrb[58].mxu1 }
 0x46d   :  { %v12380_v44 = vpop.f32.mrb[59].mxu1 }
 0x46e   :  { %v8684_v42 = vpack.i.bf16 %v12380_v44, %v12376_v3  ;;  %8680 = vrot.lane.b32.xlu0 %v8679_v24, %s8968_s0 }
 0x470   :  { %8685 = vrot.lane.b32.xlu1 %v8684_v42, %s8968_s0  ;;  %v12449_v42 = vld [vmem:[%s13403_s3 + $0xf0] sm:$0xff]  }
 0x471   :  { %13903 = vst [vmem:[#allocation38_spill] sm:$0xff] %v12449_v42  ;;  %7501 = vmatprep.subr.bf16.mxu1 %v12449_v42 }
 0x472   :  { %8695 = vrot.lane.b32.xlu0 %v8694_v20, %s8971_s30  ;;  %7502 = vmatpush3.bf16.msra.mxu1 %v12458_v33 }
 0x474   :  { %v8646_v61 = vpop.permute.xlu1 %8645  ;;  %8690 = vrot.lane.b32.xlu1 %v8689_v28, %s8971_s30 }
 0x475   :  { %v8648_v18 = vunpack.i.h.bf16 %v8646_v61  ;;  %v8647_v30 = vunpack.i.l.bf16 %v8646_v61 }
 0x476   :  { %v8651_v24 = vpop.permute.xlu0 %8650 }
 0x477   :  { %v4323_v20 = vsel %vm13904_vm15, %v8637_v63, %v8647_v30  ;;  %v4324_v61 = vsel %vm13905_vm3, %v8647_v30, %v8648_v18  ;;  %v8653_v28 = vunpack.i.h.bf16 %v8651_v24  ;;  %v8652_v46 = vunpack.i.l.bf16 %v8651_v24  ;;  %v12470_v63 = vld [vmem:[%s13403_s3 + $0xf8] sm:$0xff]   ;;  %vm13926_vm15 = vmmov %vm13898_vm0 }
 0x478   :  { %v12461_v17 = vmax.f32 %v12168_v10, %v4323_v20  ;;  %v12464_v45 = vmax.f32 %v12181_v32, %v4324_v61  ;;  %13907 = vst [vmem:[#allocation25_spill] sm:$0xff] %v12470_v63  ;;  %v13908_v30 = vunpack.i.h.bf16 %v12305_v49  ;;  %v12488_v20 = vld [vmem:[%s13403_s3 + $0xb8] sm:$0xff]   ;;  %v12493_v49 = vld [vmem:[%s13403_s3 + $0x140] sm:$0xff]   ;;  %7503 = vmatprep.subr.bf16.mxu1 %v12470_v63  ;;  %vm13927_vm3 = vmmov %vm13898_vm0 }
 0x479   :  { %v4336_v34 = vsel %vm13910_vm6, %v8652_v46, %v8653_v28  ;;  %13911 = vst [vmem:[#allocation29_spill] sm:$0xff] %v12488_v20  ;;  %7511 = vmatprep.subr.bf16.mxu0 %v12493_v49  ;;  %7504 = vmatpush3.bf16.msra.mxu1 %v12488_v20  ;;  %vm5380_vm6 = vsmask.f32 256 }
 0x47a   :  { %v4335_v24 = vsel %vm13909_vm5, %v13908_v30, %v8652_v46  ;;  %v12480_v10 = vmax.f32 %v12187_v2, %v4336_v34  ;;  %v8699_v32 = vpack.i.bf16 %v12464_v45, %v12461_v17  ;;  %7533 = vmatprep.subr.bf16.mxu1 %v12214_v27  ;;  %vm13928_vm5 = vmmov %vm13898_vm0 }
 0x47b   :  { %v12477_v47 = vmax.f32 %v12175_v7, %v4335_v24 }
 0x47c   :  { %8700 = vrot.lane.b32.xlu0 %v8699_v32, %s8971_s30 }
 0x47d   :  { %v8704_v7 = vpack.i.bf16 %v12480_v10, %v12477_v47 }
 0x47f   :  { %8705 = vrot.lane.b32.xlu1 %v8704_v7, %s8971_s30 }
 0x493   :  { %v8656_v2 = vpop.permute.xlu1 %8655 }
 0x494   :  { %v8658_v46 = vunpack.i.h.bf16 %v8656_v2  ;;  %v8657_v34 = vunpack.i.l.bf16 %v8656_v2 }
 0x495   :  { %v8661_v61 = vpop.permute.xlu0 %8660 }
 0x496   :  { %v4325_v30 = vsel %vm13912_vm7, %v8648_v18, %v8657_v34  ;;  %v4326_v24 = vsel %vm13913_vm2, %v8657_v34, %v8658_v46  ;;  %v8663_v32 = vunpack.i.h.bf16 %v8661_v61  ;;  %v8662_v33 = vunpack.i.l.bf16 %v8661_v61 }
 0x497   :  { %v12506_v63 = vmax.f32 %v12183_v0, %v4325_v30  ;;  %v12509_v42 = vmax.f32 %v12195_v50, %v4326_v24  ;;  %vm8985_vm2 = vmmov 0  }
 0x498   :  { %v4337_v7 = vsel %vm13914_vm8, %v8653_v28, %v8662_v33  ;;  %v4338_v27 = vsel %vm13915_vm9, %v8662_v33, %v8663_v32 }
 0x499   :  { %v12514_v20 = vmax.f32 %v12189_v6, %v4337_v7  ;;  %v12517_v2 = vmax.f32 %v12201_v1, %v4338_v27  ;;  %v8709_v18 = vpack.i.bf16 %v12509_v42, %v12506_v63 }
 0x49b   :  { %13916 = vst [vmem:[#allocation37_spill] sm:$0xff] %v12517_v2  ;;  %8710 = vrot.lane.b32.xlu0 %v8709_v18, %s8971_s30  ;;  %v8714_v0 = vpack.i.bf16 %v12517_v2, %v12514_v20 }
 0x49d   :  { %8715 = vrot.lane.b32.xlu1 %v8714_v0, %s8971_s30 }
 0x4a8   :  { %v8666_v50 = vpop.permute.xlu1 %8665 }
 0x4a9   :  { %v8668_v28 = vunpack.i.h.bf16 %v8666_v50  ;;  %v8667_v34 = vunpack.i.l.bf16 %v8666_v50 }
 0x4aa   :  { %v8671_v33 = vpop.permute.xlu0 %8670 }
 0x4ab   :  { %v4327_v6 = vsel %vm13917_vm10, %v8658_v46, %v8667_v34  ;;  %v4328_v61 = vsel %vm13918_vm1, %v8667_v34, %v8668_v28  ;;  %v8673_v1 = vunpack.i.h.bf16 %v8671_v33  ;;  %v8672_v30 = vunpack.i.l.bf16 %v8671_v33 }
 0x4ac   :  { %v12528_v24 = vmax.f32 %v12197_v38, %v4327_v6  ;;  %v12531_v7 = vmax.f32 %v12209_v39, %v4328_v61 }
 0x4ad   :  { %v4339_v27 = vsel %vm13920_vm11, %v8663_v32, %v8672_v30  ;;  %v4340_v18 = vsel %vm13921_vm12, %v8672_v30, %v8673_v1 }
 0x4ae   :  { %13919 = vst [vmem:[#allocation23_spill] sm:$0xff] %v12531_v7  ;;  %v12536_v0 = vmax.f32 %v12203_v25, %v4339_v27  ;;  %v12539_v50 = vmax.f32 %v12225_v8, %v4340_v18  ;;  %v8719_v46 = vpack.i.bf16 %v12531_v7, %v12528_v24 }
 0x4b0   :  { %13922 = vst [vmem:[#allocation27_spill] sm:$0xff] %v12536_v0  ;;  %13923 = vst [vmem:[#allocation28_spill] sm:$0xff] %v12539_v50  ;;  %8720 = vrot.lane.b32.xlu0 %v8719_v46, %s8971_s30  ;;  %v8724_v38 = vpack.i.bf16 %v12539_v50, %v12536_v0 }
 0x4b2   :  { %8725 = vrot.lane.b32.xlu1 %v8724_v38, %s8971_s30 }
 0x4d5   :  { %v8676_v39 = vpop.permute.xlu1 %8675 }
 0x4d6   :  { %v8678_v50 = vunpack.i.h.bf16 %v8676_v39 }
 0x4e0   :  { %v8681_v32 = vpop.permute.xlu0 %8680 }
 0x4e1   :  { %v8683_v34 = vunpack.i.h.bf16 %v8681_v32  ;;  %v8682_v33 = vunpack.i.l.bf16 %v8681_v32 }
 0x4e2   :  { %v8686_v6 = vpop.permute.xlu1 %8685 }
 0x4e3   :  { %v4331_v25 = vsel %vm13924_vm13, %v8683_v34, %v13735_v36  ;;  %v4329_v8 = vsel %vm13925_vm14, %v8668_v28, %v8682_v33  ;;  %v4330_v61 = vsel %vm13898_vm0, %v8682_v33, %v8683_v34  ;;  %v8688_v30 = vunpack.i.h.bf16 %v8686_v6 }
 0x4e4   :  { %v12552_v27 = vmax.f32 %v12221_v15, %v4329_v8  ;;  %v12555_v18 = vmax.f32 %v12342_v11, %v4330_v61  ;;  %v8687_v46 = vunpack.i.l.bf16 %v8686_v6  ;;  %v8696_v38 = vpop.permute.xlu0 %8695  ;;  %v12558_v0 = vmax.f32 %v12361_v57, %v4331_v25 }
 0x4e5   :  { %v8698_v7 = vunpack.i.h.bf16 %v8696_v38  ;;  %v8697_v32 = vunpack.i.l.bf16 %v8696_v38  ;;  %v8677_v57 = vunpack.i.l.bf16 %v8676_v39 }
 0x4e6   :  { %v4341_v2 = vsel %vm13926_vm15, %v8673_v1, %v8687_v46  ;;  %v4342_v28 = vsel %vm13927_vm3, %v8687_v46, %v8688_v30  ;;  %v8691_v34 = vpop.permute.xlu1 %8690  ;;  %v8729_v15 = vpack.i.bf16 %v12555_v18, %v12552_v27  ;;  %v4393_v1 = vmax.f32 %v13735_v36, 0.0 }
 0x4e7   :  { %v12565_v33 = vmax.f32 %v12228_v19, %v4341_v2  ;;  %v12568_v11 = vmax.f32 %v12376_v3, %v4342_v28  ;;  %v4481_v6 = vsel %vm2757_vm4, %v8678_v50, %v8697_v32  ;;  %v4482_v8 = vsel %vm2757_vm4, %v8697_v32, %v8698_v7 }
 0x4e8   :  { %v8693_v25 = vunpack.i.h.bf16 %v8691_v34  ;;  %v8692_v61 = vunpack.i.l.bf16 %v8691_v34  ;;  %8730 = vrot.lane.b32.xlu0 %v8729_v15, %s8971_s30  ;;  %v4343_v46 = vsel %vm13928_vm5, %v8688_v30, %v13735_v36  ;;  %v4529_v19 = vmax.f32 %v12302_v9, %v4481_v6 }
 0x4e9   :  { %v8734_v3 = vpack.i.bf16 %v12568_v11, %v12565_v33  ;;  %v4530_v2 = vmax.f32 %v12369_v55, %v4482_v8  ;;  %v8739_v38 = vpack.i.bf16 %v4393_v1, %v12558_v0  ;;  %v12587_v36 = vmax.f32 %v12380_v44, %v4343_v46 }
 0x4ea   :  { %v4469_v50 = vsel %vm2757_vm4, %v8677_v57, %v8692_v61  ;;  %v4470_v39 = vsel %vm2757_vm4, %v8692_v61, %v8693_v25  ;;  %v4553_v9 = vmax.f32 %v4529_v19, 0.0  ;;  %v12601_v57 = vld [vmem:[%s13403_s3 + $0x100] sm:$0xff]  }
 0x4eb   :  { %v4517_v32 = vmax.f32 %v12297_v35, %v4469_v50  ;;  %8735 = vrot.lane.b32.xlu1 %v8734_v3, %s8971_s30  ;;  %v4518_v28 = vmax.f32 %v12400_v37, %v4470_v39  ;;  %v4554_v15 = vmax.f32 %v4530_v2, 0.0  ;;  %v12612_v3 = vld [vmem:[%s13403_s3 + $0x148] sm:$0xff]  }
 0x4ec   :  { %8740 = vrot.lane.b32.xlu0 %v8739_v38, %s8971_s30 }
 0x4ed   :  { %v4541_v30 = vmax.f32 %v4517_v32, 0.0  ;;  %v4542_v34 = vmax.f32 %v4518_v28, 0.0 }
 0x4ee   :  { %v12590_v55 = vpop.permute.xlu0 %8700 }
 0x4ef   :  { %v8703_v6 = vunpack.i.h.bf16 %v12590_v55  ;;  %v8702_v8 = vunpack.i.l.bf16 %v12590_v55  ;;  %4467 = vrot.lane.b32.xlu1 %v12587_v36, %s8971_s30  ;;  %v4566_v37 = vpack.c.bf16 %v4554_v15, %v4542_v34  ;;  %v4565_v44 = vpack.c.bf16 %v4553_v9, %v4541_v30  ;;  %v12638_v34 = vld [vmem:[%s13403_s3 + $0x110] sm:$0xff]   ;;  %v12644_v15 = vld [vmem:[%s13403_s3 + $0x158] sm:$0xff]  }
 0x4f1   :  { %v12594_v35 = vpop.permute.xlu1 %8705  ;;  %v4471_v61 = vsel %vm2757_vm4, %v8693_v25, %v8702_v8  ;;  %v4472_v1 = vsel %vm2757_vm4, %v8702_v8, %v8703_v6  ;;  %4993 = vmatprep.mubr.bf16.mxu0 %v4566_v37  ;;  %v12650_v8 = vld [vmem:[%s13403_s3 + $0x118] sm:$0xff]   ;;  %v12657_v37 = vld [vmem:[%s13403_s3 + $0x160] sm:$0xff]  }
 0x4f2   :  { %v8708_v46 = vunpack.i.h.bf16 %v12594_v35  ;;  %v8707_v19 = vunpack.i.l.bf16 %v12594_v35  ;;  %v4519_v2 = vmax.f32 %v12403_v23, %v4471_v61  ;;  %v4520_v50 = vmax.f32 %v12461_v17, %v4472_v1  ;;  %4994 = vmatmul.mubr.bf16.vlgmr.msra.gmra.mrb[60].mxu0 %v4565_v44  ;;  %v12626_v23 = vld [vmem:[%s13403_s3 + $0x108] sm:$0xff]   ;;  %v12632_v17 = vld [vmem:[%s13403_s3 + $0x150] sm:$0xff]   ;;  %v12664_v44 = vld [vmem:[%s13403_s3 + $0x120] sm:$0xff]  }
 0x4f3   :  { %7512 = vmatpush3.bf16.msra.mxu0 %v12601_v57 }
 0x4f4   :  { %v4483_v25 = vsel %vm2757_vm4, %v8698_v7, %v8707_v19  ;;  %v4484_v39 = vsel %vm2757_vm4, %v8707_v19, %v8708_v46  ;;  %7513 = vmatprep.subr.bf16.mxu0 %v12612_v3  ;;  %v4543_v7 = vmax.f32 %v4519_v2, 0.0  ;;  %v4544_v9 = vmax.f32 %v4520_v50, 0.0 }
 0x4f5   :  { %v4531_v38 = vmax.f32 %v12372_v5, %v4483_v25  ;;  %v4532_v32 = vmax.f32 %v12477_v47, %v4484_v39 }
 0x4f7   :  { %v4555_v28 = vmax.f32 %v4531_v38, 0.0  ;;  %v4556_v5 = vmax.f32 %v4532_v32, 0.0  ;;  %7514 = vmatpush3.bf16.msra.mxu0 %v12626_v23 }
 0x4f8   :  { %7515 = vmatprep.subr.bf16.mxu0 %v12632_v17 }
 0x4f9   :  { %v4568_v30 = vpack.c.bf16 %v4556_v5, %v4544_v9  ;;  %v4567_v47 = vpack.c.bf16 %v4555_v28, %v4543_v7  ;;  %v13930_v28 = vld [vmem:[#allocation27_spill] sm:$0xff] }
 0x4fa   :  { %v13931_v9 = vld [vmem:[#allocation7_spill] sm:$0xff] }
 0x4fb   :  { %5034 = vmatprep.mubr.bf16.mxu1 %v4568_v30  ;;  %7516 = vmatpush3.bf16.msra.mxu0 %v12638_v34 }
 0x4fc   :  { %5035 = vmatmul.mubr.bf16.vlgmr.msra.gmra.mrb[60].mxu1 %v4567_v47  ;;  %7517 = vmatprep.subr.bf16.mxu0 %v12644_v15 }
 0x4fd   :  { %7534 = vmatpush3.bf16.msra.mxu1 %v12219_v51  ;;  %v12671_v51 = vld [vmem:[%s13403_s3 + $0x168] sm:$0xff]  }
 0x4fe   :  { %7535 = vmatprep.subr.bf16.mxu1 %v12238_v31  ;;  %v12678_v31 = vld [vmem:[%s13403_s3 + $0x128] sm:$0xff]  }
 0x4ff   :  { %7518 = vmatpush3.bf16.msra.mxu0 %v12650_v8 }
 0x500   :  { %7519 = vmatprep.subr.bf16.mxu0 %v12657_v37 }
 0x501   :  { %7536 = vmatpush3.bf16.msra.mxu1 %v12243_v40  ;;  %v12685_v40 = vld [vmem:[%s13403_s3 + $0x170] sm:$0xff]  }
 0x502   :  { %7537 = vmatprep.subr.bf16.mxu1 %v12248_v48  ;;  %v12692_v48 = vld [vmem:[%s13403_s3 + $0x130] sm:$0xff]  }
 0x503   :  { %7520 = vmatpush3.bf16.msra.mxu0 %v12664_v44 }
 0x504   :  { %7521 = vmatprep.subr.bf16.mxu0 %v12671_v51 }
 0x505   :  { %7538 = vmatpush3.bf16.msra.mxu1 %v12271_v41  ;;  %v12699_v41 = vld [vmem:[%s13403_s3 + $0x178] sm:$0xff]  }
 0x506   :  { %7539 = vmatprep.subr.bf16.mxu1 %v12278_v52  ;;  %v12706_v52 = vld [vmem:[%s13403_s3 + $0x138] sm:$0xff]  }
 0x507   :  { %7522 = vmatpush3.bf16.msra.mxu0 %v12678_v31 }
 0x508   :  { %7523 = vmatprep.subr.bf16.mxu0 %v12685_v40 }
 0x509   :  { %7540 = vmatpush3.bf16.msra.mxu1 %v12294_v60 }
 0x50a   :  { %7541 = vmatprep.subr.bf16.mxu1 %v12314_v29 }
 0x50b   :  { %7524 = vmatpush3.bf16.msra.mxu0 %v12692_v48 }
 0x50c   :  { %7525 = vmatprep.subr.bf16.mxu0 %v12699_v41 }
 0x50d   :  { %7542 = vmatpush3.bf16.msra.mxu1 %v12324_v43  ;;  %v8711_v61 = vpop.permute.xlu0 %8710 }
 0x50e   :  { %7543 = vmatprep.subr.bf16.mxu1 %v12347_v14  ;;  %v8713_v60 = vunpack.i.h.bf16 %v8711_v61  ;;  %v8712_v1 = vunpack.i.l.bf16 %v8711_v61 }
 0x50f   :  { %v8716_v19 = vpop.permute.xlu1 %8715  ;;  %7526 = vmatpush3.bf16.msra.mxu0 %v12706_v52 }
 0x510   :  { %v4473_v29 = vsel %vm2757_vm4, %v8703_v6, %v8712_v1  ;;  %v4474_v2 = vsel %vm2757_vm4, %v8712_v1, %v8713_v60  ;;  %v8718_v50 = vunpack.i.h.bf16 %v8716_v19  ;;  %v8717_v25 = vunpack.i.l.bf16 %v8716_v19  ;;  %7555 = vmatprep.subr.bf16.mxu0 %v12253_v54  ;;  %v13933_v1 = vld [vmem:[#allocation20_spill] sm:$0xff] }
 0x511   :  { %7544 = vmatpush3.bf16.msra.mxu1 %v12357_v62  ;;  %v4521_v43 = vmax.f32 %v12464_v45, %v4473_v29  ;;  %v4522_v39 = vmax.f32 %v12506_v63, %v4474_v2  ;;  %v13934_v19 = vld [vmem:[#allocation32_spill] sm:$0xff]  ;;  %v13936_v29 = vld [vmem:[#allocation26_spill] sm:$0xff]  ;;  %v13937_v2 = vld [vmem:[#allocation25_spill] sm:$0xff] }
 0x512   :  { %7545 = vmatprep.subr.bf16.mxu1 %v12387_v21  ;;  %v4485_v14 = vsel %vm2757_vm4, %v8708_v46, %v8717_v25  ;;  %v4486_v55 = vsel %vm2757_vm4, %v8717_v25, %v8718_v50 }
 0x513   :  { %v4533_v6 = vmax.f32 %v12480_v10, %v4485_v14  ;;  %v4534_v38 = vmax.f32 %v12514_v20, %v4486_v55  ;;  %v4545_v62 = vmax.f32 %v4521_v43, 0.0  ;;  %v4546_v32 = vmax.f32 %v4522_v39, 0.0  ;;  %v13940_v14 = vld [vmem:[#allocation28_spill] sm:$0xff] }
 0x515   :  { %7546 = vmatpush3.bf16.msra.mxu1 %v12397_v26  ;;  %v4557_v45 = vmax.f32 %v4533_v6, 0.0  ;;  %v4558_v63 = vmax.f32 %v4534_v38, 0.0 }
 0x516   :  { %7547 = vmatprep.subr.bf16.mxu1 %v12426_v4 }
 0x517   :  { %v4570_v21 = vpack.c.bf16 %v4558_v63, %v4546_v32  ;;  %v4569_v54 = vpack.c.bf16 %v4557_v45, %v4545_v62 }
 0x519   :  { %7548 = vmatpush3.bf16.msra.mxu1 %v12436_v58  ;;  %5075 = vmatprep.mubr.bf16.mxu0 %v4570_v21 }
 0x51a   :  { %7577 = vmatprep.subr.bf16.mxu1 %v12493_v49  ;;  %5076 = vmatmul.mubr.bf16.vlgmr.msra.gmra.mrb[64].mxu0 %v4569_v54 }
 0x51b   :  { %7556 = vmatpush3.bf16.msra.mxu0 %v12258_v56 }
 0x51c   :  { %7557 = vmatprep.subr.bf16.mxu0 %v12264_v16 }
 0x51f   :  { %7558 = vmatpush3.bf16.msra.mxu0 %v12286_v12 }
 0x520   :  { %7559 = vmatprep.subr.bf16.mxu0 %v12319_v59 }
 0x522   :  { %v8721_v26 = vpop.permute.xlu0 %8720 }
 0x523   :  { %v8723_v10 = vunpack.i.h.bf16 %v8721_v26  ;;  %v8722_v20 = vunpack.i.l.bf16 %v8721_v26  ;;  %7560 = vmatpush3.bf16.msra.mxu0 %v12331_v22  ;;  %v13929_v22 = vld [vmem:[#allocation37_spill] sm:$0xff] }
 0x524   :  { %v8726_v4 = vpop.permute.xlu1 %8725  ;;  %7561 = vmatprep.subr.bf16.mxu0 %v12352_v53 }
 0x525   :  { %v4475_v58 = vsel %vm2757_vm4, %v8713_v60, %v8722_v20  ;;  %v4476_v49 = vsel %vm2757_vm4, %v8722_v20, %v8723_v10  ;;  %v8728_v35 = vunpack.i.h.bf16 %v8726_v4  ;;  %v8727_v56 = vunpack.i.l.bf16 %v8726_v4  ;;  %v13932_v60 = vld [vmem:[#allocation19_spill] sm:$0xff] }
 0x526   :  { %v4523_v16 = vmax.f32 %v12509_v42, %v4475_v58  ;;  %v4524_v12 = vmax.f32 %v12528_v24, %v4476_v49 }
 0x527   :  { %v4487_v59 = vsel %vm2757_vm4, %v8718_v50, %v8727_v56  ;;  %v4488_v46 = vsel %vm2757_vm4, %v8727_v56, %v8728_v35  ;;  %7562 = vmatpush3.bf16.msra.mxu0 %v12366_v13  ;;  %v13935_v13 = vld [vmem:[#allocation38_spill] sm:$0xff]  ;;  %v13938_v50 = vld [vmem:[#allocation29_spill] sm:$0xff] }
 0x528   :  { %v4535_v7 = vmax.f32 %v13929_v22, %v4487_v59  ;;  %v4536_v53 = vmax.f32 %v13930_v28, %v4488_v46  ;;  %7563 = vmatprep.subr.bf16.mxu0 %v13931_v9  ;;  %v4547_v5 = vmax.f32 %v4523_v16, 0.0  ;;  %v4548_v47 = vmax.f32 %v4524_v12, 0.0  ;;  %v8798_v12 = vld [vmem:[%s13404_s4 + $0x80] sm:$0xff]   ;;  %v8799_v59 = vld [vmem:[%s13404_s4 + $0x48] sm:$0xff]   ;;  %v8803_v28 = vld [vmem:[%s13404_s4 + $0x50] sm:$0xff]  }
 0x529   :  { %v8800_v46 = vld [vmem:[%s13404_s4 + $0xc8] sm:$0xff]   ;;  %v8805_v9 = vld [vmem:[%s13404_s4 + $0x10] sm:$0xff]  }
 0x52a   :  { %v4559_v30 = vmax.f32 %v4535_v7, 0.0  ;;  %v4560_v61 = vmax.f32 %v4536_v53, 0.0  ;;  %v8801_v22 = vld [vmem:[%s13404_s4 + $0x8] sm:$0xff]   ;;  %v8804_v53 = vld [vmem:[%s13404_s4 + $0xd0] sm:$0xff]  }
 0x52b   :  { %7564 = vmatpush3.bf16.msra.mxu0 %v13932_v60  ;;  %v8802_v7 = vld [vmem:[%s13404_s4 + $0x88] sm:$0xff]   ;;  %v8810_v60 = vld [vmem:[%s13404_s4 + $0x98] sm:$0xff]  }
 0x52c   :  { %v4572_v42 = vpack.c.bf16 %v4560_v61, %v4548_v47  ;;  %v4571_v24 = vpack.c.bf16 %v4559_v30, %v4547_v5  ;;  %7565 = vmatprep.subr.bf16.mxu0 %v13933_v1  ;;  %v8806_v5 = vld [vmem:[%s13404_s4 + $0x90] sm:$0xff]   ;;  %v8807_v30 = vld [vmem:[%s13404_s4 + $0x58] sm:$0xff]   ;;  %v8813_v1 = vld [vmem:[%s13404_s4 + $0x20] sm:$0xff]  }
 0x52d   :  { %v8808_v47 = vld [vmem:[%s13404_s4 + $0xd8] sm:$0xff]  }
 0x52e   :  { %5117 = vmatprep.mubr.bf16.mxu1 %v4572_v42  ;;  %v8809_v61 = vld [vmem:[%s13404_s4 + $0x18] sm:$0xff]   ;;  %v8811_v42 = vld [vmem:[%s13404_s4 + $0x60] sm:$0xff]  }
 0x52f   :  { %5118 = vmatmul.mubr.bf16.vlgmr.msra.gmra.mrb[64].mxu1 %v4571_v24  ;;  %7566 = vmatpush3.bf16.msra.mxu0 %v13934_v19  ;;  %v8812_v24 = vld [vmem:[%s13404_s4 + $0xe0] sm:$0xff]  }
 0x530   :  { %7578 = vmatpush3.bf16.msra.mxu1 %v12601_v57  ;;  %7567 = vmatprep.subr.bf16.mxu0 %v13935_v13  ;;  %v8814_v19 = vld [vmem:[%s13404_s4 + $0xa0] sm:$0xff]   ;;  %v8815_v13 = vld [vmem:[%s13404_s4 + $0x68] sm:$0xff]  }
 0x531   :  { %7579 = vmatprep.subr.bf16.mxu1 %v12612_v3 }
 0x533   :  { %7568 = vmatpush3.bf16.msra.mxu0 %v13936_v29  ;;  %v8816_v29 = vld [vmem:[%s13404_s4 + $0xe8] sm:$0xff]  }
 0x534   :  { %7580 = vmatpush3.bf16.msra.mxu1 %v12626_v23  ;;  %7569 = vmatprep.subr.bf16.mxu0 %v13937_v2  ;;  %v8817_v2 = vld [vmem:[%s13404_s4 + $0x28] sm:$0xff]  }
 0x535   :  { %7581 = vmatprep.subr.bf16.mxu1 %v12632_v17 }
 0x537   :  { %7570 = vmatpush3.bf16.msra.mxu0 %v13938_v50  ;;  %v8818_v50 = vld [vmem:[%s13404_s4 + $0xa8] sm:$0xff]  }
 0x538   :  { %7582 = vmatpush3.bf16.msra.mxu1 %v12638_v34 }
 0x539   :  { %7583 = vmatprep.subr.bf16.mxu1 %v12644_v15 }
 0x53c   :  { %7584 = vmatpush3.bf16.msra.mxu1 %v12650_v8  ;;  %v13939_v8 = vld [vmem:[#allocation23_spill] sm:$0xff] }
 0x53d   :  { %7585 = vmatprep.subr.bf16.mxu1 %v12657_v37 }
 0x540   :  { %7586 = vmatpush3.bf16.msra.mxu1 %v12664_v44 }
 0x541   :  { %7587 = vmatprep.subr.bf16.mxu1 %v12671_v51 }
 0x544   :  { %7588 = vmatpush3.bf16.msra.mxu1 %v12678_v31 }
 0x545   :  { %7589 = vmatprep.subr.bf16.mxu1 %v12685_v40 }
 0x548   :  { %7590 = vmatpush3.bf16.msra.mxu1 %v12692_v48 }
 0x549   :  { %7591 = vmatprep.subr.bf16.mxu1 %v12699_v41 }
 0x54c   :  { %7592 = vmatpush3.bf16.msra.mxu1 %v12706_v52 }
 0x55a   :  { %v8731_v57 = vpop.permute.xlu0 %8730 }
 0x55b   :  { %v8733_v3 = vunpack.i.h.bf16 %v8731_v57  ;;  %v8732_v23 = vunpack.i.l.bf16 %v8731_v57 }
 0x55d   :  { %v4477_v17 = vsel %vm2757_vm4, %v8723_v10, %v8732_v23  ;;  %v4478_v34 = vsel %vm2757_vm4, %v8732_v23, %v8733_v3  ;;  %v8736_v15 = vpop.permute.xlu1 %8735  ;;  %v8820_v23 = vld [vmem:[%s13404_s4 + $0xf0] sm:$0xff]  }
 0x55e   :  { %v4525_v37 = vmax.f32 %v13939_v8, %v4477_v17  ;;  %v8738_v44 = vunpack.i.h.bf16 %v8736_v15  ;;  %v8737_v51 = vunpack.i.l.bf16 %v8736_v15  ;;  %v8741_v31 = vpop.permute.xlu0 %8740  ;;  %v4526_v40 = vmax.f32 %v12552_v27, %v4478_v34  ;;  %v8821_v17 = vld [vmem:[%s13404_s4 + $0x30] sm:$0xff]   ;;  %v8823_v8 = vld [vmem:[%s13404_s4 + $0x78] sm:$0xff]  }
 0x55f   :  { %v8743_v48 = vunpack.i.h.bf16 %v8741_v31  ;;  %v8742_v25 = vunpack.i.l.bf16 %v8741_v31  ;;  %v8822_v15 = vld [vmem:[%s13404_s4 + $0xb0] sm:$0xff]  }
 0x560   :  { %v4549_v41 = vmax.f32 %v4525_v37, 0.0  ;;  %v4489_v52 = vsel %vm2757_vm4, %v8728_v35, %v8737_v51  ;;  %v4490_v43 = vsel %vm2757_vm4, %v8737_v51, %v8738_v44  ;;  %v4550_v39 = vmax.f32 %v4526_v40, 0.0  ;;  %v8824_v37 = vld [vmem:[%s13404_s4 + $0xf8] sm:$0xff]  }
 0x561   :  { %v4537_v55 = vmax.f32 %v13940_v14, %v4489_v52  ;;  %v4479_v6 = vsel %vm2757_vm4, %v8733_v3, %v8742_v25  ;;  %v4480_v38 = vsel %vm2757_vm4, %v8742_v25, %v8743_v48  ;;  %v4468_v62 = vpop.permute.xlu1 %4467  ;;  %v4538_v45 = vmax.f32 %v12565_v33, %v4490_v43  ;;  %v8819_v3 = vld [vmem:[%s13404_s4 + $0x70] sm:$0xff]   ;;  %v8825_v40 = vld [vmem:[%s13404_s4 + $0x38] sm:$0xff]   ;;  %v8828_v52 = vld [vmem:[%s13404_s4 + $0x1c0] sm:$0xff]  }
 0x562   :  { %v4527_v32 = vmax.f32 %v12555_v18, %v4479_v6  ;;  %v4528_v27 = vmax.f32 %v12558_v0, %v4480_v38  ;;  %v4491_v63 = vsel %vm2757_vm4, %v8738_v44, %v4468_v62  ;;  %v4492_v21 = vsel %vm2757_vm4, %v4468_v62, %v8743_v48  ;;  %v8795_v0 = vld [vmem:[%s13404_s4 + $0x40] sm:$0xff]   ;;  %v8826_v48 = vld [vmem:[%s13404_s4 + $0xb8] sm:$0xff]  }
 0x563   :  { %v4561_v54 = vmax.f32 %v4537_v55, 0.0  ;;  %v4539_v26 = vmax.f32 %v12568_v11, %v4491_v63  ;;  %v4540_v10 = vmax.f32 %v12587_v36, %v4492_v21  ;;  %v4562_v20 = vmax.f32 %v4538_v45, 0.0  ;;  %v8796_v11 = vld [vmem:[%s13404_s4 + $0xc0] sm:$0xff]   ;;  %7599 = vmatprep.subr.bf16.mxu0 %v8795_v0 }
 0x564   :  { %v4551_v4 = vmax.f32 %v4527_v32, 0.0  ;;  %v4552_v58 = vmax.f32 %v4528_v27, 0.0  ;;  %v8797_v36 = vld [vmem:[%s13404_s4] sm:$0xff]   ;;  %7621 = vmatprep.subr.bf16.mxu1 %v8796_v11  ;;  %v5214_v27 = vlaneseq  ;;  %vm5379_vm4 = vcmask 1040384  }
 0x565   :  { %v4563_v49 = vmax.f32 %v4539_v26, 0.0  ;;  %v4564_v35 = vmax.f32 %v4540_v10, 0.0  ;;  %v4574_v56 = vpack.c.bf16 %v4562_v20, %v4550_v39  ;;  %v4573_v33 = vpack.c.bf16 %v4561_v54, %v4549_v41  ;;  %v8827_v41 = vld [vmem:[%s13404_s4 + $0x140] sm:$0xff]   ;;  %vm12932_vm7 = vmand %vm5379_vm4, %vm5380_vm6 }
 0x567   :  { %v4575_v16 = vpack.c.bf16 %v4563_v49, %v4551_v4  ;;  %5158 = vmatprep.mubr.bf16.mxu0 %v4574_v56  ;;  %v4576_v18 = vpack.c.bf16 %v4564_v35, %v4552_v58  ;;  %v5215_v4 = vshrl.u32 %v5214_v27, 7  ;;  %v8829_v27 = vld [vmem:[%s13404_s4 + $0x100] sm:$0xff]  }
 0x568   :  { %5159 = vmatmul.mubr.bf16.vlgmr.msra.gmra.mrb[68].mxu0 %v4573_v33 }
 0x569   :  { %5199 = vmatprep.mubr.bf16.mxu1 %v4576_v18  ;;  %7600 = vmatpush3.bf16.msra.mxu0 %v8797_v36  ;;  %v12889_v35 = vsub.s32 0, %v5215_v4  ;;  %v12891_v56 = vsub.s32 5, %v5215_v4  ;;  %v12893_v33 = vsub.s32 4, %v5215_v4 }
 0x56a   :  { %5200 = vmatmul.mubr.bf16.vlgmr.msra.gmra.mrb[68].mxu1 %v4575_v16  ;;  %7601 = vmatprep.subr.bf16.mxu0 %v8799_v59 }
 0x56b   :  { %7622 = vmatpush3.bf16.msra.mxu1 %v8798_v12 }
 0x56c   :  { %7623 = vmatprep.subr.bf16.mxu1 %v8800_v46 }
 0x56d   :  { %7602 = vmatpush3.bf16.msra.mxu0 %v8801_v22 }
 0x56e   :  { %7603 = vmatprep.subr.bf16.mxu0 %v8803_v28 }
 0x56f   :  { %7624 = vmatpush3.bf16.msra.mxu1 %v8802_v7 }
 0x570   :  { %7625 = vmatprep.subr.bf16.mxu1 %v8804_v53 }
 0x571   :  { %7604 = vmatpush3.bf16.msra.mxu0 %v8805_v9  ;;  %v12903_v9 = vsub.s32 1, %v5215_v4 }
 0x572   :  { %7605 = vmatprep.subr.bf16.mxu0 %v8807_v30 }
 0x573   :  { %7626 = vmatpush3.bf16.msra.mxu1 %v8806_v5  ;;  %v12905_v5 = vsub.s32 3, %v5215_v4 }
 0x574   :  { %7627 = vmatprep.subr.bf16.mxu1 %v8808_v47 }
 0x575   :  { %7606 = vmatpush3.bf16.msra.mxu0 %v8809_v61 }
 0x576   :  { %7607 = vmatprep.subr.bf16.mxu0 %v8811_v42 }
 0x577   :  { %7628 = vmatpush3.bf16.msra.mxu1 %v8810_v60 }
 0x578   :  { %7629 = vmatprep.subr.bf16.mxu1 %v8812_v24  ;;  %v12907_v24 = vsub.s32 2, %v5215_v4 }
 0x579   :  { %7608 = vmatpush3.bf16.msra.mxu0 %v8813_v1  ;;  %v12909_v1 = vsub.s32 7, %v5215_v4 }
 0x57a   :  { %7609 = vmatprep.subr.bf16.mxu0 %v8815_v13 }
 0x57b   :  { %7630 = vmatpush3.bf16.msra.mxu1 %v8814_v19 }
 0x57c   :  { %7631 = vmatprep.subr.bf16.mxu1 %v8816_v29 }
 0x57d   :  { %7610 = vmatpush3.bf16.msra.mxu0 %v8817_v2 }
 0x57e   :  { %7611 = vmatprep.subr.bf16.mxu0 %v8819_v3 }
 0x57f   :  { %7632 = vmatpush3.bf16.msra.mxu1 %v8818_v50  ;;  %v12911_v50 = vsub.s32 6, %v5215_v4 }
 0x580   :  { %7633 = vmatprep.subr.bf16.mxu1 %v8820_v23 }
 0x581   :  { %7612 = vmatpush3.bf16.msra.mxu0 %v8821_v17 }
 0x582   :  { %7613 = vmatprep.subr.bf16.mxu0 %v8823_v8 }
 0x583   :  { %7634 = vmatpush3.bf16.msra.mxu1 %v8822_v15 }
 0x584   :  { %7635 = vmatprep.subr.bf16.mxu1 %v8824_v37 }
 0x585   :  { %7614 = vmatpush3.bf16.msra.mxu0 %v8825_v40 }
 0x586   :  { %7643 = vmatprep.subr.bf16.mxu0 %v8827_v41 }
 0x587   :  { %7636 = vmatpush3.bf16.msra.mxu1 %v8826_v48 }
 0x588   :  { %7665 = vmatprep.subr.bf16.mxu1 %v8828_v52  ;;  %v8855_v52 = vld [vmem:[%s13404_s4 + $0x178] sm:$0xff]  }
 0x5c5   :  { %v7483_v57 = vpop.f32.mrb[60].mxu0 }
 0x5c6   :  { %v7484_v34 = vpop.f32.mrb[61].mxu0 }
 0x5c7   :  { %v7485_v44 = vadd.f32 %v7484_v34, %v7483_v57  ;;  %v7486_v51 = vpop.f32.mrb[62].mxu0 }
 0x5c8   :  { %v7487_v31 = vpop.f32.mrb[63].mxu0 }
 0x5c9   :  { %v7488_v25 = vadd.f32 %v7487_v31, %v7486_v51 }
 0x5cf   :  { %v7505_v43 = vpop.f32.mrb[60].mxu1 }
 0x5d0   :  { %v7506_v39 = vpop.f32.mrb[61].mxu1 }
 0x5d1   :  { %v7507_v14 = vadd.f32 %v7506_v39, %v7505_v43  ;;  %v7508_v55 = vpop.f32.mrb[62].mxu1 }
 0x5d2   :  { %v7509_v6 = vpop.f32.mrb[63].mxu1 }
 0x5d3   :  { %v5037_v38 = vadd.f32 %v7507_v14, %v7485_v44  ;;  %v7510_v62 = vadd.f32 %v7509_v6, %v7508_v55 }
 0x5d5   :  { %v5040_v45 = vadd.f32 %v7510_v62, %v7488_v25 }
 0x5ed   :  { %v7527_v32 = vpop.f32.mrb[64].mxu0 }
 0x5ee   :  { %v7528_v63 = vpop.f32.mrb[65].mxu0 }
 0x5ef   :  { %v7529_v21 = vadd.f32 %v7528_v63, %v7527_v32  ;;  %v7530_v54 = vpop.f32.mrb[66].mxu0  ;;  %v8830_v63 = vld [vmem:[%s13404_s4 + $0x180] sm:$0xff]  }
 0x5f0   :  { %v7531_v26 = vpop.f32.mrb[67].mxu0 }
 0x5f1   :  { %v5078_v10 = vadd.f32 %v7529_v21, %v5037_v38  ;;  %v7532_v20 = vadd.f32 %v7531_v26, %v7530_v54 }
 0x5f3   :  { %v5081_v58 = vadd.f32 %v7532_v20, %v5040_v45  ;;  %v12901_v28 = vpack.i.bf16 %v5078_v10, %v5078_v10 }
 0x5f5   :  { %v12887_v49 = vpack.i.bf16 %v5081_v58, %v5081_v58  ;;  %v5221_v3 = vrot.slane %v12901_v28, %v12903_v9  ;;  %v5229_v23 = vrot.slane %v12901_v28, %v12905_v5  ;;  %v5217_v8 = vrot.slane %v12901_v28, %v12889_v35 }
 0x5f6   :  { %v5225_v37 = vrot.slane %v12901_v28, %v12907_v24  ;;  %v5237_v44 = vrot.slane %v12901_v28, %v12891_v56  ;;  %v5245_v51 = vrot.slane %v12901_v28, %v12909_v1  ;;  %v5233_v31 = vrot.slane %v12901_v28, %v12893_v33 }
 0x5f7   :  { %v5249_v16 = vrot.slane %v12887_v49, %v12889_v35  ;;  %v5269_v18 = vrot.slane %v12887_v49, %v12891_v56  ;;  %v5265_v0 = vrot.slane %v12887_v49, %v12893_v33  ;;  %v5241_v25 = vrot.slane %v12901_v28, %v12911_v50 }
 0x5f8   :  { %v5253_v41 = vrot.slane %v12887_v49, %v12903_v9  ;;  %v5261_v43 = vrot.slane %v12887_v49, %v12905_v5  ;;  %v5257_v39 = vrot.slane %v12887_v49, %v12907_v24  ;;  %v5277_v14 = vrot.slane %v12887_v49, %v12909_v1 }
 0x5f9   :  { %v5273_v55 = vrot.slane %v12887_v49, %v12911_v50  ;;  %v8843_v49 = vld [vmem:[%s13404_s4 + $0x160] sm:$0xff]  }
 0x602   :  { %v7549_v11 = vpop.f32.mrb[64].mxu1 }
 0x603   :  { %v7550_v36 = vpop.f32.mrb[65].mxu1 }
 0x604   :  { %v7551_v12 = vadd.f32 %v7550_v36, %v7549_v11  ;;  %v7552_v59 = vpop.f32.mrb[66].mxu1 }
 0x605   :  { %v7553_v46 = vpop.f32.mrb[67].mxu1 }
 0x606   :  { %v7554_v22 = vadd.f32 %v7553_v46, %v7552_v59  ;;  %v8831_v59 = vld [vmem:[%s13404_s4 + $0x148] sm:$0xff]  }
 0x607   :  { %v8832_v46 = vld [vmem:[%s13404_s4 + $0x1c8] sm:$0xff]  }
 0x63b   :  { %v7571_v7 = vpop.f32.mrb[68].mxu0 }
 0x63c   :  { %v7572_v53 = vpop.f32.mrb[69].mxu0 }
 0x63d   :  { %v7573_v30 = vadd.f32 %v7572_v53, %v7571_v7  ;;  %v7574_v47 = vpop.f32.mrb[70].mxu0  ;;  %v7593_v61 = vpop.f32.mrb[68].mxu1  ;;  %v8833_v53 = vld [vmem:[%s13404_s4 + $0x108] sm:$0xff]  }
 0x63e   :  { %v7575_v60 = vpop.f32.mrb[71].mxu0  ;;  %v7594_v42 = vpop.f32.mrb[69].mxu1 }
 0x63f   :  { %v5161_v19 = vadd.f32 %v7573_v30, %v7551_v12  ;;  %v7576_v13 = vadd.f32 %v7575_v60, %v7574_v47  ;;  %v7595_v29 = vadd.f32 %v7594_v42, %v7593_v61  ;;  %v7596_v2 = vpop.f32.mrb[70].mxu1  ;;  %v8834_v30 = vld [vmem:[%s13404_s4 + $0x188] sm:$0xff]   ;;  %v8836_v42 = vld [vmem:[%s13404_s4 + $0x1d0] sm:$0xff]  }
 0x640   :  { %v7597_v57 = vpop.f32.mrb[71].mxu1 }
 0x641   :  { %v5164_v17 = vadd.f32 %v7576_v13, %v7554_v22  ;;  %v5202_v34 = vadd.f32 %v7595_v29, %v5161_v19  ;;  %v7598_v15 = vadd.f32 %v7597_v57, %v7596_v2 }
 0x643   :  { %v7318_v40 = vpack.i.bf16 %v5202_v34, %v5202_v34  ;;  %v5205_v48 = vadd.f32 %v7598_v15, %v5164_v17  ;;  %v8841_v34 = vld [vmem:[%s13404_s4 + $0x118] sm:$0xff]  }
 0x644   :  { %v8842_v15 = vld [vmem:[%s13404_s4 + $0x198] sm:$0xff]  }
 0x645   :  { %v7319_v6 = vpack.i.bf16 %v5205_v48, %v5205_v48  ;;  %v5306_v38 = vrot.slane %v7318_v40, %v12903_v9  ;;  %v5314_v62 = vrot.slane %v7318_v40, %v12905_v5  ;;  %v5302_v45 = vrot.slane %v7318_v40, %v12889_v35  ;;  %v8852_v48 = vld [vmem:[%s13404_s4 + $0x1f0] sm:$0xff]  }
 0x646   :  { %v5310_v32 = vrot.slane %v7318_v40, %v12907_v24  ;;  %v5322_v21 = vrot.slane %v7318_v40, %v12891_v56  ;;  %v5330_v54 = vrot.slane %v7318_v40, %v12909_v1  ;;  %v5318_v26 = vrot.slane %v7318_v40, %v12893_v33 }
 0x647   :  { %v5383_v10 = vsel %vm12932_vm7, %v5221_v3, %v5306_v38  ;;  %v5385_v20 = vsel %vm12932_vm7, %v5229_v23, %v5314_v62  ;;  %v5382_v4 = vsel %vm12932_vm7, %v5217_v8, %v5302_v45  ;;  %v5326_v58 = vrot.slane %v7318_v40, %v12911_v50  ;;  %v8837_v3 = vld [vmem:[%s13404_s4 + $0x110] sm:$0xff]   ;;  %v8846_v8 = vld [vmem:[%s13404_s4 + $0x1a0] sm:$0xff]   ;;  %v8863_v45 = vld [vmem:[%s13404_s4 + $0x248] sm:$0xff]  }
 0x648   :  { %6461 = vmatprep.mubr.bf16.mxu0 %v5383_v10  ;;  %6501 = vmatprep.mubr.bf16.mxu1 %v5385_v20  ;;  %v5384_v11 = vsel %vm12932_vm7, %v5225_v37, %v5310_v32  ;;  %v5387_v36 = vsel %vm12932_vm7, %v5237_v44, %v5322_v21  ;;  %v5389_v12 = vsel %vm12932_vm7, %v5245_v51, %v5330_v54  ;;  %v8847_v37 = vld [vmem:[%s13404_s4 + $0x168] sm:$0xff]   ;;  %v8851_v40 = vld [vmem:[%s13404_s4 + $0x170] sm:$0xff]   ;;  %v8861_v38 = vld [vmem:[%s13404_s4 + $0x200] sm:$0xff]  }
 0x649   :  { %6462 = vmatmul.mubr.bf16.vlgmr.msra.gmra.mrb[72].mxu0 %v5382_v4  ;;  %6502 = vmatmul.mubr.bf16.vlgmr.msra.gmra.mrb[72].mxu1 %v5384_v11  ;;  %v12978_v22 = vsel %vm12932_vm7, %v5233_v31, %v5318_v26  ;;  %v12982_v7 = vsel %vm12932_vm7, %v5241_v25, %v5326_v58  ;;  %v5338_v28 = vrot.slane %v7319_v6, %v12903_v9  ;;  %v8835_v9 = vld [vmem:[%s13404_s4 + $0x150] sm:$0xff]   ;;  %v8848_v44 = vld [vmem:[%s13404_s4 + $0x1e8] sm:$0xff]   ;;  %v8862_v62 = vld [vmem:[%s13404_s4 + $0x280] sm:$0xff]  }
 0x64a   :  { %7644 = vmatpush3.bf16.msra.mxu0 %v8829_v27  ;;  %7666 = vmatpush3.bf16.msra.mxu1 %v8830_v63  ;;  %v5346_v47 = vrot.slane %v7319_v6, %v12905_v5  ;;  %v5334_v61 = vrot.slane %v7319_v6, %v12889_v35  ;;  %v5342_v60 = vrot.slane %v7319_v6, %v12907_v24  ;;  %v8849_v51 = vld [vmem:[%s13404_s4 + $0x128] sm:$0xff]   ;;  %v8853_v25 = vld [vmem:[%s13404_s4 + $0x130] sm:$0xff]   ;;  %v8871_v20 = vld [vmem:[%s13404_s4 + $0x258] sm:$0xff]  }
 0x64b   :  { %6541 = vmatprep.mubr.bf16.mxu0 %v5387_v36  ;;  %6581 = vmatprep.mubr.bf16.mxu1 %v5389_v12  ;;  %v13002_v19 = vsel %vm12932_vm7, %v5253_v41, %v5338_v28  ;;  %v5354_v5 = vrot.slane %v7319_v6, %v12891_v56  ;;  %v5362_v13 = vrot.slane %v7319_v6, %v12909_v1  ;;  %v8838_v56 = vld [vmem:[%s13404_s4 + $0x190] sm:$0xff]   ;;  %v8850_v31 = vld [vmem:[%s13404_s4 + $0x1a8] sm:$0xff]   ;;  %v8872_v4 = vld [vmem:[%s13404_s4 + $0x2d8] sm:$0xff]  }
 0x64c   :  { %7645 = vmatprep.subr.bf16.mxu0 %v8831_v59  ;;  %7667 = vmatprep.subr.bf16.mxu1 %v8832_v46  ;;  %v13008_v24 = vsel %vm12932_vm7, %v5261_v43, %v5346_v47  ;;  %v13015_v29 = vsel %vm12932_vm7, %v5249_v16, %v5334_v61  ;;  %v13019_v2 = vsel %vm12932_vm7, %v5257_v39, %v5342_v60  ;;  %v8854_v41 = vld [vmem:[%s13404_s4 + $0x1b0] sm:$0xff]   ;;  %v8856_v43 = vld [vmem:[%s13404_s4 + $0x1f8] sm:$0xff]   ;;  %v8864_v32 = vld [vmem:[%s13404_s4 + $0x2c8] sm:$0xff]  }
 0x64d   :  { %v13026_v1 = vsel %vm12932_vm7, %v5269_v18, %v5354_v5  ;;  %v13030_v57 = vsel %vm12932_vm7, %v5277_v14, %v5362_v13  ;;  %v5350_v35 = vrot.slane %v7319_v6, %v12893_v33  ;;  %v5358_v16 = vrot.slane %v7319_v6, %v12911_v50  ;;  %v8839_v18 = vld [vmem:[%s13404_s4 + $0x158] sm:$0xff]   ;;  %v8844_v33 = vld [vmem:[%s13404_s4 + $0x1e0] sm:$0xff]   ;;  %v8865_v27 = vld [vmem:[%s13404_s4 + $0x208] sm:$0xff]  }
 0x64e   :  { %7646 = vmatpush3.bf16.msra.mxu0 %v8833_v53  ;;  %7668 = vmatpush3.bf16.msra.mxu1 %v8834_v30  ;;  %v8840_v50 = vld [vmem:[%s13404_s4 + $0x1d8] sm:$0xff]   ;;  %v8860_v6 = vld [vmem:[%s13404_s4 + $0x2c0] sm:$0xff]   ;;  %v8866_v63 = vld [vmem:[%s13404_s4 + $0x288] sm:$0xff]  }
 0x64f   :  { %7647 = vmatprep.subr.bf16.mxu0 %v8835_v9  ;;  %7669 = vmatprep.subr.bf16.mxu1 %v8836_v42  ;;  %v13051_v23 = vsel %vm12932_vm7, %v5265_v0, %v5350_v35  ;;  %v13055_v17 = vsel %vm12932_vm7, %v5273_v55, %v5358_v16  ;;  %v8845_v0 = vld [vmem:[%s13404_s4 + $0x120] sm:$0xff]   ;;  %v8857_v39 = vld [vmem:[%s13404_s4 + $0x138] sm:$0xff]   ;;  %v8867_v21 = vld [vmem:[%s13404_s4 + $0x250] sm:$0xff]  }
 0x650   :  { %v8858_v14 = vld [vmem:[%s13404_s4 + $0x1b8] sm:$0xff]   ;;  %v8859_v55 = vld [vmem:[%s13404_s4 + $0x240] sm:$0xff]   ;;  %v8868_v54 = vld [vmem:[%s13404_s4 + $0x2d0] sm:$0xff]  }
 0x651   :  { %v8869_v26 = vld [vmem:[%s13404_s4 + $0x210] sm:$0xff]   ;;  %v8873_v58 = vld [vmem:[%s13404_s4 + $0x218] sm:$0xff]   ;;  %v8875_v36 = vld [vmem:[%s13404_s4 + $0x260] sm:$0xff]  }
 0x652   :  { %7648 = vmatpush3.bf16.msra.mxu0 %v8837_v3  ;;  %7670 = vmatpush3.bf16.msra.mxu1 %v8838_v56  ;;  %v8870_v10 = vld [vmem:[%s13404_s4 + $0x290] sm:$0xff]   ;;  %v8874_v11 = vld [vmem:[%s13404_s4 + $0x298] sm:$0xff]   ;;  %v8876_v12 = vld [vmem:[%s13404_s4 + $0x2e0] sm:$0xff]  }
 0x653   :  { %7649 = vmatprep.subr.bf16.mxu0 %v8839_v18  ;;  %7671 = vmatprep.subr.bf16.mxu1 %v8840_v50  ;;  %v8877_v59 = vld [vmem:[%s13404_s4 + $0x220] sm:$0xff]   ;;  %v8881_v28 = vld [vmem:[%s13404_s4 + $0x228] sm:$0xff]   ;;  %v8883_v30 = vld [vmem:[%s13404_s4 + $0x270] sm:$0xff]  }
 0x654   :  { %v8878_v46 = vld [vmem:[%s13404_s4 + $0x2a0] sm:$0xff]   ;;  %v8882_v53 = vld [vmem:[%s13404_s4 + $0x2a8] sm:$0xff]   ;;  %v8884_v47 = vld [vmem:[%s13404_s4 + $0x2f0] sm:$0xff]  }
 0x655   :  { %v8885_v61 = vld [vmem:[%s13404_s4 + $0x230] sm:$0xff]   ;;  %v8887_v9 = vld [vmem:[%s13404_s4 + $0x278] sm:$0xff]   ;;  %v8891_v13 = vld [vmem:[%s13404_s4 + $0x340] sm:$0xff]  }
 0x656   :  { %7650 = vmatpush3.bf16.msra.mxu0 %v8841_v34  ;;  %7672 = vmatpush3.bf16.msra.mxu1 %v8842_v15  ;;  %v8886_v60 = vld [vmem:[%s13404_s4 + $0x2b0] sm:$0xff]   ;;  %v8888_v42 = vld [vmem:[%s13404_s4 + $0x2f8] sm:$0xff]   ;;  %v8893_v35 = vld [vmem:[%s13404_s4 + $0x300] sm:$0xff]  }
 0x657   :  { %7651 = vmatprep.subr.bf16.mxu0 %v8843_v49  ;;  %7673 = vmatprep.subr.bf16.mxu1 %v8844_v33  ;;  %v8890_v5 = vld [vmem:[%s13404_s4 + $0x2b8] sm:$0xff]   ;;  %v8894_v16 = vld [vmem:[%s13404_s4 + $0x380] sm:$0xff]   ;;  %v8895_v3 = vld [vmem:[%s13404_s4 + $0x348] sm:$0xff]  }
 0x658   :  { %v8896_v56 = vld [vmem:[%s13404_s4 + $0x3c8] sm:$0xff]   ;;  %v8902_v34 = vld [vmem:[%s13404_s4 + $0x390] sm:$0xff]   ;;  %v8904_v15 = vld [vmem:[%s13404_s4 + $0x3d8] sm:$0xff]  }
 0x659   :  { %v8897_v18 = vld [vmem:[%s13404_s4 + $0x308] sm:$0xff]   ;;  %v8905_v49 = vld [vmem:[%s13404_s4 + $0x318] sm:$0xff]  }
 0x65a   :  { %7652 = vmatpush3.bf16.msra.mxu0 %v8845_v0  ;;  %7674 = vmatpush3.bf16.msra.mxu1 %v8846_v8  ;;  %v8898_v50 = vld [vmem:[%s13404_s4 + $0x388] sm:$0xff]   ;;  %v8906_v33 = vld [vmem:[%s13404_s4 + $0x398] sm:$0xff]   ;;  %v8907_v0 = vld [vmem:[%s13404_s4 + $0x360] sm:$0xff]  }
 0x65b   :  { %7653 = vmatprep.subr.bf16.mxu0 %v8847_v37  ;;  %7675 = vmatprep.subr.bf16.mxu1 %v8848_v44  ;;  %v8908_v8 = vld [vmem:[%s13404_s4 + $0x3e0] sm:$0xff]  }
 0x65c   :  { %v8909_v37 = vld [vmem:[%s13404_s4 + $0x320] sm:$0xff]  }
 0x65d   :  { %v8910_v44 = vld [vmem:[%s13404_s4 + $0x3a0] sm:$0xff]  }
 0x65e   :  { %7654 = vmatpush3.bf16.msra.mxu0 %v8849_v51  ;;  %7676 = vmatpush3.bf16.msra.mxu1 %v8850_v31  ;;  %v8911_v51 = vld [vmem:[%s13404_s4 + $0x368] sm:$0xff]  }
 0x65f   :  { %7655 = vmatprep.subr.bf16.mxu0 %v8851_v40  ;;  %7677 = vmatprep.subr.bf16.mxu1 %v8852_v48  ;;  %v8912_v31 = vld [vmem:[%s13404_s4 + $0x3e8] sm:$0xff]  }
 0x660   :  { %v8913_v40 = vld [vmem:[%s13404_s4 + $0x328] sm:$0xff]  }
 0x661   :  { %v8914_v48 = vld [vmem:[%s13404_s4 + $0x3a8] sm:$0xff]  }
 0x662   :  { %7656 = vmatpush3.bf16.msra.mxu0 %v8853_v25  ;;  %7678 = vmatpush3.bf16.msra.mxu1 %v8854_v41  ;;  %v8915_v25 = vld [vmem:[%s13404_s4 + $0x370] sm:$0xff]  }
 0x663   :  { %7657 = vmatprep.subr.bf16.mxu0 %v8855_v52  ;;  %7679 = vmatprep.subr.bf16.mxu1 %v8856_v43  ;;  %v8916_v41 = vld [vmem:[%s13404_s4 + $0x3f0] sm:$0xff]  }
 0x664   :  { %v8917_v52 = vld [vmem:[%s13404_s4 + $0x330] sm:$0xff]  }
 0x665   :  { %v8918_v43 = vld [vmem:[%s13404_s4 + $0x3b0] sm:$0xff]  }
 0x666   :  { %7658 = vmatpush3.bf16.msra.mxu0 %v8857_v39  ;;  %7680 = vmatpush3.bf16.msra.mxu1 %v8858_v14  ;;  %v8919_v39 = vld [vmem:[%s13404_s4 + $0x378] sm:$0xff]  }
 0x667   :  { %7687 = vmatprep.subr.bf16.mxu0 %v8859_v55  ;;  %7709 = vmatprep.subr.bf16.mxu1 %v8860_v6  ;;  %v8920_v14 = vld [vmem:[%s13404_s4 + $0x3f8] sm:$0xff]  }
 0x668   :  { %v8921_v55 = vld [vmem:[%s13404_s4 + $0x338] sm:$0xff]  }
 0x669   :  { %6542 = vmatmul.mubr.bf16.vlgmr.msra.gmra.mrb[76].mxu0 %v12978_v22  ;;  %6582 = vmatmul.mubr.bf16.vlgmr.msra.gmra.mrb[76].mxu1 %v12982_v7  ;;  %v8879_v22 = vld [vmem:[%s13404_s4 + $0x268] sm:$0xff]   ;;  %v8922_v6 = vld [vmem:[%s13404_s4 + $0x3b8] sm:$0xff]  }
 0x66a   :  { %7688 = vmatpush3.bf16.msra.mxu0 %v8861_v38  ;;  %6621 = vmatprep.mubr.bf16.mxu0 %v13002_v19  ;;  %v8880_v7 = vld [vmem:[%s13404_s4 + $0x2e8] sm:$0xff]   ;;  %v8889_v19 = vld [vmem:[%s13404_s4 + $0x238] sm:$0xff]   ;;  %v13943_v38 = vmov 0.0  }
 0x66b   :  { %7710 = vmatpush3.bf16.msra.mxu1 %v8862_v62  ;;  %6661 = vmatprep.mubr.bf16.mxu1 %v13008_v24  ;;  %v8892_v24 = vld [vmem:[%s13404_s4 + $0x3c0] sm:$0xff]  }
 0x66c   :  { %7689 = vmatprep.subr.bf16.mxu0 %v8863_v45  ;;  %7711 = vmatprep.subr.bf16.mxu1 %v8864_v32  ;;  %v8923_v62 = vld [vmem:[%s13406_s6] sm:$0xff]   ;;  %v8924_v45 = vld [vmem:[%s13406_s6 + $0x8] sm:$0xff]   ;;  %v8925_v32 = vld [vmem:[%s13406_s6 + $0x10] sm:$0xff]  }
 0x66e   :  { %7690 = vmatpush3.bf16.msra.mxu0 %v8865_v27  ;;  %v8928_v27 = vld [vmem:[%s13406_s6 + $0x28] sm:$0xff]  }
 0x66f   :  { %7712 = vmatpush3.bf16.msra.mxu1 %v8866_v63  ;;  %7691 = vmatprep.subr.bf16.mxu0 %v8867_v21  ;;  %v8929_v63 = vld [vmem:[%s13406_s6 + $0x30] sm:$0xff]   ;;  %v8930_v21 = vld [vmem:[%s13406_s6 + $0x38] sm:$0xff]  }
 0x670   :  { %7713 = vmatprep.subr.bf16.mxu1 %v8868_v54  ;;  %v8931_v54 = vld [vmem:[%s13408_s8] sm:$0xff]  }
 0x672   :  { %7692 = vmatpush3.bf16.msra.mxu0 %v8869_v26  ;;  %v8932_v26 = vld [vmem:[%s13408_s8 + $0x8] sm:$0xff]  }
 0x673   :  { %7714 = vmatpush3.bf16.msra.mxu1 %v8870_v10  ;;  %7693 = vmatprep.subr.bf16.mxu0 %v8871_v20  ;;  %v8933_v10 = vld [vmem:[%s13408_s8 + $0x10] sm:$0xff]   ;;  %v8934_v20 = vld [vmem:[%s13408_s8 + $0x18] sm:$0xff]  }
 0x674   :  { %7715 = vmatprep.subr.bf16.mxu1 %v8872_v4  ;;  %v8935_v4 = vld [vmem:[%s13408_s8 + $0x20] sm:$0xff]  }
 0x676   :  { %7694 = vmatpush3.bf16.msra.mxu0 %v8873_v58  ;;  %v8936_v58 = vld [vmem:[%s13408_s8 + $0x28] sm:$0xff]  }
 0x677   :  { %7716 = vmatpush3.bf16.msra.mxu1 %v8874_v11  ;;  %7695 = vmatprep.subr.bf16.mxu0 %v8875_v36 }
 0x678   :  { %7717 = vmatprep.subr.bf16.mxu1 %v8876_v12  ;;  %v7320_v12 = vld [vmem:[%s13405_s5] ss:$0 sm:$0xff] }
 0x67a   :  { %7696 = vmatpush3.bf16.msra.mxu0 %v8877_v59 }
 0x67b   :  { %7718 = vmatpush3.bf16.msra.mxu1 %v8878_v46  ;;  %7697 = vmatprep.subr.bf16.mxu0 %v8879_v22 }
 0x67c   :  { %7719 = vmatprep.subr.bf16.mxu1 %v8880_v7 }
 0x67e   :  { %7698 = vmatpush3.bf16.msra.mxu0 %v8881_v28 }
 0x67f   :  { %7720 = vmatpush3.bf16.msra.mxu1 %v8882_v53  ;;  %7699 = vmatprep.subr.bf16.mxu0 %v8883_v30 }
 0x680   :  { %7721 = vmatprep.subr.bf16.mxu1 %v8884_v47 }
 0x682   :  { %7700 = vmatpush3.bf16.msra.mxu0 %v8885_v61 }
 0x683   :  { %7722 = vmatpush3.bf16.msra.mxu1 %v8886_v60  ;;  %7701 = vmatprep.subr.bf16.mxu0 %v8887_v9 }
 0x684   :  { %7723 = vmatprep.subr.bf16.mxu1 %v8888_v42 }
 0x686   :  { %7702 = vmatpush3.bf16.msra.mxu0 %v8889_v19 }
 0x687   :  { %7724 = vmatpush3.bf16.msra.mxu1 %v8890_v5  ;;  %7731 = vmatprep.subr.bf16.mxu0 %v8891_v13 }
 0x688   :  { %7753 = vmatprep.subr.bf16.mxu1 %v8892_v24 }
 0x689   :  { %6622 = vmatmul.mubr.bf16.vlgmr.msra.gmra.mrb[80].mxu0 %v13015_v29  ;;  %v8899_v29 = vld [vmem:[%s13404_s4 + $0x350] sm:$0xff]  }
 0x68a   :  { %6662 = vmatmul.mubr.bf16.vlgmr.msra.gmra.mrb[80].mxu1 %v13019_v2  ;;  %7732 = vmatpush3.bf16.msra.mxu0 %v8893_v35  ;;  %v8900_v2 = vld [vmem:[%s13404_s4 + $0x3d0] sm:$0xff]  }
 0x68b   :  { %6701 = vmatprep.mubr.bf16.mxu0 %v13026_v1  ;;  %7754 = vmatpush3.bf16.msra.mxu1 %v8894_v16  ;;  %v8901_v1 = vld [vmem:[%s13404_s4 + $0x310] sm:$0xff]  }
 0x68c   :  { %6741 = vmatprep.mubr.bf16.mxu1 %v13030_v57  ;;  %7733 = vmatprep.subr.bf16.mxu0 %v8895_v3  ;;  %v8903_v57 = vld [vmem:[%s13404_s4 + $0x358] sm:$0xff]  }
 0x68d   :  { %7755 = vmatprep.subr.bf16.mxu1 %v8896_v56 }
 0x68e   :  { %7734 = vmatpush3.bf16.msra.mxu0 %v8897_v18 }
 0x68f   :  { %7756 = vmatpush3.bf16.msra.mxu1 %v8898_v50  ;;  %7735 = vmatprep.subr.bf16.mxu0 %v8899_v29 }
 0x690   :  { %7757 = vmatprep.subr.bf16.mxu1 %v8900_v2 }
 0x692   :  { %7736 = vmatpush3.bf16.msra.mxu0 %v8901_v1 }
 0x693   :  { %7758 = vmatpush3.bf16.msra.mxu1 %v8902_v34  ;;  %7737 = vmatprep.subr.bf16.mxu0 %v8903_v57 }
 0x694   :  { %7759 = vmatprep.subr.bf16.mxu1 %v8904_v15 }
 0x696   :  { %7738 = vmatpush3.bf16.msra.mxu0 %v8905_v49 }
 0x697   :  { %7760 = vmatpush3.bf16.msra.mxu1 %v8906_v33  ;;  %7739 = vmatprep.subr.bf16.mxu0 %v8907_v0 }
 0x698   :  { %7761 = vmatprep.subr.bf16.mxu1 %v8908_v8 }
 0x69a   :  { %7740 = vmatpush3.bf16.msra.mxu0 %v8909_v37 }
 0x69b   :  { %7762 = vmatpush3.bf16.msra.mxu1 %v8910_v44  ;;  %7741 = vmatprep.subr.bf16.mxu0 %v8911_v51 }
 0x69c   :  { %7763 = vmatprep.subr.bf16.mxu1 %v8912_v31 }
 0x69e   :  { %7742 = vmatpush3.bf16.msra.mxu0 %v8913_v40 }
 0x69f   :  { %7764 = vmatpush3.bf16.msra.mxu1 %v8914_v48  ;;  %7743 = vmatprep.subr.bf16.mxu0 %v8915_v25 }
 0x6a0   :  { %7765 = vmatprep.subr.bf16.mxu1 %v8916_v41 }
 0x6a2   :  { %7744 = vmatpush3.bf16.msra.mxu0 %v8917_v52 }
 0x6a3   :  { %7766 = vmatpush3.bf16.msra.mxu1 %v8918_v43  ;;  %7745 = vmatprep.subr.bf16.mxu0 %v8919_v39 }
 0x6a4   :  { %7767 = vmatprep.subr.bf16.mxu1 %v8920_v14 }
 0x6a6   :  { %7746 = vmatpush3.bf16.msra.mxu0 %v8921_v55 }
 0x6a7   :  { %7768 = vmatpush3.bf16.msra.mxu1 %v8922_v6  ;;  %7793 = vmatprep.subr.bf16.mxu0 %v13943_v38 }
 0x6a8   :  { %7813 = vmatprep.subr.bf16.mxu1 %v13943_v38 }
 0x6a9   :  { %6702 = vmatmul.mubr.bf16.vlgmr.msra.gmra.mrb[84].mxu0 %v13051_v23  ;;  %v8926_v23 = vld [vmem:[%s13406_s6 + $0x18] sm:$0xff]  }
 0x6aa   :  { %6742 = vmatmul.mubr.bf16.vlgmr.msra.gmra.mrb[84].mxu1 %v13055_v17  ;;  %7794 = vmatpush3.bf16.msra.mxu0 %v8923_v62  ;;  %v8927_v17 = vld [vmem:[%s13406_s6 + $0x20] sm:$0xff]  }
 0x6ab   :  { %7795 = vmatprep.subr.bf16.mxu0 %v13943_v38  ;;  %7809 = vmatprep.mubr.msk.bf16.mxu0 %vm8985_vm2, %v13943_v38 }
 0x6ac   :  { %7829 = vmatprep.mubr.msk.bf16.mxu1 %vm8985_vm2, %v13943_v38  ;;  %7814 = vmatpush3.bf16.msra.mxu1 %v8931_v54 }
 0x6ad   :  { %7815 = vmatprep.subr.bf16.mxu1 %v13943_v38 }
 0x6ae   :  { %7796 = vmatpush3.bf16.msra.mxu0 %v8924_v45 }
 0x6af   :  { %7797 = vmatprep.subr.bf16.mxu0 %v13943_v38 }
 0x6b0   :  { %7816 = vmatpush3.bf16.msra.mxu1 %v8932_v26 }
 0x6b1   :  { %7817 = vmatprep.subr.bf16.mxu1 %v13943_v38 }
 0x6b2   :  { %7798 = vmatpush3.bf16.msra.mxu0 %v8925_v32  ;;  %v8937_v32 = vld [vmem:[%s13408_s8 + $0x30] sm:$0xff]  }
 0x6b3   :  { %7799 = vmatprep.subr.bf16.mxu0 %v13943_v38 }
 0x6b4   :  { %7818 = vmatpush3.bf16.msra.mxu1 %v8933_v10 }
 0x6b5   :  { %7819 = vmatprep.subr.bf16.mxu1 %v13943_v38 }
 0x6b6   :  { %7800 = vmatpush3.bf16.msra.mxu0 %v8926_v23  ;;  %v8938_v23 = vld [vmem:[%s13408_s8 + $0x38] sm:$0xff]   ;;  %s8986_s8 = smov [#allocation2]  }
 0x6b7   :  { %7801 = vmatprep.subr.bf16.mxu0 %v13943_v38  ;;  %s6982_s0 = sshll.u32 %s8986_s8, 4  ;;  %s6983_s0 = int_to_ptr.vmem [resolvable:$true] %s6982_s0 }
 0x6b8   :  { %7820 = vmatpush3.bf16.msra.mxu1 %v8934_v20  ;;  %p8947_p1 = scmp.lt.s32.totalorder %s6983_s0, %s6983_s0 }
 0x6b9   :  { %7821 = vmatprep.subr.bf16.mxu1 %v13943_v38 }
 0x6ba   :  { %7802 = vmatpush3.bf16.msra.mxu0 %v8927_v17  ;;  %v7449_v17 = vld [vmem:[%s13407_s7] ss:$0 sm:$0xff]  ;;  %s8942_s7 = scalar_lea.vmem %s6983_s0, 32 }
 0x6bb   :  { %7803 = vmatprep.subr.bf16.mxu0 %v13943_v38  ;;  %p8943_p0 = scmp.ne.s32.totalorder %s6983_s0, %s8942_s7  ;;  %p8948_p2 = scmp.lt.s32.totalorder %s8942_s7, %s8942_s7 }
 0x6bc   :  { %7822 = vmatpush3.bf16.msra.mxu1 %v8935_v4  ;;  %v7458_v4 = vld [vmem:[%s13409_s9] ss:$0 sm:$0xff] }
 0x6bd   :  { %7823 = vmatprep.subr.bf16.mxu1 %v13943_v38  ;;  %p8949_p3 = por %p8948_p2, %p8947_p1 }
 0x6be   :  { %7804 = vmatpush3.bf16.msra.mxu0 %v8928_v27 }
 0x6bf   :  { %7805 = vmatprep.subr.bf16.mxu0 %v13943_v38  ;;  %p8950_p4 = pnand %p8949_p3, %p8943_p0 }
 0x6c0   :  { %7824 = vmatpush3.bf16.msra.mxu1 %v8936_v58 }
 0x6c1   :  { %7825 = vmatprep.subr.bf16.mxu1 %v13943_v38 }
 0x6c2   :  { %7806 = vmatpush3.bf16.msra.mxu0 %v8929_v63 }
 0x6c3   :  { %7807 = vmatprep.subr.bf16.mxu0 %v13943_v38 }
 0x6c4   :  { %7826 = vmatpush3.bf16.msra.mxu1 %v8937_v32 }
 0x6c5   :  { %7827 = vmatprep.subr.bf16.mxu1 %v13943_v38 }
 0x6c6   :  { %7808 = vmatpush3.bf16.msra.mxu0 %v8930_v21 }
 0x6c8   :  { %7828 = vmatpush3.bf16.msra.mxu1 %v8938_v23 }
 0x71c   :  { %v7615_v11 = vpop.f32.mrb[72].mxu0  ;;  %v7637_v36 = vpop.f32.mrb[72].mxu1 }
 0x71d   :  { %v7616_v59 = vpop.f32.mrb[73].mxu0  ;;  %v7638_v46 = vpop.f32.mrb[73].mxu1 }
 0x71e   :  { %v7617_v22 = vadd.f32 %v7616_v59, %v7615_v11  ;;  %v7639_v7 = vadd.f32 %v7638_v46, %v7637_v36  ;;  %v7618_v28 = vpop.f32.mrb[74].mxu0  ;;  %v7640_v53 = vpop.f32.mrb[74].mxu1 }
 0x71f   :  { %v7619_v30 = vpop.f32.mrb[75].mxu0  ;;  %v7641_v47 = vpop.f32.mrb[75].mxu1 }
 0x720   :  { %v6464_v61 = vadd.f32 %v7617_v22, %v7320_v12 }
 0x722   :  { %v6504_v60 = vadd.f32 %v7639_v7, %v6464_v61 }
 0x73c   :  { %v7659_v9 = vpop.f32.mrb[76].mxu0  ;;  %v7681_v42 = vpop.f32.mrb[76].mxu1 }
 0x73d   :  { %v7660_v19 = vpop.f32.mrb[77].mxu0  ;;  %v7682_v5 = vpop.f32.mrb[77].mxu1 }
 0x73e   :  { %v7661_v13 = vadd.f32 %v7660_v19, %v7659_v9  ;;  %v7683_v24 = vadd.f32 %v7682_v5, %v7681_v42  ;;  %v7662_v35 = vpop.f32.mrb[78].mxu0  ;;  %v7684_v16 = vpop.f32.mrb[78].mxu1 }
 0x73f   :  { %v7663_v3 = vpop.f32.mrb[79].mxu0  ;;  %v7685_v56 = vpop.f32.mrb[79].mxu1 }
 0x740   :  { %v6544_v18 = vadd.f32 %v7661_v13, %v6504_v60 }
 0x742   :  { %v6584_v50 = vadd.f32 %v7683_v24, %v6544_v18 }
 0x75c   :  { %v7703_v29 = vpop.f32.mrb[80].mxu0 }
 0x75d   :  { %v7725_v2 = vpop.f32.mrb[80].mxu1  ;;  %v7704_v1 = vpop.f32.mrb[81].mxu0 }
 0x75e   :  { %v7705_v34 = vadd.f32 %v7704_v1, %v7703_v29  ;;  %v7726_v57 = vpop.f32.mrb[81].mxu1  ;;  %v7706_v15 = vpop.f32.mrb[82].mxu0 }
 0x75f   :  { %v7727_v49 = vadd.f32 %v7726_v57, %v7725_v2  ;;  %v7728_v33 = vpop.f32.mrb[82].mxu1  ;;  %v7707_v0 = vpop.f32.mrb[83].mxu0 }
 0x760   :  { %v6624_v8 = vadd.f32 %v7705_v34, %v6584_v50  ;;  %v7729_v37 = vpop.f32.mrb[83].mxu1 }
 0x762   :  { %v6664_v44 = vadd.f32 %v7727_v49, %v6624_v8 }
 0x77c   :  { %v7747_v51 = vpop.f32.mrb[84].mxu0 }
 0x77d   :  { %v7769_v31 = vpop.f32.mrb[84].mxu1  ;;  %v7748_v40 = vpop.f32.mrb[85].mxu0 }
 0x77e   :  { %v7749_v48 = vadd.f32 %v7748_v40, %v7747_v51  ;;  %v7770_v25 = vpop.f32.mrb[85].mxu1  ;;  %v7750_v41 = vpop.f32.mrb[86].mxu0 }
 0x77f   :  { %v7771_v52 = vadd.f32 %v7770_v25, %v7769_v31  ;;  %v7772_v43 = vpop.f32.mrb[86].mxu1  ;;  %v7751_v39 = vpop.f32.mrb[87].mxu0 }
 0x780   :  { %v6704_v14 = vadd.f32 %v7749_v48, %v6664_v44  ;;  %v7773_v55 = vpop.f32.mrb[87].mxu1 }
 0x782   :  { %v6744_v6 = vadd.f32 %v7771_v52, %v6704_v14 }
 0x784   :  { %v6749_v62 = vmax.f32 %v6744_v6, 0.0 }
 0x786   :  { %v6750_v45 = vpack.c.bf16 %v6749_v62, %v6749_v62 }
 0x788   :  { %7810 = vmatmul.mubr.bf16.vlgmr.msra.gmra.mrb[88].mxu0 %v6750_v45 }
 0x85b   :  { %v6856_v27 = vpop.f32.mrb[88].mxu0 }
 0x85c   :  { %v6857_v63 = vadd.f32 %v7449_v17, %v6856_v27  ;;  %v7811_v21 = vpop.f32.mrb[89].mxu0 }
 0x85d   :  { %v6859_v54 = vpop.f32.mrb[90].mxu0 }
 0x85e   :  { %v6862_v26 = vmax.f32 %v6857_v63, 0.0  ;;  %v7812_v10 = vpop.f32.mrb[91].mxu0 }
 0x860   :  { %v6863_v20 = vpack.c.bf16 %v6862_v26, %v6862_v26 }
 0x862   :  { %7830 = vmatmul.mubr.bf16.vlgmr.msra.gmra.mrb[88].mxu1 %v6863_v20 }
 0x935   :  { %v6969_v38 = vpop.f32.mrb[88].mxu1 }
 0x936   :  { %v6970_v58 = vadd.f32 %v7458_v4, %v6969_v38  ;;  %v7831_v11 = vpop.f32.mrb[89].mxu1 }
 0x937   :  { %v6972_v36 = vpop.f32.mrb[90].mxu1 }
 0x938   :  { %6975 = vst [vmem:[#allocation2] sm:$0x3] %v6970_v58  ;;  %v7832_v12 = vpop.f32.mrb[91].mxu1 }
 0x939   :  { %8953 = shalt.err (!%p8950_p4)
}
 0x93a   :  { %s8954_s9 = scalar_lea.hbm %s13410_s10, 32 }
 0x93b   :  { %p8955_p5 = scmp.ne.s32.totalorder %s13410_s10, %s8954_s9  ;;  %p8958_p6 = scmp.lt.u32.totalorder %s8954_s9, %s13410_s10 }
 0x93d   :  { %p8960_p7 = pnand %p8958_p6, %p8955_p5 }
 0x93f   :  { %8963 = shalt.err (!%p8960_p7)
}
 0x940   :  { %6985 = dma.vmem_to_hbm [thread:$0]  %s6983_s0, 32, %s13410_s10, [#allocation3]  }
 0x941   :  { %8964 = dma.done.wait [#allocation3], 32  }
 0x942   :  { %8965 = vsyncadd [#allocation3], 4294967264 }
 0x943   :  { %6989 = vsyncpa [#allocation3], 1 }

</bundles_post_ra>
